<compile_context>
chip_gen: v6e
topology: v6e:2x2x1
jax: 0.10.0
libtpu: 0.0.40
codegen_flags: <defaults>
</compile_context>

<pallas_src>
import functools
import math

import jax
import jax.numpy as jnp
from jax.experimental import pallas as pl
from jax.experimental.pallas import tpu as pltpu

KH = KW = 3
PAD = KH // 2
BBOX_CLIP = math.log(1000.0 / 16.0)  # detectron-style clamp on dw/dh


# -----------------------------------------------------------------------------
# Fused kernel: backbone -> FPN -> RPN head -> box decode, one image per step.
# -----------------------------------------------------------------------------
def _rcnn_fused_kernel(x_ref, mask_ref, anchors_ref,
                       w1_ref, b1_ref, w2_ref, b2_ref,
                       wl_ref, bl_ref, wo_ref, bo_ref,
                       wr_ref, br_ref, wh_ref, bh_ref,
                       scores_ref, boxes_ref,
                       buf_ref, col_ref,
                       *, H, W, A):
    f32, bf16 = jnp.float32, jnp.bfloat16
    wp = W + 2 * PAD
    npos = (H + 2 * PAD) * wp
    guard = wp + PAD                       # largest |tap shift| in flat layout
    c_in = x_ref.shape[1]
    c_mid = w1_ref.shape[0]
    c_feat = w2_ref.shape[0]

    mask = mask_ref[...]                   # (1, npos): 1 inside image, 0 on pad ring

    def conv3x3(cin, w_ref, b_ref, relu):
        # Transposed im2col: copy the 9 shifted views of the flat padded
        # activation into col_ref (K stacked on sublanes), then ONE MXU matmul
        # with K = 9*cin, bf16 operands, f32 accumulation.
        for kh in range(KH):
            for kw in range(KW):
                tap = kh * KW + kw
                shift = (kh - PAD) * wp + (kw - PAD)
                col_ref[tap * cin:(tap + 1) * cin, :] = (
                    buf_ref[0:cin, guard + shift:guard + shift + npos])
        xcol = col_ref[0:KH * KW * cin, :]
        y = jnp.dot(w_ref[...].astype(bf16), xcol.astype(bf16),
                    preferred_element_type=f32)
        y = y + b_ref[...]
        return jnp.maximum(y, 0.0) if relu else y

    def conv1x1(x, w_ref, b_ref, relu):
        y = jnp.dot(w_ref[...].astype(bf16), x.astype(bf16),
                    preferred_element_type=f32) + b_ref[...]
        return jnp.maximum(y, 0.0) if relu else y

    def to_buf(val, cout):
        # write back with the pad ring forced to zero -> acts as conv padding
        buf_ref[0:cout, guard:guard + npos] = val * mask

    # ---- init: zero guard + pad ring once, drop the input image planes in ---
    buf_ref[...] = jnp.zeros_like(buf_ref)
    buf_ref[0:c_in, guard:guard + npos] = x_ref[0]

    # ---- backbone: 2 x (3x3 conv + ReLU) -------------------------------------
    to_buf(conv3x3(c_in, w1_ref, b1_ref, relu=True), c_mid)
    f2 = conv3x3(c_mid, w2_ref, b2_ref, relu=True)            # (c_feat, npos)

    # ---- FPN: 1x1 lateral + 3x3 output conv ----------------------------------
    to_buf(conv1x1(f2, wl_ref, bl_ref, relu=False), c_feat)
    to_buf(conv3x3(c_feat, wo_ref, bo_ref, relu=False), c_feat)

    # ---- RPN head: 3x3 conv + ReLU, fused 1x1 (objectness | bbox deltas) -----
    t = conv3x3(c_feat, wr_ref, br_ref, relu=True)            # (c_feat, npos)
    head = conv1x1(t, wh_ref, bh_ref, relu=False)             # (>=5A, npos)

    scores_ref[0] = jax.nn.sigmoid(head[0:A, :])              # (A, npos)

    # ---- anchor decode (clamped, detectron-style), vectorized over (A, npos) -
    ax1, ay1 = anchors_ref[0], anchors_ref[1]
    ax2, ay2 = anchors_ref[2], anchors_ref[3]
    aw, ah = ax2 - ax1, ay2 - ay1
    acx, acy = ax1 + 0.5 * aw, ay1 + 0.5 * ah
    dx = head[A:2 * A, :]
    dy = head[2 * A:3 * A, :]
    dw = jnp.minimum(head[3 * A:4 * A, :], BBOX_CLIP)
    dh = jnp.minimum(head[4 * A:5 * A, :], BBOX_CLIP)
    pcx = dx * aw + acx
    pcy = dy * ah + acy
    pw = jnp.exp(dw) * aw
    ph = jnp.exp(dh) * ah
    boxes_ref[0, 0] = pcx - 0.5 * pw
    boxes_ref[0, 1] = pcy - 0.5 * ph
    boxes_ref[0, 2] = pcx + 0.5 * pw
    boxes_ref[0, 3] = pcy + 0.5 * ph


# -----------------------------------------------------------------------------
# Wrapper
# -----------------------------------------------------------------------------
class GeneralizedRCNNPallas:
    """RETINANET_ON inference path of GeneralizedRCNN as one fused Pallas kernel."""

    def __init__(self, key, in_ch=4, mid_ch=16, feat_ch=32, num_anchors=3,
                 height=16, width=16):
        self.in_ch, self.mid, self.feat, self.A = in_ch, mid_ch, feat_ch, num_anchors
        self.H, self.W = height, width
        self.in_pad = ((in_ch + 7) // 8) * 8       # sublane-align input channels
        f32 = jnp.float32
        s = 0.1
        ks = jax.random.split(key, 12)
        head = 5 * num_anchors                     # [A objectness | 4A deltas (c*A+a)]
        # reference-layout parameters (HWIO convs, f32)
        self.w1 = (s * jax.random.normal(ks[0], (3, 3, in_ch, mid_ch))).astype(f32)
        self.b1 = (s * jax.random.normal(ks[1], (mid_ch,))).astype(f32)
        self.w2 = (s * jax.random.normal(ks[2], (3, 3, mid_ch, feat_ch))).astype(f32)
        self.b2 = (s * jax.random.normal(ks[3], (feat_ch,))).astype(f32)
        self.wl = (s * jax.random.normal(ks[4], (1, 1, feat_ch, feat_ch))).astype(f32)
        self.bl = (s * jax.random.normal(ks[5], (feat_ch,))).astype(f32)
        self.wo = (s * jax.random.normal(ks[6], (3, 3, feat_ch, feat_ch))).astype(f32)
        self.bo = (s * jax.random.normal(ks[7], (feat_ch,))).astype(f32)
        self.wr = (s * jax.random.normal(ks[8], (3, 3, feat_ch, feat_ch))).astype(f32)
        self.br = (s * jax.random.normal(ks[9], (feat_ch,))).astype(f32)
        self.wh = (s * jax.random.normal(ks[10], (1, 1, feat_ch, head))).astype(f32)
        self.bh = (s * jax.random.normal(ks[11], (head,))).astype(f32)
        self._prepare_kernel_params()

    # (KH, KW, Cin, Cout) -> (Cout, KH*KW*Cin) im2col weight, bf16 (MXU native)
    @staticmethod
    def _conv_w(w_hwio, cin_pad=None):
        kh, kw, cin, cout = w_hwio.shape
        if cin_pad is not None and cin_pad != cin:
            w_hwio = jnp.pad(w_hwio, ((0, 0), (0, 0), (0, cin_pad - cin), (0, 0)))
            cin = cin_pad
        return jnp.transpose(w_hwio, (3, 0, 1, 2)).reshape(
            cout, kh * kw * cin).astype(jnp.bfloat16)

    def _prepare_kernel_params(self):
        f32, bf16 = jnp.float32, jnp.bfloat16
        col = lambda b: b.reshape(-1, 1).astype(f32)
        self.kw1 = self._conv_w(self.w1, self.in_pad)
        self.kw2 = self._conv_w(self.w2)
        self.kwl = self.wl[0, 0].T.astype(bf16)                  # (feat, feat)
        self.kwo = self._conv_w(self.wo)
        self.kwr = self._conv_w(self.wr)
        self.kb1, self.kb2 = col(self.b1), col(self.b2)
        self.kbl, self.kbo, self.kbr = col(self.bl), col(self.bo), col(self.br)
        # fused objectness + bbox head; pad rows to a sublane multiple
        head = 5 * self.A
        head_pad = ((head + 7) // 8) * 8
        wh2 = self.wh[0, 0].T                                    # (5A, feat)
        bh2 = self.bh.reshape(-1, 1)
        if head_pad != head:
            wh2 = jnp.pad(wh2, ((0, head_pad - head), (0, 0)))
            bh2 = jnp.pad(bh2, ((0, head_pad - head), (0, 0)))
        self.kwh = wh2.astype(bf16)
        self.kbh = bh2.astype(f32)

    def _anchors_grid(self):
        # (4, A, H, W): [x1, y1, x2, y2] square anchors centred on each cell
        f32 = jnp.float32
        sizes = jnp.array([2.0, 4.0, 8.0, 16.0, 32.0], f32)[: self.A]
        ys = jnp.arange(self.H, dtype=f32) + 0.5
        xs = jnp.arange(self.W, dtype=f32) + 0.5
        cy, cx = jnp.meshgrid(ys, xs, indexing="ij")             # (H, W)
        half = 0.5 * sizes.reshape(self.A, 1, 1)
        return jnp.stack([cx[None] - half, cy[None] - half,
                          cx[None] + half, cy[None] + half], axis=0)

    def forward(self, images_nchw):
        f32 = jnp.float32
        B, C, Hi, Wi = images_nchw.shape
        assert (C, Hi, Wi) == (self.in_ch, self.H, self.W)
        H, W, A = self.H, self.W, self.A
        hp, wp = H + 2 * PAD, W + 2 * PAD
        npos = hp * wp
        guard = wp + PAD
        bufw = npos + 2 * guard
        cbuf = max(self.feat, self.mid, self.in_pad)

        # pad ONCE (spatial halo + channel alignment); NCHW is already
        # channel-planar, so just flatten the padded spatial grid.
        x = jnp.pad(images_nchw.astype(f32),
                    ((0, 0), (0, self.in_pad - C), (PAD, PAD), (PAD, PAD)))
        x = x.reshape(B, self.in_pad, npos)

        interior = jnp.pad(jnp.ones((H, W), f32),
                           ((PAD, PAD), (PAD, PAD))).reshape(1, npos)
        anchors = jnp.pad(self._anchors_grid(),
                          ((0, 0), (0, 0), (PAD, PAD), (PAD, PAD))).reshape(4, A, npos)

        kernel = functools.partial(_rcnn_fused_kernel, H=H, W=W, A=A)

        def _full(a):  # whole-array block, constant index map
            zeros = (0,) * a.ndim
            return pl.BlockSpec(a.shape, lambda b, _z=zeros: _z)

        weight_args = [self.kw1, self.kb1, self.kw2, self.kb2,
                       self.kwl, self.kbl, self.kwo, self.kbo,
                       self.kwr, self.kbr, self.kwh, self.kbh]

        scores, boxes = pl.pallas_call(
            kernel,
            out_shape=(jax.ShapeDtypeStruct((B, A, npos), f32),
                       jax.ShapeDtypeStruct((B, 4, A, npos), f32)),
            grid=(B,),
            in_specs=[pl.BlockSpec((1, self.in_pad, npos), lambda b: (b, 0, 0)),
                      _full(interior), _full(anchors)]
                     + [_full(a) for a in weight_args],
            out_specs=(pl.BlockSpec((1, A, npos), lambda b: (b, 0, 0)),
                       pl.BlockSpec((1, 4, A, npos), lambda b: (b, 0, 0, 0))),
            scratch_shapes=[pltpu.VMEM((cbuf, bufw), f32),
                            pltpu.VMEM((KH * KW * cbuf, npos), f32)],
            compiler_params=pltpu.CompilerParams(
                dimension_semantics=("parallel",)),
        )(x, interior, anchors, *weight_args)

        # drop the pad ring; cheap reshapes + a single transpose at the end
        scores = scores.reshape(B, A, hp, wp)[:, :, PAD:PAD + H, PAD:PAD + W]
        boxes = boxes.reshape(B, 4, A, hp, wp)[..., PAD:PAD + H, PAD:PAD + W]
        return {"boxes": boxes.reshape(B, 4, A * H * W).transpose(0, 2, 1),
                "scores": scores.reshape(B, A * H * W)}


# -----------------------------------------------------------------------------
# Pure-JAX (XLA) reference of the same path, for a numerical cross-check.
# -----------------------------------------------------------------------------
def reference_forward(model, images_nchw):
    f32, bf16 = jnp.float32, jnp.bfloat16

    def conv(x, w, b, relu):
        y = jax.lax.conv_general_dilated(
            x.astype(bf16), w.astype(bf16), window_strides=(1, 1),
            padding="SAME", dimension_numbers=("NCHW", "HWIO", "NCHW"),
            preferred_element_type=f32)
        y = y + b.reshape(1, -1, 1, 1).astype(f32)
        return jnp.maximum(y, 0.0) if relu else y

    A, H, W = model.A, model.H, model.W
    x = images_nchw.astype(f32)
    f = conv(x, model.w1, model.b1, True)
    f = conv(f, model.w2, model.b2, True)
    p = conv(f, model.wl, model.bl, False)
    p = conv(p, model.wo, model.bo, False)
    t = conv(p, model.wr, model.br, True)
    hd = conv(t, model.wh, model.bh, False)                 # (B, 5A, H, W)

    B = x.shape[0]
    scores = jax.nn.sigmoid(hd[:, :A])                      # (B, A, H, W)
    deltas = hd[:, A:].reshape(B, 4, A, H, W)               # channel = c*A + a

    anc = model._anchors_grid()                             # (4, A, H, W)
    aw, ah = anc[2] - anc[0], anc[3] - anc[1]
    acx, acy = anc[0] + 0.5 * aw, anc[1] + 0.5 * ah
    dx, dy = deltas[:, 0], deltas[:, 1]
    dw = jnp.minimum(deltas[:, 2], BBOX_CLIP)
    dh = jnp.minimum(deltas[:, 3], BBOX_CLIP)
    pcx = dx * aw + acx
    pcy = dy * ah + acy
    pw = jnp.exp(dw) * aw
    ph = jnp.exp(dh) * ah
    boxes = jnp.stack([pcx - 0.5 * pw, pcy - 0.5 * ph,
                       pcx + 0.5 * pw, pcy + 0.5 * ph], axis=1)   # (B,4,A,H,W)
    return {"boxes": boxes.reshape(B, 4, -1).transpose(0, 2, 1),
            "scores": scores.reshape(B, -1)}


if __name__ == "__main__":
    key = jax.random.PRNGKey(0)
    k_model, k_img = jax.random.split(key)
    model = GeneralizedRCNNPallas(k_model, in_ch=4, mid_ch=16, feat_ch=32,
                                  num_anchors=3, height=16, width=16)
    images = jax.random.normal(k_img, (2, 4, 16, 16), jnp.float32)   # NCHW

    out = jax.jit(model.forward)(images)
    jax.block_until_ready(out)

    assert out["boxes"].shape == (2, 16 * 16 * 3, 4)
    assert out["scores"].shape == (2, 16 * 16 * 3)

    ref = reference_forward(model, images)
    assert bool(jnp.allclose(out["scores"], ref["scores"], rtol=2e-2, atol=2e-2)), \
        "scores mismatch vs pure-JAX reference"
    assert bool(jnp.allclose(out["boxes"], ref["boxes"], rtol=2e-2, atol=2e-2)), \
        "boxes mismatch vs pure-JAX reference"
    print("KERNEL_OK")
</pallas_src>

<mosaic_0001>
module attributes {stable_mosaic.version = 11 : i64} {
  func.func @_rcnn_fused_kernel(%arg0: i32, %arg1: memref<1x8x324xf32, #tpu.memory_space<vmem>>, %arg2: memref<1x324xf32, #tpu.memory_space<vmem>>, %arg3: memref<4x3x324xf32, #tpu.memory_space<vmem>>, %arg4: memref<16x72xbf16, #tpu.memory_space<vmem>>, %arg5: memref<16x1xf32, #tpu.memory_space<vmem>>, %arg6: memref<32x144xbf16, #tpu.memory_space<vmem>>, %arg7: memref<32x1xf32, #tpu.memory_space<vmem>>, %arg8: memref<32x32xbf16, #tpu.memory_space<vmem>>, %arg9: memref<32x1xf32, #tpu.memory_space<vmem>>, %arg10: memref<32x288xbf16, #tpu.memory_space<vmem>>, %arg11: memref<32x1xf32, #tpu.memory_space<vmem>>, %arg12: memref<32x288xbf16, #tpu.memory_space<vmem>>, %arg13: memref<32x1xf32, #tpu.memory_space<vmem>>, %arg14: memref<16x32xbf16, #tpu.memory_space<vmem>>, %arg15: memref<16x1xf32, #tpu.memory_space<vmem>>, %arg16: memref<1x3x324xf32, #tpu.memory_space<vmem>>, %arg17: memref<1x4x3x324xf32, #tpu.memory_space<vmem>>, %arg18: memref<32x362xf32, #tpu.memory_space<vmem>>, %arg19: memref<288x324xf32, #tpu.memory_space<vmem>>) attributes {dimension_semantics = [#tpu.dimension_semantics<parallel>], iteration_bounds = array<i64: 2>, scalar_prefetch = 0 : i64, scratch_operands = 2 : i64, tpu.core_type = #tpu.core_type<tc>, window_params = [{transform_indices = @transform_0, window_bounds = array<i64: 1, 8, 324>}, {pipeline_mode = #tpu.pipeline_mode<synchronous>, transform_indices = @transform_1, window_bounds = array<i64: 1, 324>}, {pipeline_mode = #tpu.pipeline_mode<synchronous>, transform_indices = @transform_2, window_bounds = array<i64: 4, 3, 324>}, {pipeline_mode = #tpu.pipeline_mode<synchronous>, transform_indices = @transform_3, window_bounds = array<i64: 16, 72>}, {pipeline_mode = #tpu.pipeline_mode<synchronous>, transform_indices = @transform_4, window_bounds = array<i64: 16, 1>}, {pipeline_mode = #tpu.pipeline_mode<synchronous>, transform_indices = @transform_5, window_bounds = array<i64: 32, 144>}, {pipeline_mode = #tpu.pipeline_mode<synchronous>, transform_indices = @transform_6, window_bounds = array<i64: 32, 1>}, {pipeline_mode = #tpu.pipeline_mode<synchronous>, transform_indices = @transform_7, window_bounds = array<i64: 32, 32>}, {pipeline_mode = #tpu.pipeline_mode<synchronous>, transform_indices = @transform_8, window_bounds = array<i64: 32, 1>}, {pipeline_mode = #tpu.pipeline_mode<synchronous>, transform_indices = @transform_9, window_bounds = array<i64: 32, 288>}, {pipeline_mode = #tpu.pipeline_mode<synchronous>, transform_indices = @transform_10, window_bounds = array<i64: 32, 1>}, {pipeline_mode = #tpu.pipeline_mode<synchronous>, transform_indices = @transform_11, window_bounds = array<i64: 32, 288>}, {pipeline_mode = #tpu.pipeline_mode<synchronous>, transform_indices = @transform_12, window_bounds = array<i64: 32, 1>}, {pipeline_mode = #tpu.pipeline_mode<synchronous>, transform_indices = @transform_13, window_bounds = array<i64: 16, 32>}, {pipeline_mode = #tpu.pipeline_mode<synchronous>, transform_indices = @transform_14, window_bounds = array<i64: 16, 1>}, {transform_indices = @transform_15, window_bounds = array<i64: 1, 3, 324>}, {transform_indices = @transform_16, window_bounds = array<i64: 1, 4, 3, 324>}]} {
    %c0 = arith.constant 0 : index
    %c0_0 = arith.constant 0 : index
    %0 = vector.load %arg2[%c0, %c0_0] : memref<1x324xf32, #tpu.memory_space<vmem>>, vector<1x324xf32>
    %cst = arith.constant 0.000000e+00 : f32
    %1 = vector.broadcast %cst : f32 to vector<32x362xf32>
    %c0_1 = arith.constant 0 : index
    %c0_2 = arith.constant 0 : index
    %2 = vector.load %arg18[%c0_1, %c0_2] : memref<32x362xf32, #tpu.memory_space<vmem>>, vector<32x362xf32>
    tpu.vector_store %arg18[%c0_1, %c0_2], %1 {strides = array<i32>} : memref<32x362xf32, #tpu.memory_space<vmem>>, vector<32x362xf32>,
    %c0_3 = arith.constant 0 : index
    %c0_4 = arith.constant 0 : index
    %c0_5 = arith.constant 0 : index
    %3 = vector.load %arg1[%c0_3, %c0_4, %c0_5] : memref<1x8x324xf32, #tpu.memory_space<vmem>>, vector<1x8x324xf32>
    %4 = vector.shape_cast %3 : vector<1x8x324xf32> to vector<8x324xf32>
    %c0_6 = arith.constant 0 : index
    %c19 = arith.constant 19 : index
    %5 = vector.load %arg18[%c0_6, %c19] : memref<32x362xf32, #tpu.memory_space<vmem>>, vector<8x324xf32>
    tpu.vector_store %arg18[%c0_6, %c19], %4 {strides = array<i32>} : memref<32x362xf32, #tpu.memory_space<vmem>>, vector<8x324xf32>,
    %c0_7 = arith.constant 0 : index
    %c0_8 = arith.constant 0 : index
    %6 = vector.load %arg18[%c0_7, %c0_8] : memref<32x362xf32, #tpu.memory_space<vmem>>, vector<8x324xf32>
    %c0_9 = arith.constant 0 : index
    %c0_10 = arith.constant 0 : index
    %7 = vector.load %arg19[%c0_9, %c0_10] : memref<288x324xf32, #tpu.memory_space<vmem>>, vector<8x324xf32>
    tpu.vector_store %arg19[%c0_9, %c0_10], %6 {strides = array<i32>} : memref<288x324xf32, #tpu.memory_space<vmem>>, vector<8x324xf32>,
    %c0_11 = arith.constant 0 : index
    %c1 = arith.constant 1 : index
    %8 = vector.load %arg18[%c0_11, %c1] : memref<32x362xf32, #tpu.memory_space<vmem>>, vector<8x324xf32>
    %c8 = arith.constant 8 : index
    %c0_12 = arith.constant 0 : index
    %9 = vector.load %arg19[%c8, %c0_12] : memref<288x324xf32, #tpu.memory_space<vmem>>, vector<8x324xf32>
    tpu.vector_store %arg19[%c8, %c0_12], %8 {strides = array<i32>} : memref<288x324xf32, #tpu.memory_space<vmem>>, vector<8x324xf32>,
    %c0_13 = arith.constant 0 : index
    %c2 = arith.constant 2 : index
    %10 = vector.load %arg18[%c0_13, %c2] : memref<32x362xf32, #tpu.memory_space<vmem>>, vector<8x324xf32>
    %c16 = arith.constant 16 : index
    %c0_14 = arith.constant 0 : index
    %11 = vector.load %arg19[%c16, %c0_14] : memref<288x324xf32, #tpu.memory_space<vmem>>, vector<8x324xf32>
    tpu.vector_store %arg19[%c16, %c0_14], %10 {strides = array<i32>} : memref<288x324xf32, #tpu.memory_space<vmem>>, vector<8x324xf32>,
    %c0_15 = arith.constant 0 : index
    %c18 = arith.constant 18 : index
    %12 = vector.load %arg18[%c0_15, %c18] : memref<32x362xf32, #tpu.memory_space<vmem>>, vector<8x324xf32>
    %c24 = arith.constant 24 : index
    %c0_16 = arith.constant 0 : index
    %13 = vector.load %arg19[%c24, %c0_16] : memref<288x324xf32, #tpu.memory_space<vmem>>, vector<8x324xf32>
    tpu.vector_store %arg19[%c24, %c0_16], %12 {strides = array<i32>} : memref<288x324xf32, #tpu.memory_space<vmem>>, vector<8x324xf32>,
    %c0_17 = arith.constant 0 : index
    %c19_18 = arith.constant 19 : index
    %14 = vector.load %arg18[%c0_17, %c19_18] : memref<32x362xf32, #tpu.memory_space<vmem>>, vector<8x324xf32>
    %c32 = arith.constant 32 : index
    %c0_19 = arith.constant 0 : index
    %15 = vector.load %arg19[%c32, %c0_19] : memref<288x324xf32, #tpu.memory_space<vmem>>, vector<8x324xf32>
    tpu.vector_store %arg19[%c32, %c0_19], %14 {strides = array<i32>} : memref<288x324xf32, #tpu.memory_space<vmem>>, vector<8x324xf32>,
    %c0_20 = arith.constant 0 : index
    %c20 = arith.constant 20 : index
    %16 = vector.load %arg18[%c0_20, %c20] : memref<32x362xf32, #tpu.memory_space<vmem>>, vector<8x324xf32>
    %c40 = arith.constant 40 : index
    %c0_21 = arith.constant 0 : index
    %17 = vector.load %arg19[%c40, %c0_21] : memref<288x324xf32, #tpu.memory_space<vmem>>, vector<8x324xf32>
    tpu.vector_store %arg19[%c40, %c0_21], %16 {strides = array<i32>} : memref<288x324xf32, #tpu.memory_space<vmem>>, vector<8x324xf32>,
    %c0_22 = arith.constant 0 : index
    %c36 = arith.constant 36 : index
    %18 = vector.load %arg18[%c0_22, %c36] : memref<32x362xf32, #tpu.memory_space<vmem>>, vector<8x324xf32>
    %c48 = arith.constant 48 : index
    %c0_23 = arith.constant 0 : index
    %19 = vector.load %arg19[%c48, %c0_23] : memref<288x324xf32, #tpu.memory_space<vmem>>, vector<8x324xf32>
    tpu.vector_store %arg19[%c48, %c0_23], %18 {strides = array<i32>} : memref<288x324xf32, #tpu.memory_space<vmem>>, vector<8x324xf32>,
    %c0_24 = arith.constant 0 : index
    %c37 = arith.constant 37 : index
    %20 = vector.load %arg18[%c0_24, %c37] : memref<32x362xf32, #tpu.memory_space<vmem>>, vector<8x324xf32>
    %c56 = arith.constant 56 : index
    %c0_25 = arith.constant 0 : index
    %21 = vector.load %arg19[%c56, %c0_25] : memref<288x324xf32, #tpu.memory_space<vmem>>, vector<8x324xf32>
    tpu.vector_store %arg19[%c56, %c0_25], %20 {strides = array<i32>} : memref<288x324xf32, #tpu.memory_space<vmem>>, vector<8x324xf32>,
    %c0_26 = arith.constant 0 : index
    %c38 = arith.constant 38 : index
    %22 = vector.load %arg18[%c0_26, %c38] : memref<32x362xf32, #tpu.memory_space<vmem>>, vector<8x324xf32>
    %c64 = arith.constant 64 : index
    %c0_27 = arith.constant 0 : index
    %23 = vector.load %arg19[%c64, %c0_27] : memref<288x324xf32, #tpu.memory_space<vmem>>, vector<8x324xf32>
    tpu.vector_store %arg19[%c64, %c0_27], %22 {strides = array<i32>} : memref<288x324xf32, #tpu.memory_space<vmem>>, vector<8x324xf32>,
    %c0_28 = arith.constant 0 : index
    %c0_29 = arith.constant 0 : index
    %24 = vector.load %arg19[%c0_28, %c0_29] : memref<288x324xf32, #tpu.memory_space<vmem>>, vector<72x324xf32>
    %c0_30 = arith.constant 0 : index
    %c0_31 = arith.constant 0 : index
    %25 = vector.load %arg4[%c0_30, %c0_31] : memref<16x72xbf16, #tpu.memory_space<vmem>>, vector<16x72xbf16>
    %26 = arith.truncf %24 : vector<72x324xf32> to vector<72x324xbf16>
    %cst_32 = arith.constant dense<0.000000e+00> : vector<16x324xf32>
    %27 = tpu.matmul %25, %26, %cst_32 {dimension_numbers = #tpu.dot_dimension_numbers<[1], [0], [0], [1], [0, 0, 1, 1], [], []>} : vector<16x72xbf16>, vector<72x324xbf16>, vector<16x324xf32> -> vector<16x324xf32>
    %c0_33 = arith.constant 0 : index
    %c0_34 = arith.constant 0 : index
    %28 = vector.load %arg5[%c0_33, %c0_34] : memref<16x1xf32, #tpu.memory_space<vmem>>, vector<16x1xf32>
    %29 = vector.broadcast %28 : vector<16x1xf32> to vector<16x324xf32>
    %30 = arith.addf %27, %29 : vector<16x324xf32>
    %cst_35 = arith.constant 0.000000e+00 : f32
    %31 = vector.broadcast %cst_35 : f32 to vector<16x324xf32>
    %32 = arith.maximumf %30, %31 : vector<16x324xf32>
    %33 = vector.broadcast %0 : vector<1x324xf32> to vector<16x324xf32>
    %34 = arith.mulf %32, %33 : vector<16x324xf32>
    %c0_36 = arith.constant 0 : index
    %c19_37 = arith.constant 19 : index
    %35 = vector.load %arg18[%c0_36, %c19_37] : memref<32x362xf32, #tpu.memory_space<vmem>>, vector<16x324xf32>
    tpu.vector_store %arg18[%c0_36, %c19_37], %34 {strides = array<i32>} : memref<32x362xf32, #tpu.memory_space<vmem>>, vector<16x324xf32>,
    %c0_38 = arith.constant 0 : index
    %c0_39 = arith.constant 0 : index
    %36 = vector.load %arg18[%c0_38, %c0_39] : memref<32x362xf32, #tpu.memory_space<vmem>>, vector<16x324xf32>
    %c0_40 = arith.constant 0 : index
    %c0_41 = arith.constant 0 : index
    %37 = vector.load %arg19[%c0_40, %c0_41] : memref<288x324xf32, #tpu.memory_space<vmem>>, vector<16x324xf32>
    tpu.vector_store %arg19[%c0_40, %c0_41], %36 {strides = array<i32>} : memref<288x324xf32, #tpu.memory_space<vmem>>, vector<16x324xf32>,
    %c0_42 = arith.constant 0 : index
    %c1_43 = arith.constant 1 : index
    %38 = vector.load %arg18[%c0_42, %c1_43] : memref<32x362xf32, #tpu.memory_space<vmem>>, vector<16x324xf32>
    %c16_44 = arith.constant 16 : index
    %c0_45 = arith.constant 0 : index
    %39 = vector.load %arg19[%c16_44, %c0_45] : memref<288x324xf32, #tpu.memory_space<vmem>>, vector<16x324xf32>
    tpu.vector_store %arg19[%c16_44, %c0_45], %38 {strides = array<i32>} : memref<288x324xf32, #tpu.memory_space<vmem>>, vector<16x324xf32>,
    %c0_46 = arith.constant 0 : index
    %c2_47 = arith.constant 2 : index
    %40 = vector.load %arg18[%c0_46, %c2_47] : memref<32x362xf32, #tpu.memory_space<vmem>>, vector<16x324xf32>
    %c32_48 = arith.constant 32 : index
    %c0_49 = arith.constant 0 : index
    %41 = vector.load %arg19[%c32_48, %c0_49] : memref<288x324xf32, #tpu.memory_space<vmem>>, vector<16x324xf32>
    tpu.vector_store %arg19[%c32_48, %c0_49], %40 {strides = array<i32>} : memref<288x324xf32, #tpu.memory_space<vmem>>, vector<16x324xf32>,
    %c0_50 = arith.constant 0 : index
    %c18_51 = arith.constant 18 : index
    %42 = vector.load %arg18[%c0_50, %c18_51] : memref<32x362xf32, #tpu.memory_space<vmem>>, vector<16x324xf32>
    %c48_52 = arith.constant 48 : index
    %c0_53 = arith.constant 0 : index
    %43 = vector.load %arg19[%c48_52, %c0_53] : memref<288x324xf32, #tpu.memory_space<vmem>>, vector<16x324xf32>
    tpu.vector_store %arg19[%c48_52, %c0_53], %42 {strides = array<i32>} : memref<288x324xf32, #tpu.memory_space<vmem>>, vector<16x324xf32>,
    %c0_54 = arith.constant 0 : index
    %c19_55 = arith.constant 19 : index
    %44 = vector.load %arg18[%c0_54, %c19_55] : memref<32x362xf32, #tpu.memory_space<vmem>>, vector<16x324xf32>
    %c64_56 = arith.constant 64 : index
    %c0_57 = arith.constant 0 : index
    %45 = vector.load %arg19[%c64_56, %c0_57] : memref<288x324xf32, #tpu.memory_space<vmem>>, vector<16x324xf32>
    tpu.vector_store %arg19[%c64_56, %c0_57], %44 {strides = array<i32>} : memref<288x324xf32, #tpu.memory_space<vmem>>, vector<16x324xf32>,
    %c0_58 = arith.constant 0 : index
    %c20_59 = arith.constant 20 : index
    %46 = vector.load %arg18[%c0_58, %c20_59] : memref<32x362xf32, #tpu.memory_space<vmem>>, vector<16x324xf32>
    %c80 = arith.constant 80 : index
    %c0_60 = arith.constant 0 : index
    %47 = vector.load %arg19[%c80, %c0_60] : memref<288x324xf32, #tpu.memory_space<vmem>>, vector<16x324xf32>
    tpu.vector_store %arg19[%c80, %c0_60], %46 {strides = array<i32>} : memref<288x324xf32, #tpu.memory_space<vmem>>, vector<16x324xf32>,
    %c0_61 = arith.constant 0 : index
    %c36_62 = arith.constant 36 : index
    %48 = vector.load %arg18[%c0_61, %c36_62] : memref<32x362xf32, #tpu.memory_space<vmem>>, vector<16x324xf32>
    %c96 = arith.constant 96 : index
    %c0_63 = arith.constant 0 : index
    %49 = vector.load %arg19[%c96, %c0_63] : memref<288x324xf32, #tpu.memory_space<vmem>>, vector<16x324xf32>
    tpu.vector_store %arg19[%c96, %c0_63], %48 {strides = array<i32>} : memref<288x324xf32, #tpu.memory_space<vmem>>, vector<16x324xf32>,
    %c0_64 = arith.constant 0 : index
    %c37_65 = arith.constant 37 : index
    %50 = vector.load %arg18[%c0_64, %c37_65] : memref<32x362xf32, #tpu.memory_space<vmem>>, vector<16x324xf32>
    %c112 = arith.constant 112 : index
    %c0_66 = arith.constant 0 : index
    %51 = vector.load %arg19[%c112, %c0_66] : memref<288x324xf32, #tpu.memory_space<vmem>>, vector<16x324xf32>
    tpu.vector_store %arg19[%c112, %c0_66], %50 {strides = array<i32>} : memref<288x324xf32, #tpu.memory_space<vmem>>, vector<16x324xf32>,
    %c0_67 = arith.constant 0 : index
    %c38_68 = arith.constant 38 : index
    %52 = vector.load %arg18[%c0_67, %c38_68] : memref<32x362xf32, #tpu.memory_space<vmem>>, vector<16x324xf32>
    %c128 = arith.constant 128 : index
    %c0_69 = arith.constant 0 : index
    %53 = vector.load %arg19[%c128, %c0_69] : memref<288x324xf32, #tpu.memory_space<vmem>>, vector<16x324xf32>
    tpu.vector_store %arg19[%c128, %c0_69], %52 {strides = array<i32>} : memref<288x324xf32, #tpu.memory_space<vmem>>, vector<16x324xf32>,
    %c0_70 = arith.constant 0 : index
    %c0_71 = arith.constant 0 : index
    %54 = vector.load %arg19[%c0_70, %c0_71] : memref<288x324xf32, #tpu.memory_space<vmem>>, vector<144x324xf32>
    %c0_72 = arith.constant 0 : index
    %c0_73 = arith.constant 0 : index
    %55 = vector.load %arg6[%c0_72, %c0_73] : memref<32x144xbf16, #tpu.memory_space<vmem>>, vector<32x144xbf16>
    %56 = arith.truncf %54 : vector<144x324xf32> to vector<144x324xbf16>
    %cst_74 = arith.constant dense<0.000000e+00> : vector<32x324xf32>
    %57 = tpu.matmul %55, %56, %cst_74 {dimension_numbers = #tpu.dot_dimension_numbers<[1], [0], [0], [1], [0, 0, 1, 1], [], []>} : vector<32x144xbf16>, vector<144x324xbf16>, vector<32x324xf32> -> vector<32x324xf32>
    %c0_75 = arith.constant 0 : index
    %c0_76 = arith.constant 0 : index
    %58 = vector.load %arg7[%c0_75, %c0_76] : memref<32x1xf32, #tpu.memory_space<vmem>>, vector<32x1xf32>
    %59 = vector.broadcast %58 : vector<32x1xf32> to vector<32x324xf32>
    %60 = arith.addf %57, %59 : vector<32x324xf32>
    %cst_77 = arith.constant 0.000000e+00 : f32
    %61 = vector.broadcast %cst_77 : f32 to vector<32x324xf32>
    %62 = arith.maximumf %60, %61 : vector<32x324xf32>
    %c0_78 = arith.constant 0 : index
    %c0_79 = arith.constant 0 : index
    %63 = vector.load %arg8[%c0_78, %c0_79] : memref<32x32xbf16, #tpu.memory_space<vmem>>, vector<32x32xbf16>
    %64 = arith.truncf %62 : vector<32x324xf32> to vector<32x324xbf16>
    %cst_80 = arith.constant dense<0.000000e+00> : vector<32x324xf32>
    %65 = tpu.matmul %63, %64, %cst_80 {dimension_numbers = #tpu.dot_dimension_numbers<[1], [0], [0], [1], [0, 0, 1, 1], [], []>} : vector<32x32xbf16>, vector<32x324xbf16>, vector<32x324xf32> -> vector<32x324xf32>
    %c0_81 = arith.constant 0 : index
    %c0_82 = arith.constant 0 : index
    %66 = vector.load %arg9[%c0_81, %c0_82] : memref<32x1xf32, #tpu.memory_space<vmem>>, vector<32x1xf32>
    %67 = vector.broadcast %66 : vector<32x1xf32> to vector<32x324xf32>
    %68 = arith.addf %65, %67 : vector<32x324xf32>
    %69 = vector.broadcast %0 : vector<1x324xf32> to vector<32x324xf32>
    %70 = arith.mulf %68, %69 : vector<32x324xf32>
    %c0_83 = arith.constant 0 : index
    %c19_84 = arith.constant 19 : index
    %71 = vector.load %arg18[%c0_83, %c19_84] : memref<32x362xf32, #tpu.memory_space<vmem>>, vector<32x324xf32>
    tpu.vector_store %arg18[%c0_83, %c19_84], %70 {strides = array<i32>} : memref<32x362xf32, #tpu.memory_space<vmem>>, vector<32x324xf32>,
    %c0_85 = arith.constant 0 : index
    %c0_86 = arith.constant 0 : index
    %72 = vector.load %arg18[%c0_85, %c0_86] : memref<32x362xf32, #tpu.memory_space<vmem>>, vector<32x324xf32>
    %c0_87 = arith.constant 0 : index
    %c0_88 = arith.constant 0 : index
    %73 = vector.load %arg19[%c0_87, %c0_88] : memref<288x324xf32, #tpu.memory_space<vmem>>, vector<32x324xf32>
    tpu.vector_store %arg19[%c0_87, %c0_88], %72 {strides = array<i32>} : memref<288x324xf32, #tpu.memory_space<vmem>>, vector<32x324xf32>,
    %c0_89 = arith.constant 0 : index
    %c1_90 = arith.constant 1 : index
    %74 = vector.load %arg18[%c0_89, %c1_90] : memref<32x362xf32, #tpu.memory_space<vmem>>, vector<32x324xf32>
    %c32_91 = arith.constant 32 : index
    %c0_92 = arith.constant 0 : index
    %75 = vector.load %arg19[%c32_91, %c0_92] : memref<288x324xf32, #tpu.memory_space<vmem>>, vector<32x324xf32>
    tpu.vector_store %arg19[%c32_91, %c0_92], %74 {strides = array<i32>} : memref<288x324xf32, #tpu.memory_space<vmem>>, vector<32x324xf32>,
    %c0_93 = arith.constant 0 : index
    %c2_94 = arith.constant 2 : index
    %76 = vector.load %arg18[%c0_93, %c2_94] : memref<32x362xf32, #tpu.memory_space<vmem>>, vector<32x324xf32>
    %c64_95 = arith.constant 64 : index
    %c0_96 = arith.constant 0 : index
    %77 = vector.load %arg19[%c64_95, %c0_96] : memref<288x324xf32, #tpu.memory_space<vmem>>, vector<32x324xf32>
    tpu.vector_store %arg19[%c64_95, %c0_96], %76 {strides = array<i32>} : memref<288x324xf32, #tpu.memory_space<vmem>>, vector<32x324xf32>,
    %c0_97 = arith.constant 0 : index
    %c18_98 = arith.constant 18 : index
    %78 = vector.load %arg18[%c0_97, %c18_98] : memref<32x362xf32, #tpu.memory_space<vmem>>, vector<32x324xf32>
    %c96_99 = arith.constant 96 : index
    %c0_100 = arith.constant 0 : index
    %79 = vector.load %arg19[%c96_99, %c0_100] : memref<288x324xf32, #tpu.memory_space<vmem>>, vector<32x324xf32>
    tpu.vector_store %arg19[%c96_99, %c0_100], %78 {strides = array<i32>} : memref<288x324xf32, #tpu.memory_space<vmem>>, vector<32x324xf32>,
    %c0_101 = arith.constant 0 : index
    %c19_102 = arith.constant 19 : index
    %80 = vector.load %arg18[%c0_101, %c19_102] : memref<32x362xf32, #tpu.memory_space<vmem>>, vector<32x324xf32>
    %c128_103 = arith.constant 128 : index
    %c0_104 = arith.constant 0 : index
    %81 = vector.load %arg19[%c128_103, %c0_104] : memref<288x324xf32, #tpu.memory_space<vmem>>, vector<32x324xf32>
    tpu.vector_store %arg19[%c128_103, %c0_104], %80 {strides = array<i32>} : memref<288x324xf32, #tpu.memory_space<vmem>>, vector<32x324xf32>,
    %c0_105 = arith.constant 0 : index
    %c20_106 = arith.constant 20 : index
    %82 = vector.load %arg18[%c0_105, %c20_106] : memref<32x362xf32, #tpu.memory_space<vmem>>, vector<32x324xf32>
    %c160 = arith.constant 160 : index
    %c0_107 = arith.constant 0 : index
    %83 = vector.load %arg19[%c160, %c0_107] : memref<288x324xf32, #tpu.memory_space<vmem>>, vector<32x324xf32>
    tpu.vector_store %arg19[%c160, %c0_107], %82 {strides = array<i32>} : memref<288x324xf32, #tpu.memory_space<vmem>>, vector<32x324xf32>,
    %c0_108 = arith.constant 0 : index
    %c36_109 = arith.constant 36 : index
    %84 = vector.load %arg18[%c0_108, %c36_109] : memref<32x362xf32, #tpu.memory_space<vmem>>, vector<32x324xf32>
    %c192 = arith.constant 192 : index
    %c0_110 = arith.constant 0 : index
    %85 = vector.load %arg19[%c192, %c0_110] : memref<288x324xf32, #tpu.memory_space<vmem>>, vector<32x324xf32>
    tpu.vector_store %arg19[%c192, %c0_110], %84 {strides = array<i32>} : memref<288x324xf32, #tpu.memory_space<vmem>>, vector<32x324xf32>,
    %c0_111 = arith.constant 0 : index
    %c37_112 = arith.constant 37 : index
    %86 = vector.load %arg18[%c0_111, %c37_112] : memref<32x362xf32, #tpu.memory_space<vmem>>, vector<32x324xf32>
    %c224 = arith.constant 224 : index
    %c0_113 = arith.constant 0 : index
    %87 = vector.load %arg19[%c224, %c0_113] : memref<288x324xf32, #tpu.memory_space<vmem>>, vector<32x324xf32>
    tpu.vector_store %arg19[%c224, %c0_113], %86 {strides = array<i32>} : memref<288x324xf32, #tpu.memory_space<vmem>>, vector<32x324xf32>,
    %c0_114 = arith.constant 0 : index
    %c38_115 = arith.constant 38 : index
    %88 = vector.load %arg18[%c0_114, %c38_115] : memref<32x362xf32, #tpu.memory_space<vmem>>, vector<32x324xf32>
    %c256 = arith.constant 256 : index
    %c0_116 = arith.constant 0 : index
    %89 = vector.load %arg19[%c256, %c0_116] : memref<288x324xf32, #tpu.memory_space<vmem>>, vector<32x324xf32>
    tpu.vector_store %arg19[%c256, %c0_116], %88 {strides = array<i32>} : memref<288x324xf32, #tpu.memory_space<vmem>>, vector<32x324xf32>,
    %c0_117 = arith.constant 0 : index
    %c0_118 = arith.constant 0 : index
    %90 = vector.load %arg19[%c0_117, %c0_118] : memref<288x324xf32, #tpu.memory_space<vmem>>, vector<288x324xf32>
    %c0_119 = arith.constant 0 : index
    %c0_120 = arith.constant 0 : index
    %91 = vector.load %arg10[%c0_119, %c0_120] : memref<32x288xbf16, #tpu.memory_space<vmem>>, vector<32x288xbf16>
    %92 = arith.truncf %90 : vector<288x324xf32> to vector<288x324xbf16>
    %cst_121 = arith.constant dense<0.000000e+00> : vector<32x324xf32>
    %93 = tpu.matmul %91, %92, %cst_121 {dimension_numbers = #tpu.dot_dimension_numbers<[1], [0], [0], [1], [0, 0, 1, 1], [], []>} : vector<32x288xbf16>, vector<288x324xbf16>, vector<32x324xf32> -> vector<32x324xf32>
    %c0_122 = arith.constant 0 : index
    %c0_123 = arith.constant 0 : index
    %94 = vector.load %arg11[%c0_122, %c0_123] : memref<32x1xf32, #tpu.memory_space<vmem>>, vector<32x1xf32>
    %95 = vector.broadcast %94 : vector<32x1xf32> to vector<32x324xf32>
    %96 = arith.addf %93, %95 : vector<32x324xf32>
    %97 = vector.broadcast %0 : vector<1x324xf32> to vector<32x324xf32>
    %98 = arith.mulf %96, %97 : vector<32x324xf32>
    %c0_124 = arith.constant 0 : index
    %c19_125 = arith.constant 19 : index
    %99 = vector.load %arg18[%c0_124, %c19_125] : memref<32x362xf32, #tpu.memory_space<vmem>>, vector<32x324xf32>
    tpu.vector_store %arg18[%c0_124, %c19_125], %98 {strides = array<i32>} : memref<32x362xf32, #tpu.memory_space<vmem>>, vector<32x324xf32>,
    %c0_126 = arith.constant 0 : index
    %c0_127 = arith.constant 0 : index
    %100 = vector.load %arg18[%c0_126, %c0_127] : memref<32x362xf32, #tpu.memory_space<vmem>>, vector<32x324xf32>
    %c0_128 = arith.constant 0 : index
    %c0_129 = arith.constant 0 : index
    %101 = vector.load %arg19[%c0_128, %c0_129] : memref<288x324xf32, #tpu.memory_space<vmem>>, vector<32x324xf32>
    tpu.vector_store %arg19[%c0_128, %c0_129], %100 {strides = array<i32>} : memref<288x324xf32, #tpu.memory_space<vmem>>, vector<32x324xf32>,
    %c0_130 = arith.constant 0 : index
    %c1_131 = arith.constant 1 : index
    %102 = vector.load %arg18[%c0_130, %c1_131] : memref<32x362xf32, #tpu.memory_space<vmem>>, vector<32x324xf32>
    %c32_132 = arith.constant 32 : index
    %c0_133 = arith.constant 0 : index
    %103 = vector.load %arg19[%c32_132, %c0_133] : memref<288x324xf32, #tpu.memory_space<vmem>>, vector<32x324xf32>
    tpu.vector_store %arg19[%c32_132, %c0_133], %102 {strides = array<i32>} : memref<288x324xf32, #tpu.memory_space<vmem>>, vector<32x324xf32>,
    %c0_134 = arith.constant 0 : index
    %c2_135 = arith.constant 2 : index
    %104 = vector.load %arg18[%c0_134, %c2_135] : memref<32x362xf32, #tpu.memory_space<vmem>>, vector<32x324xf32>
    %c64_136 = arith.constant 64 : index
    %c0_137 = arith.constant 0 : index
    %105 = vector.load %arg19[%c64_136, %c0_137] : memref<288x324xf32, #tpu.memory_space<vmem>>, vector<32x324xf32>
    tpu.vector_store %arg19[%c64_136, %c0_137], %104 {strides = array<i32>} : memref<288x324xf32, #tpu.memory_space<vmem>>, vector<32x324xf32>,
    %c0_138 = arith.constant 0 : index
    %c18_139 = arith.constant 18 : index
    %106 = vector.load %arg18[%c0_138, %c18_139] : memref<32x362xf32, #tpu.memory_space<vmem>>, vector<32x324xf32>
    %c96_140 = arith.constant 96 : index
    %c0_141 = arith.constant 0 : index
    %107 = vector.load %arg19[%c96_140, %c0_141] : memref<288x324xf32, #tpu.memory_space<vmem>>, vector<32x324xf32>
    tpu.vector_store %arg19[%c96_140, %c0_141], %106 {strides = array<i32>} : memref<288x324xf32, #tpu.memory_space<vmem>>, vector<32x324xf32>,
    %c0_142 = arith.constant 0 : index
    %c19_143 = arith.constant 19 : index
    %108 = vector.load %arg18[%c0_142, %c19_143] : memref<32x362xf32, #tpu.memory_space<vmem>>, vector<32x324xf32>
    %c128_144 = arith.constant 128 : index
    %c0_145 = arith.constant 0 : index
    %109 = vector.load %arg19[%c128_144, %c0_145] : memref<288x324xf32, #tpu.memory_space<vmem>>, vector<32x324xf32>
    tpu.vector_store %arg19[%c128_144, %c0_145], %108 {strides = array<i32>} : memref<288x324xf32, #tpu.memory_space<vmem>>, vector<32x324xf32>,
    %c0_146 = arith.constant 0 : index
    %c20_147 = arith.constant 20 : index
    %110 = vector.load %arg18[%c0_146, %c20_147] : memref<32x362xf32, #tpu.memory_space<vmem>>, vector<32x324xf32>
    %c160_148 = arith.constant 160 : index
    %c0_149 = arith.constant 0 : index
    %111 = vector.load %arg19[%c160_148, %c0_149] : memref<288x324xf32, #tpu.memory_space<vmem>>, vector<32x324xf32>
    tpu.vector_store %arg19[%c160_148, %c0_149], %110 {strides = array<i32>} : memref<288x324xf32, #tpu.memory_space<vmem>>, vector<32x324xf32>,
    %c0_150 = arith.constant 0 : index
    %c36_151 = arith.constant 36 : index
    %112 = vector.load %arg18[%c0_150, %c36_151] : memref<32x362xf32, #tpu.memory_space<vmem>>, vector<32x324xf32>
    %c192_152 = arith.constant 192 : index
    %c0_153 = arith.constant 0 : index
    %113 = vector.load %arg19[%c192_152, %c0_153] : memref<288x324xf32, #tpu.memory_space<vmem>>, vector<32x324xf32>
    tpu.vector_store %arg19[%c192_152, %c0_153], %112 {strides = array<i32>} : memref<288x324xf32, #tpu.memory_space<vmem>>, vector<32x324xf32>,
    %c0_154 = arith.constant 0 : index
    %c37_155 = arith.constant 37 : index
    %114 = vector.load %arg18[%c0_154, %c37_155] : memref<32x362xf32, #tpu.memory_space<vmem>>, vector<32x324xf32>
    %c224_156 = arith.constant 224 : index
    %c0_157 = arith.constant 0 : index
    %115 = vector.load %arg19[%c224_156, %c0_157] : memref<288x324xf32, #tpu.memory_space<vmem>>, vector<32x324xf32>
    tpu.vector_store %arg19[%c224_156, %c0_157], %114 {strides = array<i32>} : memref<288x324xf32, #tpu.memory_space<vmem>>, vector<32x324xf32>,
    %c0_158 = arith.constant 0 : index
    %c38_159 = arith.constant 38 : index
    %116 = vector.load %arg18[%c0_158, %c38_159] : memref<32x362xf32, #tpu.memory_space<vmem>>, vector<32x324xf32>
    %c256_160 = arith.constant 256 : index
    %c0_161 = arith.constant 0 : index
    %117 = vector.load %arg19[%c256_160, %c0_161] : memref<288x324xf32, #tpu.memory_space<vmem>>, vector<32x324xf32>
    tpu.vector_store %arg19[%c256_160, %c0_161], %116 {strides = array<i32>} : memref<288x324xf32, #tpu.memory_space<vmem>>, vector<32x324xf32>,
    %c0_162 = arith.constant 0 : index
    %c0_163 = arith.constant 0 : index
    %118 = vector.load %arg19[%c0_162, %c0_163] : memref<288x324xf32, #tpu.memory_space<vmem>>, vector<288x324xf32>
    %c0_164 = arith.constant 0 : index
    %c0_165 = arith.constant 0 : index
    %119 = vector.load %arg12[%c0_164, %c0_165] : memref<32x288xbf16, #tpu.memory_space<vmem>>, vector<32x288xbf16>
    %120 = arith.truncf %118 : vector<288x324xf32> to vector<288x324xbf16>
    %cst_166 = arith.constant dense<0.000000e+00> : vector<32x324xf32>
    %121 = tpu.matmul %119, %120, %cst_166 {dimension_numbers = #tpu.dot_dimension_numbers<[1], [0], [0], [1], [0, 0, 1, 1], [], []>} : vector<32x288xbf16>, vector<288x324xbf16>, vector<32x324xf32> -> vector<32x324xf32>
    %c0_167 = arith.constant 0 : index
    %c0_168 = arith.constant 0 : index
    %122 = vector.load %arg13[%c0_167, %c0_168] : memref<32x1xf32, #tpu.memory_space<vmem>>, vector<32x1xf32>
    %123 = vector.broadcast %122 : vector<32x1xf32> to vector<32x324xf32>
    %124 = arith.addf %121, %123 : vector<32x324xf32>
    %cst_169 = arith.constant 0.000000e+00 : f32
    %125 = vector.broadcast %cst_169 : f32 to vector<32x324xf32>
    %126 = arith.maximumf %124, %125 : vector<32x324xf32>
    %c0_170 = arith.constant 0 : index
    %c0_171 = arith.constant 0 : index
    %127 = vector.load %arg14[%c0_170, %c0_171] : memref<16x32xbf16, #tpu.memory_space<vmem>>, vector<16x32xbf16>
    %128 = arith.truncf %126 : vector<32x324xf32> to vector<32x324xbf16>
    %cst_172 = arith.constant dense<0.000000e+00> : vector<16x324xf32>
    %129 = tpu.matmul %127, %128, %cst_172 {dimension_numbers = #tpu.dot_dimension_numbers<[1], [0], [0], [1], [0, 0, 1, 1], [], []>} : vector<16x32xbf16>, vector<32x324xbf16>, vector<16x324xf32> -> vector<16x324xf32>
    %c0_173 = arith.constant 0 : index
    %c0_174 = arith.constant 0 : index
    %130 = vector.load %arg15[%c0_173, %c0_174] : memref<16x1xf32, #tpu.memory_space<vmem>>, vector<16x1xf32>
    %131 = vector.broadcast %130 : vector<16x1xf32> to vector<16x324xf32>
    %132 = arith.addf %129, %131 : vector<16x324xf32>
    %133 = vector.extract_strided_slice %132 {offsets = [0, 0], sizes = [3, 324], strides = [1, 1]} : vector<16x324xf32> to vector<3x324xf32>
    %134 = arith.negf %133 : vector<3x324xf32>
    %135 = math.exp %134 : vector<3x324xf32>
    %cst_175 = arith.constant 1.000000e+00 : f32
    %136 = vector.broadcast %cst_175 : f32 to vector<3x324xf32>
    %137 = arith.addf %136, %135 : vector<3x324xf32>
    %138 = arith.divf %136, %137 : vector<3x324xf32>
    %c0_176 = arith.constant 0 : index
    %c0_177 = arith.constant 0 : index
    %c0_178 = arith.constant 0 : index
    %139 = vector.load %arg16[%c0_176, %c0_177, %c0_178] : memref<1x3x324xf32, #tpu.memory_space<vmem>>, vector<1x3x324xf32>
    %140 = vector.shape_cast %139 : vector<1x3x324xf32> to vector<3x324xf32>
    %141 = vector.shape_cast %138 : vector<3x324xf32> to vector<1x3x324xf32>
    tpu.vector_store %arg16[%c0_176, %c0_177, %c0_178], %141 {strides = array<i32>} : memref<1x3x324xf32, #tpu.memory_space<vmem>>, vector<1x3x324xf32>,
    %c0_179 = arith.constant 0 : index
    %c0_180 = arith.constant 0 : index
    %c0_181 = arith.constant 0 : index
    %142 = vector.load %arg3[%c0_179, %c0_180, %c0_181] : memref<4x3x324xf32, #tpu.memory_space<vmem>>, vector<1x3x324xf32>
    %143 = vector.shape_cast %142 : vector<1x3x324xf32> to vector<3x324xf32>
    %c1_182 = arith.constant 1 : index
    %c0_183 = arith.constant 0 : index
    %c0_184 = arith.constant 0 : index
    %144 = vector.load %arg3[%c1_182, %c0_183, %c0_184] : memref<4x3x324xf32, #tpu.memory_space<vmem>>, vector<1x3x324xf32>
    %145 = vector.shape_cast %144 : vector<1x3x324xf32> to vector<3x324xf32>
    %c2_185 = arith.constant 2 : index
    %c0_186 = arith.constant 0 : index
    %c0_187 = arith.constant 0 : index
    %146 = vector.load %arg3[%c2_185, %c0_186, %c0_187] : memref<4x3x324xf32, #tpu.memory_space<vmem>>, vector<1x3x324xf32>
    %147 = vector.shape_cast %146 : vector<1x3x324xf32> to vector<3x324xf32>
    %c3 = arith.constant 3 : index
    %c0_188 = arith.constant 0 : index
    %c0_189 = arith.constant 0 : index
    %148 = vector.load %arg3[%c3, %c0_188, %c0_189] : memref<4x3x324xf32, #tpu.memory_space<vmem>>, vector<1x3x324xf32>
    %149 = vector.shape_cast %148 : vector<1x3x324xf32> to vector<3x324xf32>
    %150 = arith.subf %147, %143 : vector<3x324xf32>
    %151 = arith.subf %149, %145 : vector<3x324xf32>
    %cst_190 = arith.constant 5.000000e-01 : f32
    %152 = vector.broadcast %cst_190 : f32 to vector<3x324xf32>
    %153 = arith.mulf %152, %150 : vector<3x324xf32>
    %154 = arith.addf %143, %153 : vector<3x324xf32>
    %cst_191 = arith.constant 5.000000e-01 : f32
    %155 = vector.broadcast %cst_191 : f32 to vector<3x324xf32>
    %156 = arith.mulf %155, %151 : vector<3x324xf32>
    %157 = arith.addf %145, %156 : vector<3x324xf32>
    %158 = vector.extract_strided_slice %132 {offsets = [3, 0], sizes = [3, 324], strides = [1, 1]} : vector<16x324xf32> to vector<3x324xf32>
    %159 = vector.extract_strided_slice %132 {offsets = [6, 0], sizes = [3, 324], strides = [1, 1]} : vector<16x324xf32> to vector<3x324xf32>
    %160 = vector.extract_strided_slice %132 {offsets = [9, 0], sizes = [3, 324], strides = [1, 1]} : vector<16x324xf32> to vector<3x324xf32>
    %cst_192 = arith.constant 4.13516665 : f32
    %161 = vector.broadcast %cst_192 : f32 to vector<3x324xf32>
    %162 = arith.minimumf %160, %161 : vector<3x324xf32>
    %163 = vector.extract_strided_slice %132 {offsets = [12, 0], sizes = [3, 324], strides = [1, 1]} : vector<16x324xf32> to vector<3x324xf32>
    %cst_193 = arith.constant 4.13516665 : f32
    %164 = vector.broadcast %cst_193 : f32 to vector<3x324xf32>
    %165 = arith.minimumf %163, %164 : vector<3x324xf32>
    %166 = arith.mulf %158, %150 : vector<3x324xf32>
    %167 = arith.addf %166, %154 : vector<3x324xf32>
    %168 = arith.mulf %159, %151 : vector<3x324xf32>
    %169 = arith.addf %168, %157 : vector<3x324xf32>
    %170 = math.exp %162 : vector<3x324xf32>
    %171 = arith.mulf %170, %150 : vector<3x324xf32>
    %172 = math.exp %165 : vector<3x324xf32>
    %173 = arith.mulf %172, %151 : vector<3x324xf32>
    %cst_194 = arith.constant 5.000000e-01 : f32
    %174 = vector.broadcast %cst_194 : f32 to vector<3x324xf32>
    %175 = arith.mulf %174, %171 : vector<3x324xf32>
    %176 = arith.subf %167, %175 : vector<3x324xf32>
    %c0_195 = arith.constant 0 : index
    %c0_196 = arith.constant 0 : index
    %c0_197 = arith.constant 0 : index
    %c0_198 = arith.constant 0 : index
    %177 = vector.load %arg17[%c0_195, %c0_196, %c0_197, %c0_198] : memref<1x4x3x324xf32, #tpu.memory_space<vmem>>, vector<1x1x3x324xf32>
    %178 = vector.shape_cast %177 : vector<1x1x3x324xf32> to vector<3x324xf32>
    %179 = vector.shape_cast %176 : vector<3x324xf32> to vector<1x1x3x324xf32>
    tpu.vector_store %arg17[%c0_195, %c0_196, %c0_197, %c0_198], %179 {strides = array<i32>} : memref<1x4x3x324xf32, #tpu.memory_space<vmem>>, vector<1x1x3x324xf32>,
    %cst_199 = arith.constant 5.000000e-01 : f32
    %180 = vector.broadcast %cst_199 : f32 to vector<3x324xf32>
    %181 = arith.mulf %180, %173 : vector<3x324xf32>
    %182 = arith.subf %169, %181 : vector<3x324xf32>
    %c0_200 = arith.constant 0 : index
    %c1_201 = arith.constant 1 : index
    %c0_202 = arith.constant 0 : index
    %c0_203 = arith.constant 0 : index
    %183 = vector.load %arg17[%c0_200, %c1_201, %c0_202, %c0_203] : memref<1x4x3x324xf32, #tpu.memory_space<vmem>>, vector<1x1x3x324xf32>
    %184 = vector.shape_cast %183 : vector<1x1x3x324xf32> to vector<3x324xf32>
    %185 = vector.shape_cast %182 : vector<3x324xf32> to vector<1x1x3x324xf32>
    tpu.vector_store %arg17[%c0_200, %c1_201, %c0_202, %c0_203], %185 {strides = array<i32>} : memref<1x4x3x324xf32, #tpu.memory_space<vmem>>, vector<1x1x3x324xf32>,
    %cst_204 = arith.constant 5.000000e-01 : f32
    %186 = vector.broadcast %cst_204 : f32 to vector<3x324xf32>
    %187 = arith.mulf %186, %171 : vector<3x324xf32>
    %188 = arith.addf %167, %187 : vector<3x324xf32>
    %c0_205 = arith.constant 0 : index
    %c2_206 = arith.constant 2 : index
    %c0_207 = arith.constant 0 : index
    %c0_208 = arith.constant 0 : index
    %189 = vector.load %arg17[%c0_205, %c2_206, %c0_207, %c0_208] : memref<1x4x3x324xf32, #tpu.memory_space<vmem>>, vector<1x1x3x324xf32>
    %190 = vector.shape_cast %189 : vector<1x1x3x324xf32> to vector<3x324xf32>
    %191 = vector.shape_cast %188 : vector<3x324xf32> to vector<1x1x3x324xf32>
    tpu.vector_store %arg17[%c0_205, %c2_206, %c0_207, %c0_208], %191 {strides = array<i32>} : memref<1x4x3x324xf32, #tpu.memory_space<vmem>>, vector<1x1x3x324xf32>,
    %cst_209 = arith.constant 5.000000e-01 : f32
    %192 = vector.broadcast %cst_209 : f32 to vector<3x324xf32>
    %193 = arith.mulf %192, %173 : vector<3x324xf32>
    %194 = arith.addf %169, %193 : vector<3x324xf32>
    %c0_210 = arith.constant 0 : index
    %c3_211 = arith.constant 3 : index
    %c0_212 = arith.constant 0 : index
    %c0_213 = arith.constant 0 : index
    %195 = vector.load %arg17[%c0_210, %c3_211, %c0_212, %c0_213] : memref<1x4x3x324xf32, #tpu.memory_space<vmem>>, vector<1x1x3x324xf32>
    %196 = vector.shape_cast %195 : vector<1x1x3x324xf32> to vector<3x324xf32>
    %197 = vector.shape_cast %194 : vector<3x324xf32> to vector<1x1x3x324xf32>
    tpu.vector_store %arg17[%c0_210, %c3_211, %c0_212, %c0_213], %197 {strides = array<i32>} : memref<1x4x3x324xf32, #tpu.memory_space<vmem>>, vector<1x1x3x324xf32>,
    return
  }
  func.func @transform_0(%arg0: i32) -> (i32, i32, i32) {
    %c0_i32 = arith.constant 0 : i32
    %c0_i32_0 = arith.constant 0 : i32
    %c0_i32_1 = arith.constant 0 : i32
    return %arg0, %c0_i32, %c0_i32_0 : i32, i32, i32
  }
  func.func @transform_1(%arg0: i32) -> (i32, i32) {
    %c0_i32 = arith.constant 0 : i32
    %c0_i32_0 = arith.constant 0 : i32
    %c0_i32_1 = arith.constant 0 : i32
    return %c0_i32, %c0_i32_0 : i32, i32
  }
  func.func @transform_2(%arg0: i32) -> (i32, i32, i32) {
    %c0_i32 = arith.constant 0 : i32
    %c0_i32_0 = arith.constant 0 : i32
    %c0_i32_1 = arith.constant 0 : i32
    %c0_i32_2 = arith.constant 0 : i32
    return %c0_i32, %c0_i32_0, %c0_i32_1 : i32, i32, i32
  }
  func.func @transform_3(%arg0: i32) -> (i32, i32) {
    %c0_i32 = arith.constant 0 : i32
    %c0_i32_0 = arith.constant 0 : i32
    %c0_i32_1 = arith.constant 0 : i32
    return %c0_i32, %c0_i32_0 : i32, i32
  }
  func.func @transform_4(%arg0: i32) -> (i32, i32) {
    %c0_i32 = arith.constant 0 : i32
    %c0_i32_0 = arith.constant 0 : i32
    %c0_i32_1 = arith.constant 0 : i32
    return %c0_i32, %c0_i32_0 : i32, i32
  }
  func.func @transform_5(%arg0: i32) -> (i32, i32) {
    %c0_i32 = arith.constant 0 : i32
    %c0_i32_0 = arith.constant 0 : i32
    %c0_i32_1 = arith.constant 0 : i32
    return %c0_i32, %c0_i32_0 : i32, i32
  }
  func.func @transform_6(%arg0: i32) -> (i32, i32) {
    %c0_i32 = arith.constant 0 : i32
    %c0_i32_0 = arith.constant 0 : i32
    %c0_i32_1 = arith.constant 0 : i32
    return %c0_i32, %c0_i32_0 : i32, i32
  }
  func.func @transform_7(%arg0: i32) -> (i32, i32) {
    %c0_i32 = arith.constant 0 : i32
    %c0_i32_0 = arith.constant 0 : i32
    %c0_i32_1 = arith.constant 0 : i32
    return %c0_i32, %c0_i32_0 : i32, i32
  }
  func.func @transform_8(%arg0: i32) -> (i32, i32) {
    %c0_i32 = arith.constant 0 : i32
    %c0_i32_0 = arith.constant 0 : i32
    %c0_i32_1 = arith.constant 0 : i32
    return %c0_i32, %c0_i32_0 : i32, i32
  }
  func.func @transform_9(%arg0: i32) -> (i32, i32) {
    %c0_i32 = arith.constant 0 : i32
    %c0_i32_0 = arith.constant 0 : i32
    %c0_i32_1 = arith.constant 0 : i32
    return %c0_i32, %c0_i32_0 : i32, i32
  }
  func.func @transform_10(%arg0: i32) -> (i32, i32) {
    %c0_i32 = arith.constant 0 : i32
    %c0_i32_0 = arith.constant 0 : i32
    %c0_i32_1 = arith.constant 0 : i32
    return %c0_i32, %c0_i32_0 : i32, i32
  }
  func.func @transform_11(%arg0: i32) -> (i32, i32) {
    %c0_i32 = arith.constant 0 : i32
    %c0_i32_0 = arith.constant 0 : i32
    %c0_i32_1 = arith.constant 0 : i32
    return %c0_i32, %c0_i32_0 : i32, i32
  }
  func.func @transform_12(%arg0: i32) -> (i32, i32) {
    %c0_i32 = arith.constant 0 : i32
    %c0_i32_0 = arith.constant 0 : i32
    %c0_i32_1 = arith.constant 0 : i32
    return %c0_i32, %c0_i32_0 : i32, i32
  }
  func.func @transform_13(%arg0: i32) -> (i32, i32) {
    %c0_i32 = arith.constant 0 : i32
    %c0_i32_0 = arith.constant 0 : i32
    %c0_i32_1 = arith.constant 0 : i32
    return %c0_i32, %c0_i32_0 : i32, i32
  }
  func.func @transform_14(%arg0: i32) -> (i32, i32) {
    %c0_i32 = arith.constant 0 : i32
    %c0_i32_0 = arith.constant 0 : i32
    %c0_i32_1 = arith.constant 0 : i32
    return %c0_i32, %c0_i32_0 : i32, i32
  }
  func.func @transform_15(%arg0: i32) -> (i32, i32, i32) {
    %c0_i32 = arith.constant 0 : i32
    %c0_i32_0 = arith.constant 0 : i32
    %c0_i32_1 = arith.constant 0 : i32
    return %arg0, %c0_i32, %c0_i32_0 : i32, i32, i32
  }
  func.func @transform_16(%arg0: i32) -> (i32, i32, i32, i32) {
    %c0_i32 = arith.constant 0 : i32
    %c0_i32_0 = arith.constant 0 : i32
    %c0_i32_1 = arith.constant 0 : i32
    %c0_i32_2 = arith.constant 0 : i32
    return %arg0, %c0_i32, %c0_i32_0, %c0_i32_1 : i32, i32, i32, i32
  }
}

</mosaic_0001>

<bundles_post_ra>
// kernel: forward.1
= control target key start
LH: loop header
LB: loop body
LE: loop exit
PB: predicated region body
PF: predicated region fallthrough
CT: control target
= control target key end

     0   :  { %s4897_s21 = smov 0   ;;  %s6711_s0 = inlined_call_operand.vmem [shape: f32[2,8,324], index: 0, kind: input, shape index: {}]   ;;  %s6712_s1 = inlined_call_operand.vmem [shape: f32[1,324], index: 1, kind: input, shape index: {}]   ;;  %s6713_s2 = inlined_call_operand.vmem [shape: f32[4,3,324], index: 2, kind: input, shape index: {}]   ;;  %s6714_s3 = inlined_call_operand.vmem [shape: bf16[16,72], index: 3, kind: input, shape index: {}]   ;;  %s6715_s4 = inlined_call_operand.vmem [shape: f32[16,1], index: 4, kind: input, shape index: {}]   ;;  %s6716_s5 = inlined_call_operand.vmem [shape: bf16[32,144], index: 5, kind: input, shape index: {}]   ;;  %s6717_s6 = inlined_call_operand.vmem [shape: f32[32,1], index: 6, kind: input, shape index: {}]   ;;  %s6718_s7 = inlined_call_operand.vmem [shape: bf16[32,32], index: 7, kind: input, shape index: {}]   ;;  %s6719_s8 = inlined_call_operand.vmem [shape: f32[32,1], index: 8, kind: input, shape index: {}]   ;;  %s6720_s9 = inlined_call_operand.vmem [shape: bf16[32,288], index: 9, kind: input, shape index: {}]   ;;  %s6721_s10 = inlined_call_operand.vmem [shape: f32[32,1], index: 10, kind: input, shape index: {}]   ;;  %s6722_s11 = inlined_call_operand.vmem [shape: bf16[32,288], index: 11, kind: input, shape index: {}]   ;;  %s6723_s12 = inlined_call_operand.vmem [shape: f32[32,1], index: 12, kind: input, shape index: {}]   ;;  %s6724_s13 = inlined_call_operand.vmem [shape: bf16[16,32], index: 13, kind: input, shape index: {}]   ;;  %s6725_s14 = inlined_call_operand.vmem [shape: f32[16,1], index: 14, kind: input, shape index: {}]   ;;  %s6726_s15 = inlined_call_operand.vmem [shape: f32[2,3,324], index: 15, kind: output, shape index: {0}]   ;;  %s6727_s16 = inlined_call_operand.vmem [shape: f32[2,4,3,324], index: 16, kind: output, shape index: {1}]  }
   0x1   :  { %6763 = sst [smem:[#allocation21_spill]] %s6711_s0 }
   0x2 LB: > { %s4526_s22 = sadd.s32 4294967295, %s4798_s21   ;;  %p4530_p0 = scmp.ge.s32.totalorder %s4798_s21, 1  ;;  %s4798_s21 = sphi %s4897_s21, %s27_s21  }
   0x3   : > { %p465_p1 = scmp.lt.s32.totalorder %s4798_s21, 3 }
   0x5   : > { %p466_p2 = pnand %p4530_p0, %p465_p1 }
   0x7   : > { %469 = sbr.rel (%p466_p2) target bundleno = 2836 (0xb14), region = 80 }
   0xc   : > { %p520_p3 = scmp.lt.s32.totalorder %s4526_s22, 1  ;;  %v6744_v0 = vmov 0.0   ;;  %vm539_vm0 = vcmask 867328   ;;  %s6764_s26 = sld [smem:[#allocation21_spill]]  ;;  %vm568_vm1 = vcmask 1047704   ;;  %vm571_vm2 = vcmask 711680  }
   0xd   : > { %537 = vst [vmem:[#allocation2] sm:$0xff] %v6744_v0  ;;  %541 = vst [vmem:[#allocation2 + $0x18] sm:$0xff] %v6744_v0  ;;  %4677 = vmatprep.subr.bf16.mxu1 %v6744_v0  ;;  %s4801_s28 = smov 19   ;;  %vm562_vm3 = vcmask 154624   ;;  %s6736_s29 = smov 90   ;;  %vm578_vm4 = vcmask 556032  }
   0xe   : > { %544 = vst [vmem:[#allocation2 + $0x30] sm:$0xff] %v6744_v0  ;;  %547 = vst [vmem:[#allocation2 + $0x48] sm:$0xff] %v6744_v0  ;;  %s6830_s22 = smov (!%p520_p3, %s4526_s22), 1  ;;  %s6732_s30 = smov 92   ;;  %v6746_v11 = vmov 0   ;;  %vm4811_vm5 = vmmov 0  }
   0xf   : > { %s4723_s23 = smul.u32 24, %s6830_s22  ;;  %540 = vst.msk [vmem:[#allocation2 + $0x10] sm:$0xff] %vm539_vm0, %v6744_v0  ;;  %543 = vst.msk [vmem:[#allocation2 + $0x28] sm:$0xff] %vm539_vm0, %v6744_v0  ;;  %s6734_s0 = smov 91   ;;  %855 = vmatprep.mubr.bf16.mxu0 %v6746_v11  ;;  %4746 = vset.pattern.permute.xlu1 %v6746_v11  ;;  %v792_v12 = vld [vmem:[%s6715_s4] sm:$0xff]  ;;  %v793_v13 = vld [vmem:[%s6715_s4 + $0x8] sm:$0xff] }
  0x10   : > { %546 = vst.msk [vmem:[#allocation2 + $0x40] sm:$0xff] %vm539_vm0, %v6744_v0  ;;  %549 = vst.msk [vmem:[#allocation2 + $0x58] sm:$0xff] %vm539_vm0, %v6744_v0  ;;  %s6728_s17 = smov 109   ;;  %s6730_s18 = smov 108   ;;  %4747 = vset.pattern.permute.xlu0 %v6746_v11  ;;  %4687 = vmatprep.mubr.msk.bf16.mxu1 %vm4811_vm5, %v6744_v0  ;;  %vm739_vm6 = vcmask 736256   ;;  %vm813_vm7 = vcmask 1043456  }
  0x11   : > { %s6740_s19 = smov 126   ;;  %s6742_s20 = smov 110   ;;  %vm718_vm8 = vcmask 744448   ;;  %vm697_vm9 = vcmask 752640   ;;  %vm676_vm10 = vcmask 883712   ;;  %vm655_vm11 = vcmask 891904  }
  0x12   : > { %s524_s27 = scalar_lea.vmem %s6764_s26, %s4723_s23  ;;  %s6738_s23 = smov 127   ;;  %vm634_vm12 = vcmask 900096   ;;  %vm613_vm13 = vcmask 1031168   ;;  %vm592_vm14 = vcmask 1039360   ;;  %vm809_vm15 = vcmask 588800  }
  0x13   : > { %v550_v1 = vld [vmem:[%s524_s27] sm:$0xff]  ;;  %v551_v2 = vld [vmem:[%s524_s27 + $0x8] sm:$0xff]  ;;  %v552_v3 = vld [vmem:[%s524_s27 + $0x10] sm:$0xff]  ;;  %vm1428_vm0 = vcmask 130048   ;;  %s6771_s25 = smov 92   ;;  %s6772_s26 = smov 108  }
  0x14   : > { %556 = vrot.lane.b32.xlu0 %v550_v1, %s4801_s28  ;;  %560 = vrot.lane.b32.xlu1 %v552_v3, %s4801_s28  ;;  %s6774_s27 = smov 109  }
  0x18   : > { %558 = vrot.lane.b32.xlu0 %v551_v2, %s4801_s28 }
  0x86   : > { %v557_v4 = vpop.permute.xlu0 %556  ;;  %v561_v5 = vpop.permute.xlu1 %560 }
  0x87   : > { %569 = vst.msk [vmem:[#allocation2] sm:$0xff] %vm568_vm1, %v557_v4 }
  0x8a   : > { %v559_v6 = vpop.permute.xlu0 %558 }
  0x8b   : > { %v564_v7 = vsel %vm562_vm3, %v559_v6, %v561_v5  ;;  %v4942_v10 = vsel %vm562_vm3, %v557_v4, %v559_v6 }
  0x8c   : > { %572 = vst.msk [vmem:[#allocation2 + $0x10] sm:$0xff] %vm571_vm2, %v564_v7 }
  0x8e   : > { %v4926_v8 = vld [vmem:[#allocation2] sm:$0xff] }
  0x8f   : > { %733 = vrot.lane.b32.xlu1 %v4926_v8, %s6736_s29  ;;  %691 = vrot.lane.b32.xlu0 %v4926_v8, %s6732_s30 }
  0x93   : > { %v575_v9 = vld [vmem:[#allocation2 + $0x10] sm:$0xff]  ;;  %712 = vrot.lane.b32.xlu1 %v4926_v8, %s6734_s0  ;;  %649 = vrot.lane.b32.xlu0 %v4926_v8, %s6728_s17 }
  0x94   : > { %579 = vst.msk [vmem:[#allocation3 + $0x10] sm:$0xff] %vm578_vm4, %v575_v9 }
  0x97   : > { %670 = vrot.lane.b32.xlu1 %v4926_v8, %s6730_s18  ;;  %607 = vrot.lane.b32.xlu0 %v4926_v8, %s6740_s19 }
  0x9b   : > { %628 = vrot.lane.b32.xlu1 %v4926_v8, %s6742_s20  ;;  %735 = vrot.lane.b32.xlu0 %v4942_v10, %s6736_s29 }
  0x9f   : > { %737 = vrot.lane.b32.xlu1 %v575_v9, %s6736_s29  ;;  %693 = vrot.lane.b32.xlu0 %v4942_v10, %s6732_s30 }
  0xa3   : > { %695 = vrot.lane.b32.xlu1 %v575_v9, %s6732_s30  ;;  %714 = vrot.lane.b32.xlu0 %v4942_v10, %s6734_s0 }
  0xa7   : > { %716 = vrot.lane.b32.xlu1 %v575_v9, %s6734_s0  ;;  %651 = vrot.lane.b32.xlu0 %v4942_v10, %s6728_s17 }
  0xab   : > { %653 = vrot.lane.b32.xlu1 %v575_v9, %s6728_s17  ;;  %672 = vrot.lane.b32.xlu0 %v4942_v10, %s6730_s18 }
  0xaf   : > { %674 = vrot.lane.b32.xlu1 %v575_v9, %s6730_s18  ;;  %609 = vrot.lane.b32.xlu0 %v4942_v10, %s6740_s19 }
  0xb3   : > { %611 = vrot.lane.b32.xlu1 %v575_v9, %s6740_s19  ;;  %630 = vrot.lane.b32.xlu0 %v4942_v10, %s6742_s20 }
  0xb7   : > { %632 = vrot.lane.b32.xlu1 %v575_v9, %s6742_s20  ;;  %588 = vrot.lane.b32.xlu0 %v4942_v10, %s6738_s23 }
  0xbb   : > { %590 = vrot.lane.b32.xlu1 %v575_v9, %s6738_s23  ;;  %586 = vrot.lane.b32.xlu0 %v4926_v8, %s6738_s23 }
  0xbf   : > { %796 = vperm.xlu1 %4746, %v792_v12   ;;  %801 = vperm.xlu0 %4747, %v793_v13  }
 0x101   : > { %v734_v14 = vpop.permute.xlu1 %733  ;;  %v692_v15 = vpop.permute.xlu0 %691 }
 0x105   : > { %v713_v16 = vpop.permute.xlu1 %712  ;;  %v650_v17 = vpop.permute.xlu0 %649 }
 0x109   : > { %v671_v18 = vpop.permute.xlu1 %670  ;;  %v4983_v19 = vpop.permute.xlu0 %607 }
 0x10d   : > { %v629_v20 = vpop.permute.xlu1 %628  ;;  %v736_v21 = vpop.permute.xlu0 %735 }
 0x10e   : > { %v740_v22 = vsel %vm739_vm6, %v734_v14, %v736_v21 }
 0x10f   : > { %v789_v25 = vpack.c.bf16 %v740_v22, %v740_v22 }
 0x111   : > { %v738_v23 = vpop.permute.xlu1 %737  ;;  %v694_v24 = vpop.permute.xlu0 %693  ;;  %v815_v30 = vsel %vm813_vm7, %v789_v25, 0 }
 0x112   : > { %v741_v26 = vsel %vm739_vm6, %v736_v21, %v738_v23  ;;  %747 = vst.msk [vmem:[#allocation3 + $0xd0] sm:$0xff] %vm578_vm4, %v738_v23  ;;  %v698_v38 = vsel %vm697_vm9, %v692_v15, %v694_v24  ;;  %v536_v23 = vld [vmem:[%s6712_s1] sm:$0x7] }
 0x113   : > { %v790_v27 = vpack.c.bf16 %v741_v26, %v741_v26 }
 0x115   : > { %v696_v28 = vpop.permute.xlu1 %695  ;;  %v715_v29 = vpop.permute.xlu0 %714  ;;  %4535 = vmatprep.subr.msk.bf16.mxu0 %vm813_vm7, %v790_v27 }
 0x116   : > { %705 = vst.msk [vmem:[#allocation3 + $0xa0] sm:$0xff] %vm578_vm4, %v696_v28  ;;  %830 = vmatpush1.bf16.msra.mxu0 %v815_v30  ;;  %v719_v31 = vsel %vm718_vm8, %v713_v16, %v715_v29  ;;  %v699_v35 = vsel %vm697_vm9, %v694_v24, %v696_v28  ;;  %v4748_v16 = vld [vmem:[%s6714_s3] sm:$0xff]  }
 0x117   : > { %v786_v41 = vpack.c.bf16 %v719_v31, %v698_v38 }
 0x119   : > { %v717_v32 = vpop.permute.xlu1 %716  ;;  %v652_v33 = vpop.permute.xlu0 %651  ;;  %v774_v34 = vld [vmem:[#allocation3 + $0xd0] sm:$0xff] }
 0x11a   : > { %v720_v36 = vsel %vm718_vm8, %v715_v29, %v717_v32  ;;  %726 = vst.msk [vmem:[#allocation3 + $0xb8] sm:$0xff] %vm578_vm4, %v717_v32  ;;  %v791_v37 = vpack.c.bf16 %v774_v34, %v774_v34  ;;  %v656_v52 = vsel %vm655_vm11, %v650_v17, %v652_v33 }
 0x11b   : > { %v787_v39 = vpack.c.bf16 %v720_v36, %v699_v35 }
 0x11c   : > { %v821_v40 = vsel %vm813_vm7, %v791_v37, 0  ;;  %vm1593_vm7 = vcmask 261120  }
 0x11d   : > { %4678 = vmatpush3.bf16.msra.mxu1 %v821_v40  ;;  %v654_v42 = vpop.permute.xlu1 %653  ;;  %v673_v43 = vpop.permute.xlu0 %672  ;;  %831 = vmatprep.subr.bf16.mxu0 %v787_v39  ;;  %v768_v47 = vld [vmem:[#allocation3 + $0xa0] sm:$0xff] }
 0x11e   : > { %663 = vst.msk [vmem:[#allocation3 + $0x70] sm:$0xff] %vm578_vm4, %v654_v42  ;;  %4679 = vmatprep.subr.bf16.mxu1 %v6744_v0  ;;  %832 = vmatpush1.bf16.msra.mxu0 %v786_v41  ;;  %v677_v44 = vsel %vm676_vm10, %v671_v18, %v673_v43  ;;  %v657_v49 = vsel %vm655_vm11, %v652_v33, %v654_v42  ;;  %v750_v18 = vld [vmem:[#allocation3 + $0x10] sm:$0xff] }
 0x11f   : > { %v783_v54 = vpack.c.bf16 %v677_v44, %v656_v52 }
 0x121   : > { %v675_v45 = vpop.permute.xlu1 %674  ;;  %v610_v46 = vpop.permute.xlu0 %609  ;;  %v771_v48 = vld [vmem:[#allocation3 + $0xb8] sm:$0xff] }
 0x122   : > { %v678_v50 = vsel %vm676_vm10, %v673_v43, %v675_v45  ;;  %684 = vst.msk [vmem:[#allocation3 + $0x88] sm:$0xff] %vm578_vm4, %v675_v45  ;;  %v788_v51 = vpack.c.bf16 %v771_v48, %v768_v47  ;;  %v614_v2 = vsel %vm613_vm13, %v4983_v19, %v610_v46 }
 0x123   : > { %v784_v53 = vpack.c.bf16 %v678_v50, %v657_v49 }
 0x124   : > { %4680 = vmatpush3.bf16.msra.mxu1 %v788_v51 }
 0x125   : > { %v612_v55 = vpop.permute.xlu1 %611  ;;  %v631_v56 = vpop.permute.xlu0 %630  ;;  %4681 = vmatprep.subr.bf16.mxu1 %v6744_v0  ;;  %833 = vmatprep.subr.bf16.mxu0 %v784_v53  ;;  %v762_v60 = vld [vmem:[#allocation3 + $0x70] sm:$0xff] }
 0x126   : > { %621 = vst.msk [vmem:[#allocation3 + $0x40] sm:$0xff] %vm578_vm4, %v612_v55  ;;  %834 = vmatpush1.bf16.msra.mxu0 %v783_v54  ;;  %v635_v57 = vsel %vm634_vm12, %v629_v20, %v631_v56  ;;  %v615_v62 = vsel %vm613_vm13, %v610_v46, %v612_v55 }
 0x127   : > { %v780_v4 = vpack.c.bf16 %v635_v57, %v614_v2 }
 0x129   : > { %v633_v58 = vpop.permute.xlu1 %632  ;;  %v589_v59 = vpop.permute.xlu0 %588  ;;  %v765_v61 = vld [vmem:[#allocation3 + $0x88] sm:$0xff] }
 0x12a   : > { %v636_v63 = vsel %vm634_vm12, %v631_v56, %v633_v58  ;;  %642 = vst.msk [vmem:[#allocation3 + $0x58] sm:$0xff] %vm578_vm4, %v633_v58  ;;  %v785_v1 = vpack.c.bf16 %v765_v61, %v762_v60 }
 0x12b   : > { %v781_v3 = vpack.c.bf16 %v636_v63, %v615_v62 }
 0x12c   : > { %4682 = vmatpush3.bf16.msra.mxu1 %v785_v1 }
 0x12d   : > { %v591_v5 = vpop.permute.xlu1 %590  ;;  %v587_v6 = vpop.permute.xlu0 %586  ;;  %4683 = vmatprep.subr.bf16.mxu1 %v6744_v0  ;;  %835 = vmatprep.subr.bf16.mxu0 %v781_v3  ;;  %v756_v14 = vld [vmem:[#allocation3 + $0x40] sm:$0xff] }
 0x12e   : > { %v594_v7 = vsel %vm592_vm14, %v589_v59, %v591_v5  ;;  %600 = vst.msk [vmem:[#allocation3 + $0x28] sm:$0xff] %vm578_vm4, %v591_v5  ;;  %v593_v9 = vsel %vm592_vm14, %v587_v6, %v589_v59  ;;  %836 = vmatpush1.bf16.msra.mxu0 %v780_v4 }
 0x12f   : > { %v778_v12 = vpack.c.bf16 %v594_v7, %v4942_v10  ;;  %v777_v13 = vpack.c.bf16 %v593_v9, %v4926_v8  ;;  %v914_v8 = vlaneseq  ;;  %v4749_v7 = vld [vmem:[%s6716_s5 + $0x4] ss:$8 sps:$4 sm:$0xff]   ;;  %v1388_v9 = vld [vmem:[%s6717_s6 + $0x10] sm:$0xff] }
 0x131   : > { %v759_v15 = vld [vmem:[#allocation3 + $0x58] sm:$0xff]  ;;  %837 = vmatprep.subr.bf16.mxu0 %v778_v12  ;;  %v915_v10 = vshrl.u32 %v914_v8, 7  ;;  %v1386_v12 = vld [vmem:[%s6717_s6] sm:$0xff] }
 0x132   : > { %v782_v17 = vpack.c.bf16 %v759_v15, %v756_v14  ;;  %838 = vmatpush1.bf16.msra.mxu0 %v777_v13  ;;  %v1389_v13 = vld [vmem:[%s6717_s6 + $0x18] sm:$0xff]  ;;  %v1561_v14 = vld [vmem:[%s6719_s8 + $0x10] sm:$0xff]  ;;  %v1387_v15 = vld [vmem:[%s6717_s6 + $0x8] sm:$0xff] }
 0x133   : > { %v916_v21 = vsub.s32 0, %v915_v10  ;;  %v920_v27 = vsub.s32 1, %v915_v10  ;;  %v924_v32 = vsub.s32 2, %v915_v10 }
 0x134   : > { %4684 = vmatpush3.bf16.msra.mxu1 %v782_v17  ;;  %v1562_v17 = vld [vmem:[%s6719_s8 + $0x18] sm:$0xff] }
 0x135   : > { %4685 = vmatprep.subr.bf16.mxu1 %v6744_v0  ;;  %v753_v19 = vld [vmem:[#allocation3 + $0x28] sm:$0xff]  ;;  %4536 = vmatmul.mubr.msk.bf16.vlgmr.msra.gmra.mxu0 %vm809_vm15, %v4748_v16  ;;  %v5026_v26 = vrot.slane %v536_v23, %v916_v21  ;;  %v5029_v36 = vrot.slane %v536_v23, %v920_v27  ;;  %v5031_v42 = vrot.slane %v536_v23, %v924_v32 }
 0x136   : > { %v779_v20 = vpack.c.bf16 %v753_v19, %v750_v18  ;;  %4542 = vmatprep.mubr.msk.bf16.mxu0 %vm1428_vm0, %v4749_v7  ;;  %v1560_v18 = vld [vmem:[%s6719_s8 + $0x8] sm:$0xff] }
 0x137   : > { %6765 = vst [vmem:[#allocation4_spill] sm:$0xff] %v5026_v26  ;;  %6766 = vst [vmem:[#allocation5_spill] sm:$0xff] %v5029_v36 }
 0x138   : > { %4686 = vmatpush3.bf16.msra.mxu1 %v779_v20  ;;  %6767 = vst [vmem:[#allocation6_spill] sm:$0xff] %v5031_v42 }
 0x139   : > { %1488 = vmatprep.subr.bf16.mxu1 %v6746_v11 }
 0x13a   : > { %v797_v22 = vpop.permute.xlu1 %796  ;;  %v802_v29 = vpop.permute.xlu0 %801 }
 0x13b   : > { %4688 = vmatmul.mubr.msk.bf16.vlgmr.msra.gmra.mxu1 %vm809_vm15, %v4748_v16  ;;  %v1559_v16 = vld [vmem:[%s6719_s8] sm:$0xff] }
 0x13c   : > { %4544 = vmatprep.mubr.msk.bf16.mxu1 %vm1428_vm0, %v4749_v7 }
 0x1f5   : > { %v857_v24 = vpop.f32.mrf.mxu0 }
 0x1f6   : > { %v858_v25 = vadd.f32 %v857_v24, %v797_v22 }
 0x1f7   : > { %v859_v28 = vpop.f32.mrf.mxu0 }
 0x1f8   : > { %v907_v30 = vmax.f32 %v858_v25, 0.0  ;;  %v860_v31 = vadd.f32 %v859_v28, %v797_v22 }
 0x1f9   : > { %v861_v33 = vpop.f32.mrf.mxu0 }
 0x1fa   : > { %v929_v34 = vmul.f32 %v5026_v26, %v907_v30  ;;  %v908_v35 = vmax.f32 %v860_v31, 0.0  ;;  %v862_v37 = vadd.f32 %v861_v33, %v802_v29 }
 0x1fb   : > { %v900_v38 = vpop.f32.mrf.mxu1  ;;  %v863_v39 = vpop.f32.mrf.mxu0 }
 0x1fc   : > { %v901_v40 = vadd.f32 %v900_v38, %v797_v22  ;;  %v864_v41 = vadd.f32 %v863_v39, %v802_v29  ;;  %941 = vrot.lane.b32.xlu1 %v929_v34, %s4801_s28  ;;  %v930_v44 = vmul.f32 %v5029_v36, %v908_v35  ;;  %v910_v46 = vmax.f32 %v862_v37, 0.0 }
 0x1fd   : > { %v4689_v43 = vpop.f32.mrf.mxu1 }
 0x1fe   : > { %v909_v45 = vmax.f32 %v901_v40, 0.0  ;;  %v911_v49 = vmax.f32 %v864_v41, 0.0  ;;  %v932_v52 = vmul.f32 %v5026_v26, %v910_v46 }
 0x1ff   : > { %v903_v47 = vpop.f32.mrf.mxu1 }
 0x200   : > { %v904_v48 = vadd.f32 %v903_v47, %v802_v29  ;;  %v931_v50 = vmul.f32 %v5031_v42, %v909_v45  ;;  %943 = vrot.lane.b32.xlu1 %v930_v44, %s4801_s28  ;;  %v933_v54 = vmul.f32 %v5029_v36, %v911_v49 }
 0x201   : > { %v4690_v51 = vpop.f32.mrf.mxu1 }
 0x202   : > { %945 = vrot.lane.b32.xlu0 %v931_v50, %s4801_s28  ;;  %v912_v53 = vmax.f32 %v904_v48, 0.0 }
 0x204   : > { %947 = vrot.lane.b32.xlu1 %v932_v52, %s4801_s28  ;;  %v934_v55 = vmul.f32 %v5031_v42, %v912_v53 }
 0x206   : > { %949 = vrot.lane.b32.xlu0 %v933_v54, %s4801_s28 }
 0x208   : > { %951 = vrot.lane.b32.xlu1 %v934_v55, %s4801_s28 }
 0x26e   : > { %v942_v56 = vpop.permute.xlu1 %941 }
 0x26f   : > { %963 = vst.msk [vmem:[#allocation2] sm:$0xff] %vm568_vm1, %v942_v56 }
 0x272   : > { %v944_v57 = vpop.permute.xlu1 %943 }
 0x273   : > { %v5074_v4 = vsel %vm562_vm3, %v942_v56, %v944_v57 }
 0x274   : > { %v946_v58 = vpop.permute.xlu0 %945 }
 0x275   : > { %v954_v59 = vsel %vm562_vm3, %v944_v57, %v946_v58 }
 0x276   : > { %965 = vst.msk [vmem:[#allocation2 + $0x10] sm:$0xff] %vm571_vm2, %v954_v59  ;;  %v948_v60 = vpop.permute.xlu1 %947  ;;  %v5047_v61 = vld [vmem:[#allocation2] sm:$0xff] }
 0x277   : > { %966 = vst.msk [vmem:[#allocation2 + $0x18] sm:$0xff] %vm568_vm1, %v948_v60  ;;  %1233 = vrot.lane.b32.xlu0 %v5047_v61, %s6734_s0 }
 0x278   : > { %v950_v62 = vpop.permute.xlu0 %949 }
 0x279   : > { %v5105_v6 = vsel %vm562_vm3, %v948_v60, %v950_v62 }
 0x27a   : > { %v952_v63 = vpop.permute.xlu1 %951 }
 0x27b   : > { %v956_v1 = vsel %vm562_vm3, %v950_v62, %v952_v63  ;;  %1193 = vrot.lane.b32.xlu0 %v5047_v61, %s6732_s30 }
 0x27c   : > { %968 = vst.msk [vmem:[#allocation2 + $0x28] sm:$0xff] %vm571_vm2, %v956_v1 }
 0x27d   : > { %v1223_v2 = vld [vmem:[#allocation2 + $0x10] sm:$0xff] }
 0x27e   : > { %1237 = vrot.lane.b32.xlu1 %v1223_v2, %s6734_s0  ;;  %977 = vst.msk [vmem:[#allocation3 + $0x10] sm:$0xff] %vm578_vm4, %v1223_v2  ;;  %v5082_v5 = vld [vmem:[#allocation2 + $0x18] sm:$0xff] }
 0x27f   : > { %1153 = vrot.lane.b32.xlu0 %v5047_v61, %s6730_s18 }
 0x282   : > { %1197 = vrot.lane.b32.xlu1 %v1223_v2, %s6732_s30 }
 0x283   : > { %v974_v3 = vld [vmem:[#allocation2 + $0x28] sm:$0xff]  ;;  %1113 = vrot.lane.b32.xlu0 %v5047_v61, %s6728_s17 }
 0x284   : > { %980 = vst.msk [vmem:[#allocation3 + $0x28] sm:$0xff] %vm578_vm4, %v974_v3 }
 0x286   : > { %1157 = vrot.lane.b32.xlu1 %v1223_v2, %s6730_s18 }
 0x287   : > { %1073 = vrot.lane.b32.xlu0 %v5047_v61, %s6742_s20 }
 0x28a   : > { %1117 = vrot.lane.b32.xlu1 %v1223_v2, %s6728_s17 }
 0x28b   : > { %1033 = vrot.lane.b32.xlu0 %v5047_v61, %s6740_s19 }
 0x28e   : > { %1077 = vrot.lane.b32.xlu1 %v1223_v2, %s6742_s20 }
 0x28f   : > { %993 = vrot.lane.b32.xlu0 %v5047_v61, %s6738_s23 }
 0x292   : > { %1037 = vrot.lane.b32.xlu1 %v1223_v2, %s6740_s19 }
 0x293   : > { %1235 = vrot.lane.b32.xlu0 %v5074_v4, %s6734_s0 }
 0x296   : > { %997 = vrot.lane.b32.xlu1 %v1223_v2, %s6738_s23 }
 0x297   : > { %1195 = vrot.lane.b32.xlu0 %v5074_v4, %s6732_s30 }
 0x29a   : > { %1239 = vrot.lane.b32.xlu1 %v5082_v5, %s6734_s0 }
 0x29b   : > { %1155 = vrot.lane.b32.xlu0 %v5074_v4, %s6730_s18 }
 0x29e   : > { %1199 = vrot.lane.b32.xlu1 %v5082_v5, %s6732_s30 }
 0x29f   : > { %1115 = vrot.lane.b32.xlu0 %v5074_v4, %s6728_s17 }
 0x2a2   : > { %1159 = vrot.lane.b32.xlu1 %v5082_v5, %s6730_s18 }
 0x2a3   : > { %1075 = vrot.lane.b32.xlu0 %v5074_v4, %s6742_s20 }
 0x2a6   : > { %1119 = vrot.lane.b32.xlu1 %v5082_v5, %s6728_s17 }
 0x2a7   : > { %1035 = vrot.lane.b32.xlu0 %v5074_v4, %s6740_s19 }
 0x2aa   : > { %1079 = vrot.lane.b32.xlu1 %v5082_v5, %s6742_s20 }
 0x2ab   : > { %995 = vrot.lane.b32.xlu0 %v5074_v4, %s6738_s23 }
 0x2ae   : > { %1039 = vrot.lane.b32.xlu1 %v5082_v5, %s6740_s19 }
 0x2af   : > { %1241 = vrot.lane.b32.xlu0 %v5105_v6, %s6734_s0 }
 0x2b2   : > { %999 = vrot.lane.b32.xlu1 %v5082_v5, %s6738_s23 }
 0x2b3   : > { %1201 = vrot.lane.b32.xlu0 %v5105_v6, %s6732_s30 }
 0x2b6   : > { %1243 = vrot.lane.b32.xlu1 %v974_v3, %s6734_s0  ;;  %s6769_s0 = smov 90  }
 0x2b7   : > { %1161 = vrot.lane.b32.xlu0 %v5105_v6, %s6730_s18 }
 0x2ba   : > { %1203 = vrot.lane.b32.xlu1 %v974_v3, %s6732_s30 }
 0x2bb   : > { %1121 = vrot.lane.b32.xlu0 %v5105_v6, %s6728_s17 }
 0x2be   : > { %1163 = vrot.lane.b32.xlu1 %v974_v3, %s6730_s18  ;;  %s6807_s18 = smov 126  }
 0x2bf   : > { %1081 = vrot.lane.b32.xlu0 %v5105_v6, %s6742_s20 }
 0x2c2   : > { %1123 = vrot.lane.b32.xlu1 %v974_v3, %s6728_s17 }
 0x2c3   : > { %1041 = vrot.lane.b32.xlu0 %v5105_v6, %s6740_s19 }
 0x2c6   : > { %1083 = vrot.lane.b32.xlu1 %v974_v3, %s6742_s20 }
 0x2c7   : > { %1001 = vrot.lane.b32.xlu0 %v5105_v6, %s6738_s23 }
 0x2ca   : > { %1043 = vrot.lane.b32.xlu1 %v974_v3, %s6740_s19 }
 0x2cb   : > { %1275 = vrot.lane.b32.xlu0 %v5074_v4, %s6736_s29 }
 0x2ce   : > { %1003 = vrot.lane.b32.xlu1 %v974_v3, %s6738_s23  ;;  %s6770_s23 = smov 91  }
 0x2cf   : > { %1281 = vrot.lane.b32.xlu0 %v5105_v6, %s6736_s29 }
 0x2d2   : > { %1277 = vrot.lane.b32.xlu1 %v1223_v2, %s6736_s29 }
 0x2d3   : > { %1273 = vrot.lane.b32.xlu0 %v5047_v61, %s6736_s29 }
 0x2d6   : > { %1283 = vrot.lane.b32.xlu1 %v974_v3, %s6736_s29 }
 0x2d7   : > { %1402 = vperm.xlu0 %4747, %v1388_v9  }
 0x2da   : > { %1279 = vrot.lane.b32.xlu1 %v5082_v5, %s6736_s29  ;;  %s6768_s29 = smov 127  }
 0x2db   : > { %1392 = vperm.xlu0 %4747, %v1386_v12  }
 0x2de   : > { %1407 = vperm.xlu1 %4746, %v1389_v13  }
 0x2df   : > { %1575 = vperm.xlu0 %4747, %v1561_v14  }
 0x2e2   : > { %1397 = vperm.xlu1 %4746, %v1387_v15  }
 0x2e3   : > { %1565 = vperm.xlu0 %4747, %v1559_v16  }
 0x2e6   : > { %1580 = vperm.xlu1 %4746, %v1562_v17  }
 0x2e9   : > { %v1234_v19 = vpop.permute.xlu0 %1233 }
 0x2ea   : > { %1570 = vperm.xlu1 %4746, %v1560_v18  }
 0x2ed   : > { %v1194_v20 = vpop.permute.xlu0 %1193 }
 0x2f0   : > { %v1238_v8 = vpop.permute.xlu1 %1237 }
 0x2f1   : > { %1257 = vst.msk [vmem:[#allocation3 + $0x160] sm:$0xff] %vm578_vm4, %v1238_v8  ;;  %v5172_v10 = vpop.permute.xlu0 %1153 }
 0x2f4   : > { %v1198_v21 = vpop.permute.xlu1 %1197 }
 0x2f5   : > { %1217 = vst.msk [vmem:[#allocation3 + $0x130] sm:$0xff] %vm578_vm4, %v1198_v21  ;;  %v5175_v22 = vpop.permute.xlu0 %1113 }
 0x2f8   : > { %v1158_v23 = vpop.permute.xlu1 %1157  ;;  %v1345_v12 = vld [vmem:[#allocation3 + $0x160] sm:$0xff] }
 0x2f9   : > { %1177 = vst.msk [vmem:[#allocation3 + $0x100] sm:$0xff] %vm578_vm4, %v1158_v23  ;;  %v5178_v24 = vpop.permute.xlu0 %1073 }
 0x2fc   : > { %v5180_v25 = vpop.permute.xlu1 %1117 }
 0x2fd   : > { %1137 = vst.msk [vmem:[#allocation3 + $0xd0] sm:$0xff] %vm578_vm4, %v5180_v25  ;;  %v5184_v27 = vpop.permute.xlu0 %1033 }
 0x300   : > { %v5186_v28 = vpop.permute.xlu1 %1077 }
 0x301   : > { %1097 = vst.msk [vmem:[#allocation3 + $0xa0] sm:$0xff] %vm578_vm4, %v5186_v28  ;;  %v5190_v29 = vpop.permute.xlu0 %993 }
 0x304   : > { %v5192_v30 = vpop.permute.xlu1 %1037 }
 0x305   : > { %1057 = vst.msk [vmem:[#allocation3 + $0x70] sm:$0xff] %vm578_vm4, %v5192_v30  ;;  %v1236_v31 = vpop.permute.xlu0 %1235 }
 0x306   : > { %v1246_v52 = vsel %vm718_vm8, %v1236_v31, %v1238_v8  ;;  %v1245_v55 = vsel %vm718_vm8, %v1234_v19, %v1236_v31  ;;  %v1339_v31 = vld [vmem:[#allocation3 + $0x130] sm:$0xff] }
 0x308   : > { %v5196_v32 = vpop.permute.xlu1 %997 }
 0x309   : > { %1017 = vst.msk [vmem:[#allocation3 + $0x40] sm:$0xff] %vm578_vm4, %v5196_v32  ;;  %v1196_v33 = vpop.permute.xlu0 %1195 }
 0x30a   : > { %v1206_v60 = vsel %vm697_vm9, %v1196_v33, %v1198_v21  ;;  %v1205_v1 = vsel %vm697_vm9, %v1194_v20, %v1196_v33 }
 0x30c   : > { %v1240_v34 = vpop.permute.xlu1 %1239 }
 0x30d   : > { %v1156_v35 = vpop.permute.xlu0 %1155 }
 0x30e   : > { %v1166_v14 = vsel %vm676_vm10, %v1156_v35, %v1158_v23  ;;  %v1165_v18 = vsel %vm676_vm10, %v5172_v10, %v1156_v35 }
 0x310   : > { %v1200_v37 = vpop.permute.xlu1 %1199 }
 0x311   : > { %v1116_v38 = vpop.permute.xlu0 %1115 }
 0x312   : > { %v1126_v33 = vsel %vm655_vm11, %v1116_v38, %v5180_v25  ;;  %v1125_v35 = vsel %vm655_vm11, %v5175_v22, %v1116_v38 }
 0x314   : > { %v1160_v39 = vpop.permute.xlu1 %1159 }
 0x315   : > { %v5200_v40 = vpop.permute.xlu0 %1075 }
 0x318   : > { %v1120_v41 = vpop.permute.xlu1 %1119 }
 0x319   : > { %v5202_v43 = vpop.permute.xlu0 %1035 }
 0x31c   : > { %v1080_v44 = vpop.permute.xlu1 %1079 }
 0x31d   : > { %v5204_v45 = vpop.permute.xlu0 %995 }
 0x320   : > { %v5206_v46 = vpop.permute.xlu1 %1039 }
 0x321   : > { %v1242_v47 = vpop.permute.xlu0 %1241 }
 0x322   : > { %v1247_v50 = vsel %vm718_vm8, %v1240_v34, %v1242_v47 }
 0x323   : > { %v1380_v57 = vpack.c.bf16 %v1247_v50, %v1245_v55  ;;  %v1333_v50 = vld [vmem:[#allocation3 + $0x100] sm:$0xff] }
 0x324   : > { %v5208_v48 = vpop.permute.xlu1 %999 }
 0x325   : > { %v1202_v49 = vpop.permute.xlu0 %1201 }
 0x326   : > { %v1207_v58 = vsel %vm697_vm9, %v1200_v37, %v1202_v49 }
 0x327   : > { %v1377_v3 = vpack.c.bf16 %v1207_v58, %v1205_v1  ;;  %v1046_v58 = vsel %vm613_vm13, %v5202_v43, %v5192_v30  ;;  %v1321_v30 = vld [vmem:[#allocation3 + $0xa0] sm:$0xff] }
 0x328   : > { %v1244_v51 = vpop.permute.xlu1 %1243 }
 0x329   : > { %v1248_v53 = vsel %vm718_vm8, %v1242_v47, %v1244_v51  ;;  %1260 = vst.msk [vmem:[#allocation3 + $0x178] sm:$0xff] %vm578_vm4, %v1244_v51  ;;  %v1162_v54 = vpop.permute.xlu0 %1161  ;;  %v1086_v51 = vsel %vm634_vm12, %v5200_v40, %v5186_v28  ;;  %v1327_v28 = vld [vmem:[#allocation3 + $0xd0] sm:$0xff] }
 0x32a   : > { %v1381_v56 = vpack.c.bf16 %v1248_v53, %v1246_v52  ;;  %v1167_v7 = vsel %vm676_vm10, %v1160_v39, %v1162_v54 }
 0x32b   : > { %v1374_v20 = vpack.c.bf16 %v1167_v7, %v1165_v18 }
 0x32c   : > { %v1204_v59 = vpop.permute.xlu1 %1203  ;;  %1435 = vmatprep.subr.bf16.mxu0 %v1381_v56 }
 0x32d   : > { %v1208_v62 = vsel %vm697_vm9, %v1202_v49, %v1204_v59  ;;  %1220 = vst.msk [vmem:[#allocation3 + $0x148] sm:$0xff] %vm578_vm4, %v1204_v59  ;;  %v1122_v63 = vpop.permute.xlu0 %1121  ;;  %1436 = vmatpush1.bf16.msra.mxu0 %v1380_v57 }
 0x32e   : > { %v1378_v2 = vpack.c.bf16 %v1208_v62, %v1206_v60  ;;  %v1127_v8 = vsel %vm655_vm11, %v1120_v41, %v1122_v63 }
 0x32f   : > { %v1371_v41 = vpack.c.bf16 %v1127_v8, %v1125_v35  ;;  %v1306_v8 = vld [vmem:[#allocation3 + $0x28] sm:$0xff] }
 0x330   : > { %v1164_v9 = vpop.permute.xlu1 %1163  ;;  %v1348_v13 = vld [vmem:[#allocation3 + $0x178] sm:$0xff]  ;;  %1437 = vmatprep.subr.bf16.mxu0 %v1378_v2 }
 0x331   : > { %v1168_v15 = vsel %vm676_vm10, %v1162_v54, %v1164_v9  ;;  %1180 = vst.msk [vmem:[#allocation3 + $0x118] sm:$0xff] %vm578_vm4, %v1164_v9  ;;  %v1382_v16 = vpack.c.bf16 %v1348_v13, %v1345_v12  ;;  %v1082_v17 = vpop.permute.xlu0 %1081  ;;  %1438 = vmatpush1.bf16.msra.mxu0 %v1377_v3  ;;  %v1006_v3 = vsel %vm592_vm14, %v5204_v45, %v5196_v32 }
 0x332   : > { %v1375_v19 = vpack.c.bf16 %v1168_v15, %v1166_v14  ;;  %v1087_v47 = vsel %vm634_vm12, %v1080_v44, %v1082_v17  ;;  %v1085_v44 = vsel %vm634_vm12, %v5178_v24, %v5200_v40  ;;  %v1045_v40 = vsel %vm613_vm13, %v5184_v27, %v5202_v43  ;;  %v1315_v14 = vld [vmem:[#allocation3 + $0x70] sm:$0xff] }
 0x333   : > { %1489 = vmatpush1.bf16.msra.mxu1 %v1382_v16  ;;  %v1368_v54 = vpack.c.bf16 %v1087_v47, %v1085_v44  ;;  %v1005_v43 = vsel %vm592_vm14, %v5190_v29, %v5204_v45  ;;  %v1360_v32 = vpack.c.bf16 %v5105_v6, %v5074_v4  ;;  %v1359_v29 = vpack.c.bf16 %v5082_v5, %v5047_v61  ;;  %v1303_v61 = vld [vmem:[#allocation3 + $0x10] sm:$0xff] }
 0x334   : > { %v1124_v21 = vpop.permute.xlu1 %1123  ;;  %1490 = vmatprep.subr.bf16.mxu1 %v6746_v11  ;;  %v1342_v23 = vld [vmem:[#allocation3 + $0x148] sm:$0xff]  ;;  %1439 = vmatprep.subr.bf16.mxu0 %v1375_v19  ;;  %v4754_v47 = vld [vmem:[%s6716_s5 + $0x10] ss:$8 sps:$4 sm:$0xff]  }
 0x335   : > { %v1128_v34 = vsel %vm655_vm11, %v1122_v63, %v1124_v21  ;;  %1140 = vst.msk [vmem:[#allocation3 + $0xe8] sm:$0xff] %vm578_vm4, %v1124_v21  ;;  %v1379_v37 = vpack.c.bf16 %v1342_v23, %v1339_v31  ;;  %v1042_v10 = vpop.permute.xlu0 %1041  ;;  %1440 = vmatpush1.bf16.msra.mxu0 %v1374_v20 }
 0x336   : > { %v1372_v39 = vpack.c.bf16 %v1128_v34, %v1126_v33  ;;  %v1047_v55 = vsel %vm613_vm13, %v5206_v46, %v1042_v10  ;;  %v1361_v33 = vpack.c.bf16 %v1306_v8, %v1303_v61 }
 0x337   : > { %1491 = vmatpush1.bf16.msra.mxu1 %v1379_v37  ;;  %v1365_v62 = vpack.c.bf16 %v1047_v55, %v1045_v40  ;;  %v4751_v37 = vld [vmem:[%s6716_s5] ss:$8 sps:$4 sm:$0xff]  }
 0x338   : > { %v1084_v49 = vpop.permute.xlu1 %1083  ;;  %1492 = vmatprep.subr.bf16.mxu1 %v6746_v11  ;;  %v1336_v25 = vld [vmem:[#allocation3 + $0x118] sm:$0xff]  ;;  %1441 = vmatprep.subr.bf16.mxu0 %v1372_v39 }
 0x339   : > { %v1088_v52 = vsel %vm634_vm12, %v1082_v17, %v1084_v49  ;;  %1100 = vst.msk [vmem:[#allocation3 + $0xb8] sm:$0xff] %vm578_vm4, %v1084_v49  ;;  %v1376_v22 = vpack.c.bf16 %v1336_v25, %v1333_v50  ;;  %v1002_v38 = vpop.permute.xlu0 %1001  ;;  %1442 = vmatpush1.bf16.msra.mxu0 %v1371_v41  ;;  %v1309_v17 = vld [vmem:[#allocation3 + $0x40] sm:$0xff]  ;;  %v4752_v39 = vld [vmem:[%s6716_s5 + $0x14] ss:$8 sps:$4 sm:$0xff]  }
 0x33a   : > { %v1369_v53 = vpack.c.bf16 %v1088_v52, %v1086_v51  ;;  %v1007_v63 = vsel %vm592_vm14, %v5208_v48, %v1002_v38  ;;  %v4755_v49 = vld [vmem:[%s6718_s7] sm:$0xff]  }
 0x33b   : > { %1493 = vmatpush1.bf16.msra.mxu1 %v1376_v22  ;;  %v1362_v9 = vpack.c.bf16 %v1007_v63, %v1005_v43 }
 0x33c   : > { %v1044_v56 = vpop.permute.xlu1 %1043  ;;  %1494 = vmatprep.subr.bf16.mxu1 %v6746_v11  ;;  %v1330_v57 = vld [vmem:[#allocation3 + $0xe8] sm:$0xff]  ;;  %1443 = vmatprep.subr.bf16.mxu0 %v1369_v53 }
 0x33d   : > { %v1048_v59 = vsel %vm613_vm13, %v1042_v10, %v1044_v56  ;;  %1060 = vst.msk [vmem:[#allocation3 + $0x88] sm:$0xff] %vm578_vm4, %v1044_v56  ;;  %v1373_v24 = vpack.c.bf16 %v1330_v57, %v1327_v28  ;;  %1444 = vmatpush1.bf16.msra.mxu0 %v1368_v54  ;;  %v1276_v46 = vpop.permute.xlu0 %1275 }
 0x33e   : > { %v1366_v60 = vpack.c.bf16 %v1048_v59, %v1046_v58 }
 0x33f   : > { %1495 = vmatpush1.bf16.msra.mxu1 %v1373_v24 }
 0x340   : > { %v1004_v1 = vpop.permute.xlu1 %1003  ;;  %1496 = vmatprep.subr.bf16.mxu1 %v6746_v11  ;;  %v1324_v2 = vld [vmem:[#allocation3 + $0xb8] sm:$0xff]  ;;  %1445 = vmatprep.subr.bf16.mxu0 %v1366_v60 }
 0x341   : > { %v1008_v7 = vsel %vm592_vm14, %v1002_v38, %v1004_v1  ;;  %1020 = vst.msk [vmem:[#allocation3 + $0x58] sm:$0xff] %vm578_vm4, %v1004_v1  ;;  %v1370_v27 = vpack.c.bf16 %v1324_v2, %v1321_v30  ;;  %1446 = vmatpush1.bf16.msra.mxu0 %v1365_v62  ;;  %v1282_v12 = vpop.permute.xlu0 %1281 }
 0x342   : > { %v1363_v48 = vpack.c.bf16 %v1008_v7, %v1006_v3 }
 0x343   : > { %1497 = vmatpush1.bf16.msra.mxu1 %v1370_v27 }
 0x344   : > { %v1278_v13 = vpop.permute.xlu1 %1277  ;;  %1498 = vmatprep.subr.bf16.mxu1 %v6746_v11  ;;  %v1318_v15 = vld [vmem:[#allocation3 + $0x88] sm:$0xff]  ;;  %1447 = vmatprep.subr.bf16.mxu0 %v1363_v48 }
 0x345   : > { %1297 = vst.msk [vmem:[#allocation3 + $0x190] sm:$0xff] %vm578_vm4, %v1278_v13  ;;  %v1367_v16 = vpack.c.bf16 %v1318_v15, %v1315_v14  ;;  %1448 = vmatpush1.bf16.msra.mxu0 %v1362_v9  ;;  %v1286_v19 = vsel %vm739_vm6, %v1276_v46, %v1278_v13  ;;  %v1274_v6 = vpop.permute.xlu0 %1273 }
 0x346   : > { %1449 = vmatprep.subr.bf16.mxu0 %v1360_v32  ;;  %v1285_v5 = vsel %vm739_vm6, %v1274_v6, %v1276_v46 }
 0x347   : > { %1499 = vmatpush1.bf16.msra.mxu1 %v1367_v16 }
 0x348   : > { %v1284_v45 = vpop.permute.xlu1 %1283  ;;  %1500 = vmatprep.subr.bf16.mxu1 %v6746_v11  ;;  %v1312_v18 = vld [vmem:[#allocation3 + $0x58] sm:$0xff] }
 0x349   : > { %v1288_v20 = vsel %vm739_vm6, %v1282_v12, %v1284_v45  ;;  %1300 = vst.msk [vmem:[#allocation3 + $0x1a8] sm:$0xff] %vm578_vm4, %v1284_v45  ;;  %v1364_v4 = vpack.c.bf16 %v1312_v18, %v1309_v17  ;;  %1450 = vmatpush1.bf16.msra.mxu0 %v1359_v29 }
 0x34a   : > { %v1384_v21 = vpack.c.bf16 %v1288_v20, %v1286_v19 }
 0x34b   : > { %1501 = vmatpush1.bf16.msra.mxu1 %v1364_v4 }
 0x34c   : > { %v1280_v31 = vpop.permute.xlu1 %1279  ;;  %1502 = vmatprep.subr.bf16.mxu1 %v6746_v11  ;;  %1465 = vmatprep.subr.bf16.mxu0 %v1384_v21  ;;  %v1351_v10 = vld [vmem:[#allocation3 + $0x190] sm:$0xff] }
 0x34d   : > { %v1287_v23 = vsel %vm739_vm6, %v1280_v31, %v1282_v12 }
 0x34e   : > { %v1383_v34 = vpack.c.bf16 %v1287_v23, %v1285_v5 }
 0x34f   : > { %1503 = vmatpush1.bf16.msra.mxu1 %v1361_v33  ;;  %v4756_v33 = vld [vmem:[%s6718_s7 + $0x8] sm:$0xff]  }
 0x350   : > { %1518 = vmatprep.subr.bf16.mxu1 %v6746_v11  ;;  %v1354_v35 = vld [vmem:[#allocation3 + $0x1a8] sm:$0xff]  ;;  %1466 = vmatpush2.bf16.msra.mxu0 %v1383_v34 }
 0x351   : > { %v1385_v41 = vpack.c.bf16 %v1354_v35, %v1351_v10 }
 0x352   : > { %v1403_v54 = vpop.permute.xlu0 %1402 }
 0x353   : > { %1519 = vmatpush2.bf16.msra.mxu1 %v1385_v41  ;;  %1468 = vmatmul.mubr.bf16.vlgmr.msra.gmra.mxu0 %v4751_v37 }
 0x354   : > { %4543 = vmatprep.mubr.msk.bf16.mxu0 %vm1428_vm0, %v4752_v39 }
 0x356   : > { %1521 = vmatmul.mubr.bf16.vlgmr.msra.gmra.mxu1 %v4751_v37  ;;  %v1393_v62 = vpop.permute.xlu0 %1392 }
 0x357   : > { %4545 = vmatprep.mubr.msk.bf16.mxu1 %vm1428_vm0, %v4752_v39 }
 0x359   : > { %v1408_v38 = vpop.permute.xlu1 %1407 }
 0x35a   : > { %v1576_v34 = vpop.permute.xlu0 %1575 }
 0x35b   : > { %1478 = vmatmul.mubr.bf16.gmra.mxu0 %v4754_v47 }
 0x35c   : > { %1632 = vmatprep.mubr.bf16.mxu0 %v6746_v11 }
 0x35d   : > { %v1398_v58 = vpop.permute.xlu1 %1397 }
 0x35e   : > { %1529 = vmatmul.mubr.bf16.gmra.mxu1 %v4754_v47  ;;  %v1566_v41 = vpop.permute.xlu0 %1565 }
 0x35f   : > { %4695 = vmatprep.mubr.msk.bf16.mxu1 %vm1593_vm7, %v4755_v49 }
 0x413   : > { %v1469_v50 = vpop.f32.mrf.mxu0 }
 0x414   : > { %v1470_v13 = vadd.f32 %v1469_v50, %v1393_v62 }
 0x415   : > { %v1471_v25 = vpop.f32.mrf.mxu0 }
 0x416   : > { %v1522_v51 = vpop.f32.mrf.mxu1  ;;  %v1472_v3 = vadd.f32 %v1471_v25, %v1393_v62  ;;  %v1537_v5 = vmax.f32 %v1470_v13, 0.0 }
 0x417   : > { %v1473_v52 = vpop.f32.mrf.mxu0  ;;  %v1523_v43 = vadd.f32 %v1522_v51, %v1393_v62 }
 0x418   : > { %v1524_v22 = vpop.f32.mrf.mxu1  ;;  %v1474_v48 = vadd.f32 %v1473_v52, %v1398_v58  ;;  %v1538_v19 = vmax.f32 %v1472_v3, 0.0 }
 0x419   : > { %v1475_v44 = vpop.f32.mrf.mxu0  ;;  %v1539_v4 = vmax.f32 %v1523_v43, 0.0 }
 0x41a   : > { %v1525_v53 = vpop.f32.mrf.mxu1  ;;  %v1476_v40 = vadd.f32 %v1475_v44, %v1398_v58  ;;  %v1540_v6 = vmax.f32 %v1474_v48, 0.0 }
 0x41b   : > { %v1479_v55 = vpop.f32.mrf.mxu0  ;;  %v1526_v63 = vadd.f32 %v1525_v53, %v1398_v58 }
 0x41c   : > { %v1527_v56 = vpop.f32.mrf.mxu1  ;;  %v1480_v30 = vadd.f32 %v1479_v55, %v1403_v54  ;;  %v1541_v14 = vmax.f32 %v1476_v40, 0.0  ;;  %v1553_v23 = vpack.c.bf16 %v1540_v6, %v1537_v5 }
 0x41d   : > { %v1481_v28 = vpop.f32.mrf.mxu0  ;;  %v1542_v29 = vmax.f32 %v1526_v63, 0.0 }
 0x41e   : > { %v1530_v57 = vpop.f32.mrf.mxu1  ;;  %v1482_v46 = vadd.f32 %v1481_v28, %v1403_v54  ;;  %v1543_v18 = vmax.f32 %v1480_v30, 0.0  ;;  %v1554_v31 = vpack.c.bf16 %v1541_v14, %v1538_v19 }
 0x41f   : > { %v1483_v59 = vpop.f32.mrf.mxu0  ;;  %v1531_v1 = vadd.f32 %v1530_v57, %v1403_v54  ;;  %v1555_v61 = vpack.c.bf16 %v1542_v29, %v1539_v4 }
 0x420   : > { %v1532_v24 = vpop.f32.mrf.mxu1  ;;  %v1484_v60 = vadd.f32 %v1483_v59, %v1408_v38  ;;  %v1544_v32 = vmax.f32 %v1482_v46, 0.0 }
 0x421   : > { %v1485_v2 = vpop.f32.mrf.mxu0  ;;  %v1545_v45 = vmax.f32 %v1531_v1, 0.0 }
 0x422   : > { %v1533_v7 = vpop.f32.mrf.mxu1  ;;  %v1486_v27 = vadd.f32 %v1485_v2, %v1408_v38  ;;  %v1546_v12 = vmax.f32 %v1484_v60, 0.0 }
 0x423   : > { %v1534_v9 = vadd.f32 %v1533_v7, %v1408_v38 }
 0x424   : > { %v1535_v15 = vpop.f32.mrf.mxu1  ;;  %v1547_v16 = vmax.f32 %v1486_v27, 0.0  ;;  %v1556_v21 = vpack.c.bf16 %v1546_v12, %v1543_v18 }
 0x425   : > { %v1548_v17 = vmax.f32 %v1534_v9, 0.0 }
 0x426   : > { %v1557_v20 = vpack.c.bf16 %v1547_v16, %v1544_v32 }
 0x427   : > { %v1558_v8 = vpack.c.bf16 %v1548_v17, %v1545_v45 }
 0x428   : > { %1612 = vmatprep.subr.bf16.mxu0 %v1557_v20 }
 0x429   : > { %4691 = vmatprep.subr.bf16.mxu1 %v1558_v8  ;;  %1613 = vmatpush1.bf16.msra.mxu0 %v1556_v21 }
 0x42a   : > { %4692 = vmatpush3.bf16.msra.mxu1 %v1558_v8  ;;  %1614 = vmatprep.subr.bf16.mxu0 %v1554_v31 }
 0x42b   : > { %4693 = vmatprep.subr.bf16.mxu1 %v1555_v61 }
 0x42d   : > { %1615 = vmatpush1.bf16.msra.mxu0 %v1553_v23 }
 0x42e   : > { %4694 = vmatpush3.bf16.msra.mxu1 %v1555_v61 }
 0x430   : > { %4548 = vmatmul.mubr.msk.bf16.vlgmr.msra.gmra.mxu0 %vm1593_vm7, %v4755_v49  ;;  %v1581_v49 = vpop.permute.xlu1 %1580 }
 0x431   : > { %4696 = vmatmul.mubr.msk.bf16.vlgmr.msra.gmra.mxu1 %vm1593_vm7, %v4756_v33  ;;  %1642 = vmatprep.mubr.bf16.mxu0 %v6746_v11 }
 0x432   : > { %2761 = vmatprep.mubr.bf16.mxu1 %v6746_v11 }
 0x434   : > { %v1571_v58 = vpop.permute.xlu1 %1570 }
 0x438   : > { %4549 = vmatmul.mubr.msk.bf16.gmra.mxu0 %vm1593_vm7, %v4756_v33 }
 0x4f0   : > { %v1634_v37 = vpop.f32.mrf.mxu0 }
 0x4f1   : > { %v4697_v10 = vpop.f32.mrf.mxu1  ;;  %v1635_v54 = vadd.f32 %v1634_v37, %v1566_v41 }
 0x4f2   : > { %v1696_v35 = vadd.f32 %v4697_v10, %v1576_v34  ;;  %v1636_v39 = vpop.f32.mrf.mxu0 }
 0x4f3   : > { %v1687_v47 = vpop.f32.mrf.mxu1  ;;  %v1637_v55 = vadd.f32 %v1636_v39, %v1566_v41  ;;  %v1702_v24 = vmul.f32 %v1635_v54, %v5026_v26 }
 0x4f4   : > { %v1710_v50 = vmul.f32 %v1696_v35, %v5031_v42  ;;  %v1688_v25 = vadd.f32 %v1687_v47, %v1566_v41  ;;  %v1638_v51 = vpop.f32.mrf.mxu0 }
 0x4f5   : > { %v4698_v52 = vpop.f32.mrf.mxu1  ;;  %v1703_v40 = vmul.f32 %v1637_v55, %v5029_v36  ;;  %v1639_v63 = vadd.f32 %v1638_v51, %v1571_v58 }
 0x4f6   : > { %v1699_v22 = vadd.f32 %v4698_v52, %v1581_v49  ;;  %1742 = vrot.lane.b32.xlu0 %v1710_v50, %s4801_s28  ;;  %v1640_v38 = vpop.f32.mrf.mxu0  ;;  %v1704_v44 = vmul.f32 %v1688_v25, %v5031_v42 }
 0x4f7   : > { %v1690_v28 = vpop.f32.mrf.mxu1  ;;  %v1641_v46 = vadd.f32 %v1640_v38, %v1571_v58  ;;  %v1705_v3 = vmul.f32 %v1639_v63, %v5026_v26 }
 0x4f8   : > { %v1713_v53 = vmul.f32 %v1699_v22, %v5031_v42  ;;  %v1644_v56 = vpop.f32.mrf.mxu0  ;;  %v1691_v59 = vadd.f32 %v1690_v28, %v1571_v58 }
 0x4f9   : > { %v1706_v1 = vmul.f32 %v1641_v46, %v5029_v36  ;;  %v1645_v30 = vadd.f32 %v1644_v56, %v1576_v34 }
 0x4fa   : > { %1748 = vrot.lane.b32.xlu1 %v1713_v53, %s4801_s28  ;;  %1730 = vrot.lane.b32.xlu0 %v1704_v44, %s4801_s28  ;;  %v1646_v57 = vpop.f32.mrf.mxu0  ;;  %v1707_v62 = vmul.f32 %v1691_v59, %v5031_v42 }
 0x4fb   : > { %v1708_v7 = vmul.f32 %v1645_v30, %v5026_v26  ;;  %v1647_v27 = vadd.f32 %v1646_v57, %v1576_v34 }
 0x4fc   : > { %v1648_v60 = vpop.f32.mrf.mxu0 }
 0x4fd   : > { %v1709_v48 = vmul.f32 %v1647_v27, %v5029_v36  ;;  %v1649_v9 = vadd.f32 %v1648_v60, %v1581_v49 }
 0x4fe   : > { %1726 = vrot.lane.b32.xlu0 %v1702_v24, %s4801_s28  ;;  %1728 = vrot.lane.b32.xlu1 %v1703_v40, %s4801_s28  ;;  %v1650_v2 = vpop.f32.mrf.mxu0 }
 0x4ff   : > { %v1651_v43 = vadd.f32 %v1650_v2, %v1581_v49  ;;  %v1711_v13 = vmul.f32 %v1649_v9, %v5026_v26 }
 0x501   : > { %v1712_v12 = vmul.f32 %v1651_v43, %v5029_v36 }
 0x502   : > { %1736 = vrot.lane.b32.xlu1 %v1707_v62, %s4801_s28  ;;  %1734 = vrot.lane.b32.xlu0 %v1706_v1, %s4801_s28 }
 0x506   : > { %1732 = vrot.lane.b32.xlu1 %v1705_v3, %s4801_s28  ;;  %1738 = vrot.lane.b32.xlu0 %v1708_v7, %s4801_s28 }
 0x50a   : > { %1740 = vrot.lane.b32.xlu1 %v1709_v48, %s4801_s28  ;;  %1746 = vrot.lane.b32.xlu0 %v1712_v12, %s4801_s28 }
 0x50e   : > { %1744 = vrot.lane.b32.xlu1 %v1711_v13, %s4801_s28 }
 0x568   : > { %v1743_v14 = vpop.permute.xlu0 %1742 }
 0x56c   : > { %v1749_v15 = vpop.permute.xlu1 %1748  ;;  %v1731_v32 = vpop.permute.xlu0 %1730 }
 0x570   : > { %v1727_v16 = vpop.permute.xlu0 %1726  ;;  %v1729_v29 = vpop.permute.xlu1 %1728 }
 0x571   : > { %1770 = vst.msk [vmem:[#allocation2] sm:$0xff] %vm568_vm1, %v1727_v16  ;;  %v5330_v45 = vsel %vm562_vm3, %v1727_v16, %v1729_v29  ;;  %v1751_v17 = vsel %vm562_vm3, %v1729_v29, %v1731_v32 }
 0x572   : > { %1771 = vst [vmem:[#allocation2 + $0x8] sm:$0xff] %v5330_v45  ;;  %1772 = vst.msk [vmem:[#allocation2 + $0x10] sm:$0xff] %vm571_vm2, %v1751_v17  ;;  %v5666_v17 = vld [vmem:[%s6720_s9 + $0x4] ss:$12 sps:$4 sm:$0xff]  }
 0x573   : > { %6782 = vst [vmem:[#allocation15_spill] sm:$0xff] %v5666_v17  ;;  %2708 = vmatprep.mubr.bf16.mxu0 %v5666_v17 }
 0x574   : > { %v1737_v18 = vpop.permute.xlu1 %1736  ;;  %v1735_v19 = vpop.permute.xlu0 %1734 }
 0x575   : > { %v1753_v20 = vsel %vm562_vm3, %v1735_v19, %v1737_v18 }
 0x576   : > { %1775 = vst.msk [vmem:[#allocation2 + $0x28] sm:$0xff] %vm571_vm2, %v1753_v20 }
 0x578   : > { %v1733_v4 = vpop.permute.xlu1 %1732  ;;  %v5337_v6 = vld [vmem:[#allocation2] sm:$0xff]  ;;  %v5339_v8 = vpop.permute.xlu0 %1738 }
 0x579   : > { %1773 = vst.msk [vmem:[#allocation2 + $0x18] sm:$0xff] %vm568_vm1, %v1733_v4  ;;  %1990 = vrot.lane.b32.xlu0 %v5337_v6, %s6742_s20  ;;  %1776 = vst.msk [vmem:[#allocation2 + $0x30] sm:$0xff] %vm568_vm1, %v5339_v8  ;;  %v5346_v21 = vld [vmem:[#allocation2 + $0x10] sm:$0xff]  ;;  %v5427_v47 = vsel %vm562_vm3, %v1733_v4, %v1735_v19 }
 0x57a   : > { %v1784_v31 = vld [vmem:[#allocation2 + $0x10] sm:$0xff]  ;;  %1994 = vrot.lane.b32.xlu1 %v5346_v21, %s6742_s20 }
 0x57b   : > { %1796 = vst.msk [vmem:[#allocation3 + $0x10] sm:$0xff] %vm578_vm4, %v1784_v31 }
 0x57c   : > { %v5351_v61 = vpop.permute.xlu1 %1740  ;;  %v5353_v5 = vpop.permute.xlu0 %1746 }
 0x57d   : > { %v1755_v23 = vsel %vm562_vm3, %v5351_v61, %v1743_v14  ;;  %1910 = vrot.lane.b32.xlu0 %v5337_v6, %s6740_s19  ;;  %v1757_v33 = vsel %vm562_vm3, %v5353_v5, %v1749_v15  ;;  %v1787_v34 = vld [vmem:[#allocation2 + $0x28] sm:$0xff]  ;;  %v5476_v51 = vsel %vm562_vm3, %v5339_v8, %v5351_v61 }
 0x57e   : > { %1778 = vst.msk [vmem:[#allocation2 + $0x40] sm:$0xff] %vm571_vm2, %v1755_v23  ;;  %1781 = vst.msk [vmem:[#allocation2 + $0x58] sm:$0xff] %vm571_vm2, %v1757_v33  ;;  %1914 = vrot.lane.b32.xlu1 %v5346_v21, %s6740_s19  ;;  %v5410_v41 = vld [vmem:[#allocation2 + $0x28] sm:$0xff] }
 0x57f   : > { %1799 = vst.msk [vmem:[#allocation3 + $0x28] sm:$0xff] %vm578_vm4, %v1787_v34 }
 0x580   : > { %v5366_v37 = vpop.permute.xlu1 %1744  ;;  %v5388_v39 = vld [vmem:[#allocation2 + $0x18] sm:$0xff]  ;;  %v5445_v50 = vld [vmem:[#allocation2 + $0x30] sm:$0xff] }
 0x581   : > { %1779 = vst.msk [vmem:[#allocation2 + $0x48] sm:$0xff] %vm568_vm1, %v5366_v37  ;;  %1830 = vrot.lane.b32.xlu0 %v5337_v6, %s6768_s29  ;;  %v5527_v53 = vsel %vm562_vm3, %v5366_v37, %v5353_v5  ;;  %v2617_v5 = vld [vmem:[%s6721_s10 + $0x8] sm:$0xff] }
 0x582   : > { %1834 = vrot.lane.b32.xlu1 %v5346_v21, %s6768_s29 }
 0x585   : > { %v5374_v10 = vld [vmem:[#allocation2 + $0x40] sm:$0xff]  ;;  %v5376_v35 = vld [vmem:[#allocation2 + $0x58] sm:$0xff]  ;;  %2390 = vrot.lane.b32.xlu0 %v5337_v6, %s6769_s0 }
 0x586   : > { %1802 = vst.msk [vmem:[#allocation3 + $0x40] sm:$0xff] %vm578_vm4, %v5374_v10  ;;  %1805 = vst.msk [vmem:[#allocation3 + $0x58] sm:$0xff] %vm578_vm4, %v5376_v35  ;;  %2394 = vrot.lane.b32.xlu1 %v5346_v21, %s6769_s0 }
 0x588   : > { %v5463_v25 = vld [vmem:[#allocation2 + $0x48] sm:$0xff] }
 0x589   : > { %2310 = vrot.lane.b32.xlu0 %v5337_v6, %s6770_s23 }
 0x58a   : > { %1996 = vrot.lane.b32.xlu1 %v5388_v39, %s6742_s20 }
 0x58d   : > { %1992 = vrot.lane.b32.xlu0 %v5330_v45, %s6742_s20 }
 0x58e   : > { %1916 = vrot.lane.b32.xlu1 %v5388_v39, %s6740_s19 }
 0x591   : > { %1912 = vrot.lane.b32.xlu0 %v5330_v45, %s6740_s19 }
 0x592   : > { %1836 = vrot.lane.b32.xlu1 %v5388_v39, %s6768_s29 }
 0x595   : > { %1832 = vrot.lane.b32.xlu0 %v5330_v45, %s6768_s29 }
 0x596   : > { %2396 = vrot.lane.b32.xlu1 %v5388_v39, %s6769_s0 }
 0x599   : > { %2392 = vrot.lane.b32.xlu0 %v5330_v45, %s6769_s0 }
 0x59a   : > { %2316 = vrot.lane.b32.xlu1 %v5388_v39, %s6770_s23 }
 0x59d   : > { %2314 = vrot.lane.b32.xlu0 %v5346_v21, %s6770_s23 }
 0x59e   : > { %2000 = vrot.lane.b32.xlu1 %v5410_v41, %s6742_s20 }
 0x5a1   : > { %2312 = vrot.lane.b32.xlu0 %v5330_v45, %s6770_s23 }
 0x5a2   : > { %1920 = vrot.lane.b32.xlu1 %v5410_v41, %s6740_s19 }
 0x5a5   : > { %2234 = vrot.lane.b32.xlu0 %v5346_v21, %s6771_s25 }
 0x5a6   : > { %1840 = vrot.lane.b32.xlu1 %v5410_v41, %s6768_s29 }
 0x5a9   : > { %2232 = vrot.lane.b32.xlu0 %v5330_v45, %s6771_s25 }
 0x5aa   : > { %2400 = vrot.lane.b32.xlu1 %v5410_v41, %s6769_s0 }
 0x5ad   : > { %1998 = vrot.lane.b32.xlu0 %v5427_v47, %s6742_s20 }
 0x5ae   : > { %2320 = vrot.lane.b32.xlu1 %v5410_v41, %s6770_s23 }
 0x5b1   : > { %1918 = vrot.lane.b32.xlu0 %v5427_v47, %s6740_s19 }
 0x5b2   : > { %2318 = vrot.lane.b32.xlu1 %v5427_v47, %s6770_s23 }
 0x5b5   : > { %1838 = vrot.lane.b32.xlu0 %v5427_v47, %s6768_s29 }
 0x5b6   : > { %2240 = vrot.lane.b32.xlu1 %v5410_v41, %s6771_s25 }
 0x5b9   : > { %2398 = vrot.lane.b32.xlu0 %v5427_v47, %s6769_s0 }
 0x5ba   : > { %2238 = vrot.lane.b32.xlu1 %v5427_v47, %s6771_s25 }
 0x5bd   : > { %2002 = vrot.lane.b32.xlu0 %v5445_v50, %s6742_s20 }
 0x5be   : > { %2006 = vrot.lane.b32.xlu1 %v5374_v10, %s6742_s20 }
 0x5c1   : > { %1922 = vrot.lane.b32.xlu0 %v5445_v50, %s6740_s19 }
 0x5c2   : > { %1926 = vrot.lane.b32.xlu1 %v5374_v10, %s6740_s19 }
 0x5c5   : > { %1842 = vrot.lane.b32.xlu0 %v5445_v50, %s6768_s29 }
 0x5c6   : > { %1846 = vrot.lane.b32.xlu1 %v5374_v10, %s6768_s29 }
 0x5c9   : > { %2402 = vrot.lane.b32.xlu0 %v5445_v50, %s6769_s0 }
 0x5ca   : > { %2406 = vrot.lane.b32.xlu1 %v5374_v10, %s6769_s0 }
 0x5cd   : > { %2322 = vrot.lane.b32.xlu0 %v5445_v50, %s6770_s23 }
 0x5ce   : > { %2008 = vrot.lane.b32.xlu1 %v5463_v25, %s6742_s20 }
 0x5d1   : > { %2242 = vrot.lane.b32.xlu0 %v5445_v50, %s6771_s25 }
 0x5d2   : > { %1928 = vrot.lane.b32.xlu1 %v5463_v25, %s6740_s19 }
 0x5d5   : > { %2004 = vrot.lane.b32.xlu0 %v5476_v51, %s6742_s20 }
 0x5d6   : > { %1848 = vrot.lane.b32.xlu1 %v5463_v25, %s6768_s29 }
 0x5d9   : > { %1924 = vrot.lane.b32.xlu0 %v5476_v51, %s6740_s19 }
 0x5da   : > { %2408 = vrot.lane.b32.xlu1 %v5463_v25, %s6769_s0 }
 0x5dd   : > { %1844 = vrot.lane.b32.xlu0 %v5476_v51, %s6768_s29 }
 0x5de   : > { %2328 = vrot.lane.b32.xlu1 %v5463_v25, %s6770_s23 }
 0x5e1   : > { %2404 = vrot.lane.b32.xlu0 %v5476_v51, %s6769_s0 }
 0x5e2   : > { %2248 = vrot.lane.b32.xlu1 %v5463_v25, %s6771_s25 }
 0x5e5   : > { %2326 = vrot.lane.b32.xlu0 %v5374_v10, %s6770_s23 }
 0x5e6   : > { %2012 = vrot.lane.b32.xlu1 %v5376_v35, %s6742_s20 }
 0x5e9   : > { %2324 = vrot.lane.b32.xlu0 %v5476_v51, %s6770_s23 }
 0x5ea   : > { %2236 = vrot.lane.b32.xlu1 %v5388_v39, %s6771_s25 }
 0x5eb   : > { %v5502_v49 = vpop.permute.xlu0 %1990 }
 0x5ec   : > { %v5504_v52 = vpop.permute.xlu1 %1994 }
 0x5ed   : > { %2036 = vst.msk [vmem:[#allocation3 + $0x130] sm:$0xff] %vm578_vm4, %v5504_v52  ;;  %2246 = vrot.lane.b32.xlu0 %v5374_v10, %s6771_s25 }
 0x5ee   : > { %1932 = vrot.lane.b32.xlu1 %v5376_v35, %s6740_s19 }
 0x5ef   : > { %v5512_v22 = vpop.permute.xlu0 %1910 }
 0x5f0   : > { %v5514_v38 = vpop.permute.xlu1 %1914 }
 0x5f1   : > { %1956 = vst.msk [vmem:[#allocation3 + $0xd0] sm:$0xff] %vm578_vm4, %v5514_v38  ;;  %2244 = vrot.lane.b32.xlu0 %v5476_v51, %s6771_s25 }
 0x5f2   : > { %1852 = vrot.lane.b32.xlu1 %v5376_v35, %s6768_s29 }
 0x5f3   : > { %v5522_v44 = vpop.permute.xlu0 %1830 }
 0x5f4   : > { %v5529_v54 = vpop.permute.xlu1 %1834 }
 0x5f5   : > { %1876 = vst.msk [vmem:[#allocation3 + $0x70] sm:$0xff] %vm578_vm4, %v5529_v54  ;;  %2010 = vrot.lane.b32.xlu0 %v5527_v53, %s6742_s20  ;;  %s4725_s20 = smul.u32 48, %s6830_s22 }
 0x5f6   : > { %2160 = vrot.lane.b32.xlu1 %v5410_v41, %s6772_s26 }
 0x5f7   : > { %v5537_v55 = vpop.permute.xlu0 %2390  ;;  %s6667_s24 = scalar_lea.vmem %s6727_s16, %s4725_s20 }
 0x5f8   : > { %v5539_v56 = vpop.permute.xlu1 %2394 }
 0x5f9   : > { %2436 = vst.msk [vmem:[#allocation3 + $0x310] sm:$0xff] %vm578_vm4, %v5539_v56  ;;  %2166 = vrot.lane.b32.xlu0 %v5374_v10, %s6772_s26 }
 0x5fa   : > { %2168 = vrot.lane.b32.xlu1 %v5463_v25, %s6772_s26 }
 0x5fb   : > { %v5547_v28 = vpop.permute.xlu0 %2310 }
 0x5fc   : > { %6773 = vst [vmem:[#allocation7_spill] sm:$0xff] %v5547_v28  ;;  %v5549_v57 = vpop.permute.xlu1 %1996 }
 0x5fd   : > { %1930 = vrot.lane.b32.xlu0 %v5527_v53, %s6740_s19 }
 0x5fe   : > { %2158 = vrot.lane.b32.xlu1 %v5427_v47, %s6772_s26 }
 0x5ff   : > { %v5555_v58 = vpop.permute.xlu0 %1992 }
 0x600   : > { %v5557_v59 = vpop.permute.xlu1 %1916 }
 0x601   : > { %2230 = vrot.lane.b32.xlu0 %v5337_v6, %s6771_s25 }
 0x602   : > { %2156 = vrot.lane.b32.xlu1 %v5388_v39, %s6772_s26 }
 0x603   : > { %v5563_v24 = vpop.permute.xlu0 %1912 }
 0x604   : > { %v5565_v40 = vpop.permute.xlu1 %1836 }
 0x605   : > { %1850 = vrot.lane.b32.xlu0 %v5527_v53, %s6768_s29 }
 0x606   : > { %2080 = vrot.lane.b32.xlu1 %v5410_v41, %s6774_s27 }
 0x607   : > { %v5571_v46 = vpop.permute.xlu0 %1832 }
 0x608   : > { %v5573_v60 = vpop.permute.xlu1 %2396 }
 0x609   : > { %2410 = vrot.lane.b32.xlu0 %v5527_v53, %s6769_s0 }
 0x60a   : > { %2412 = vrot.lane.b32.xlu1 %v5376_v35, %s6769_s0 }
 0x60b   : > { %v5579_v62 = vpop.permute.xlu0 %2392 }
 0x60c   : > { %v5581_v63 = vpop.permute.xlu1 %2316 }
 0x60d   : > { %6775 = vst [vmem:[#allocation8_spill] sm:$0xff] %v5581_v63  ;;  %2164 = vrot.lane.b32.xlu0 %v5476_v51, %s6772_s26 }
 0x60e   : > { %2088 = vrot.lane.b32.xlu1 %v5463_v25, %s6774_s27 }
 0x60f   : > { %v5587_v1 = vpop.permute.xlu0 %2314 }
 0x610   : > { %6776 = vst [vmem:[#allocation9_spill] sm:$0xff] %v5587_v1  ;;  %2356 = vst.msk [vmem:[#allocation3 + $0x2b0] sm:$0xff] %vm578_vm4, %v5587_v1  ;;  %v5591_v30 = vpop.permute.xlu1 %2000 }
 0x611   : > { %2039 = vst.msk [vmem:[#allocation3 + $0x148] sm:$0xff] %vm578_vm4, %v5591_v30  ;;  %2154 = vrot.lane.b32.xlu0 %v5346_v21, %s6772_s26 }
 0x612   : > { %2332 = vrot.lane.b32.xlu1 %v5376_v35, %s6770_s23 }
 0x613   : > { %v5599_v2 = vpop.permute.xlu0 %2312 }
 0x614   : > { %6777 = vst [vmem:[#allocation10_spill] sm:$0xff] %v5599_v2  ;;  %v5601_v3 = vpop.permute.xlu1 %1920 }
 0x615   : > { %1959 = vst.msk [vmem:[#allocation3 + $0xe8] sm:$0xff] %vm578_vm4, %v5601_v3  ;;  %2162 = vrot.lane.b32.xlu0 %v5445_v50, %s6772_s26 }
 0x616   : > { %2330 = vrot.lane.b32.xlu1 %v5527_v53, %s6770_s23 }
 0x617   : > { %v5609_v7 = vpop.permute.xlu0 %2234 }
 0x618   : > { %6778 = vst [vmem:[#allocation11_spill] sm:$0xff] %v5609_v7  ;;  %2276 = vst.msk [vmem:[#allocation3 + $0x250] sm:$0xff] %vm578_vm4, %v5609_v7  ;;  %v5613_v27 = vpop.permute.xlu1 %1840 }
 0x619   : > { %1879 = vst.msk [vmem:[#allocation3 + $0x88] sm:$0xff] %vm578_vm4, %v5613_v27  ;;  %2152 = vrot.lane.b32.xlu0 %v5330_v45, %s6772_s26 }
 0x61a   : > { %2252 = vrot.lane.b32.xlu1 %v5376_v35, %s6771_s25 }
 0x61b   : > { %v5621_v43 = vpop.permute.xlu0 %2232 }
 0x61c   : > { %6779 = vst [vmem:[#allocation12_spill] sm:$0xff] %v5621_v43  ;;  %v5623_v48 = vpop.permute.xlu1 %2400 }
 0x61d   : > { %2439 = vst.msk [vmem:[#allocation3 + $0x328] sm:$0xff] %vm578_vm4, %v5623_v48  ;;  %2086 = vrot.lane.b32.xlu0 %v5374_v10, %s6774_s27 }
 0x61e   : > { %2250 = vrot.lane.b32.xlu1 %v5527_v53, %s6771_s25 }
 0x61f   : > { %v5631_v9 = vpop.permute.xlu0 %1998 }
 0x620   : > { %v5633_v12 = vpop.permute.xlu1 %2320 }
 0x621   : > { %2359 = vst.msk [vmem:[#allocation3 + $0x2c8] sm:$0xff] %vm578_vm4, %v5633_v12  ;;  %2150 = vrot.lane.b32.xlu0 %v5337_v6, %s6772_s26 }
 0x622   : > { %2172 = vrot.lane.b32.xlu1 %v5376_v35, %s6772_s26 }
 0x623   : > { %v5641_v13 = vpop.permute.xlu0 %1918 }
 0x624   : > { %v5643_v14 = vpop.permute.xlu1 %2318 }
 0x625   : > { %2084 = vrot.lane.b32.xlu0 %v5476_v51, %s6774_s27 }
 0x626   : > { %2170 = vrot.lane.b32.xlu1 %v5527_v53, %s6772_s26 }
 0x627   : > { %v5649_v15 = vpop.permute.xlu0 %1838 }
 0x628   : > { %v5651_v32 = vpop.permute.xlu1 %2240 }
 0x629   : > { %6780 = vst [vmem:[#allocation13_spill] sm:$0xff] %v5651_v32  ;;  %2279 = vst.msk [vmem:[#allocation3 + $0x268] sm:$0xff] %vm578_vm4, %v5651_v32  ;;  %2074 = vrot.lane.b32.xlu0 %v5346_v21, %s6774_s27  ;;  %v2619_v21 = vld [vmem:[%s6721_s10 + $0x18] sm:$0xff] }
 0x62a   : > { %2092 = vrot.lane.b32.xlu1 %v5376_v35, %s6774_s27 }
 0x62b   : > { %v5659_v16 = vpop.permute.xlu0 %2398 }
 0x62c   : > { %v5661_v29 = vpop.permute.xlu1 %2238 }
 0x62d   : > { %6781 = vst [vmem:[#allocation14_spill] sm:$0xff] %v5661_v29  ;;  %2082 = vrot.lane.b32.xlu0 %v5445_v50, %s6774_s27  ;;  %v2017_v29 = vsel %vm634_vm12, %v5631_v9, %v5591_v30  ;;  %v2015_v30 = vsel %vm634_vm12, %v5555_v58, %v5504_v52 }
 0x62e   : > { %2090 = vrot.lane.b32.xlu1 %v5527_v53, %s6774_s27 }
 0x62f   : > { %v2003_v18 = vpop.permute.xlu0 %2002 }
 0x630   : > { %v2007_v19 = vpop.permute.xlu1 %2006 }
 0x631   : > { %2042 = vst.msk [vmem:[#allocation3 + $0x160] sm:$0xff] %vm578_vm4, %v2007_v19  ;;  %2072 = vrot.lane.b32.xlu0 %v5330_v45, %s6774_s27  ;;  %v2618_v45 = vld [vmem:[%s6721_s10 + $0x10] sm:$0xff] }
 0x632   : > { %2078 = vrot.lane.b32.xlu1 %v5427_v47, %s6774_s27 }
 0x633   : > { %v5678_v20 = vpop.permute.xlu0 %1922 }
 0x634   : > { %v5680_v4 = vpop.permute.xlu1 %1926 }
 0x635   : > { %1962 = vst.msk [vmem:[#allocation3 + $0x100] sm:$0xff] %vm578_vm4, %v5680_v4  ;;  %2070 = vrot.lane.b32.xlu0 %v5337_v6, %s6774_s27  ;;  %v2616_v6 = vld [vmem:[%s6721_s10] sm:$0xff] }
 0x636   : > { %2076 = vrot.lane.b32.xlu1 %v5388_v39, %s6774_s27 }
 0x637   : > { %v5691_v8 = vpop.permute.xlu0 %1842 }
 0x638   : > { %v5696_v31 = vpop.permute.xlu1 %1846 }
 0x639   : > { %1882 = vst.msk [vmem:[#allocation3 + $0xa0] sm:$0xff] %vm578_vm4, %v5696_v31  ;;  %2632 = vperm.xlu0 %4747, %v2618_v45  }
 0x63a   : > { %2637 = vperm.xlu1 %4746, %v2619_v21  }
 0x63b   : > { %v5703_v61 = vpop.permute.xlu0 %2402 }
 0x63c   : > { %v5708_v23 = vpop.permute.xlu1 %2406 }
 0x63d   : > { %2442 = vst.msk [vmem:[#allocation3 + $0x340] sm:$0xff] %vm578_vm4, %v5708_v23  ;;  %2622 = vperm.xlu0 %4747, %v2616_v6  }
 0x63e   : > { %2627 = vperm.xlu1 %4746, %v2617_v5  }
 0x63f   : > { %v5712_v33 = vpop.permute.xlu0 %2322 }
 0x640   : > { %v2009_v34 = vpop.permute.xlu1 %2008 }
 0x643   : > { %v5714_v37 = vpop.permute.xlu0 %2242 }
 0x644   : > { %6783 = vst [vmem:[#allocation16_spill] sm:$0xff] %v5714_v37  ;;  %v1929_v10 = vpop.permute.xlu1 %1928 }
 0x647   : > { %v2005_v35 = vpop.permute.xlu0 %2004 }
 0x648   : > { %v5716_v41 = vpop.permute.xlu1 %1848  ;;  %v2019_v28 = vsel %vm634_vm12, %v2005_v35, %v2007_v19 }
 0x64b   : > { %v1925_v45 = vpop.permute.xlu0 %1924 }
 0x64c   : > { %v5718_v21 = vpop.permute.xlu1 %2408 }
 0x64f   : > { %v1845_v0 = vpop.permute.xlu0 %1844 }
 0x650   : > { %v5720_v11 = vpop.permute.xlu1 %2328 }
 0x653   : > { %v5722_v36 = vpop.permute.xlu0 %2404 }
 0x654   : > { %v5724_v26 = vpop.permute.xlu1 %2248 }
 0x655   : > { %6784 = vst [vmem:[#allocation17_spill] sm:$0xff] %v5724_v26 }
 0x657   : > { %v5726_v6 = vpop.permute.xlu0 %2326 }
 0x658   : > { %2362 = vst.msk [vmem:[#allocation3 + $0x2e0] sm:$0xff] %vm578_vm4, %v5726_v6  ;;  %v2013_v5 = vpop.permute.xlu1 %2012 }
 0x659   : > { %2045 = vst.msk [vmem:[#allocation3 + $0x178] sm:$0xff] %vm578_vm4, %v2013_v5 }
 0x65b   : > { %v5731_v42 = vpop.permute.xlu0 %2324 }
 0x65c   : > { %v5733_v17 = vpop.permute.xlu1 %2236 }
 0x65d   : > { %6785 = vst [vmem:[#allocation18_spill] sm:$0xff] %v5733_v17  ;;  %v2018_v17 = vsel %vm634_vm12, %v2003_v18, %v2005_v35  ;;  %v2016_v18 = vsel %vm634_vm12, %v5549_v57, %v5631_v9  ;;  %v1937_v57 = vsel %vm613_vm13, %v5641_v13, %v5601_v3  ;;  %v1935_v3 = vsel %vm613_vm13, %v5563_v24, %v5514_v38 }
 0x65e   : > { %v1857_v38 = vsel %vm592_vm14, %v5649_v15, %v5613_v27  ;;  %v1855_v27 = vsel %vm592_vm14, %v5571_v46, %v5529_v54  ;;  %v2417_v54 = vsel %vm739_vm6, %v5659_v16, %v5623_v48  ;;  %v2566_v48 = vpack.c.bf16 %v5527_v53, %v5476_v51 }
 0x65f   : > { %v5735_v43 = vpop.permute.xlu0 %2246  ;;  %v2565_v51 = vpack.c.bf16 %v5463_v25, %v5445_v50  ;;  %v1782_v50 = vld [vmem:[#allocation2] sm:$0xff] }
 0x660   : > { %6786 = vst [vmem:[#allocation19_spill] sm:$0xff] %v5735_v43  ;;  %2282 = vst.msk [vmem:[#allocation3 + $0x280] sm:$0xff] %vm578_vm4, %v5735_v43  ;;  %v1933_v7 = vpop.permute.xlu1 %1932  ;;  %v2562_v25 = vpack.c.bf16 %v5388_v39, %v1782_v50 }
 0x661   : > { %1965 = vst.msk [vmem:[#allocation3 + $0x118] sm:$0xff] %vm578_vm4, %v1933_v7 }
 0x663   : > { %v5740_v26 = vpop.permute.xlu0 %2244 }
 0x664   : > { %6787 = vst [vmem:[#allocation20_spill] sm:$0xff] %v5740_v26  ;;  %v1853_v37 = vpop.permute.xlu1 %1852 }
 0x665   : > { %1885 = vst.msk [vmem:[#allocation3 + $0xb8] sm:$0xff] %vm578_vm4, %v1853_v37 }
 0x667   : > { %v2011_v32 = vpop.permute.xlu0 %2010 }
 0x668   : > { %v2020_v63 = vsel %vm634_vm12, %v2009_v34, %v2011_v32  ;;  %v2021_v43 = vsel %vm634_vm12, %v2011_v32, %v2013_v5  ;;  %v5750_v2 = vpop.permute.xlu1 %2160  ;;  %v2581_v34 = vpack.c.bf16 %v2017_v29, %v2015_v30 }
 0x669   : > { %2199 = vst.msk [vmem:[#allocation3 + $0x208] sm:$0xff] %vm578_vm4, %v5750_v2  ;;  %v2584_v26 = vpack.c.bf16 %v2021_v43, %v2019_v28  ;;  %v2583_v1 = vpack.c.bf16 %v2020_v63, %v2018_v17  ;;  %v2014_v28 = vsel %vm634_vm12, %v5502_v49, %v5555_v58  ;;  %v1939_v43 = vsel %vm613_vm13, %v1925_v45, %v5680_v4 }
 0x66a   : > { %v2580_v52 = vpack.c.bf16 %v2016_v18, %v2014_v28  ;;  %v1936_v17 = vsel %vm613_vm13, %v5557_v59, %v5641_v13  ;;  %v2575_v4 = vpack.c.bf16 %v1937_v57, %v1935_v3  ;;  %v1858_v59 = vsel %vm592_vm14, %v5691_v8, %v1845_v0 }
 0x66b   : > { %v5760_v19 = vpop.permute.xlu0 %2166  ;;  %2676 = vmatprep.subr.bf16.mxu0 %v2584_v26  ;;  %v1938_v26 = vsel %vm613_vm13, %v5678_v20, %v1925_v45  ;;  %v1859_v13 = vsel %vm592_vm14, %v1845_v0, %v5696_v31  ;;  %v1856_v0 = vsel %vm592_vm14, %v5565_v40, %v5649_v15  ;;  %v2569_v31 = vpack.c.bf16 %v1857_v38, %v1855_v27  ;;  %v6791_v38 = vld [vmem:[#allocation8_spill] sm:$0xff] }
 0x66c   : > { %2202 = vst.msk [vmem:[#allocation3 + $0x220] sm:$0xff] %vm578_vm4, %v5760_v19  ;;  %v5764_v32 = vpop.permute.xlu1 %2168  ;;  %2677 = vmatpush1.bf16.msra.mxu0 %v2583_v1  ;;  %v2419_v40 = vsel %vm739_vm6, %v5722_v36, %v5708_v23  ;;  %v2416_v57 = vsel %vm739_vm6, %v5573_v60, %v5659_v16 }
 0x66d   : > { %2678 = vmatprep.subr.bf16.mxu0 %v2581_v34  ;;  %v1854_v34 = vsel %vm592_vm14, %v5522_v44, %v5571_v46  ;;  %v2415_v44 = vsel %vm739_vm6, %v5579_v62, %v5539_v56  ;;  %v2414_v56 = vsel %vm739_vm6, %v5537_v55, %v5579_v62 }
 0x66e   : > { %v2568_v28 = vpack.c.bf16 %v1856_v0, %v1854_v34  ;;  %v2610_v16 = vpack.c.bf16 %v2416_v57, %v2414_v56  ;;  %v2532_v0 = vld [vmem:[#allocation3 + $0x2b0] sm:$0xff]  ;;  %v6793_v34 = vld [vmem:[#allocation13_spill] sm:$0xff] }
 0x66f   : > { %v1931_v63 = vpop.permute.xlu0 %1930 }
 0x670   : > { %v1940_v9 = vsel %vm613_vm13, %v1929_v10, %v1931_v63  ;;  %v1941_v1 = vsel %vm613_vm13, %v1931_v63, %v1933_v7  ;;  %v5778_v29 = vpop.permute.xlu1 %2158  ;;  %2679 = vmatpush1.bf16.msra.mxu0 %v2580_v52  ;;  %v1934_v7 = vsel %vm613_vm13, %v5512_v22, %v5563_v24 }
 0x671   : > { %v2578_v49 = vpack.c.bf16 %v1941_v1, %v1939_v43  ;;  %v2577_v58 = vpack.c.bf16 %v1940_v9, %v1938_v26  ;;  %v2574_v35 = vpack.c.bf16 %v1936_v17, %v1934_v7  ;;  %v5854_v43 = vld [vmem:[%s6720_s9 + $0x8] ss:$12 sps:$4 sm:$0xff]   ;;  %v2338_v9 = vsel %vm718_vm8, %v5712_v33, %v5731_v42  ;;  %v2493_v33 = vld [vmem:[#allocation3 + $0x178] sm:$0xff] }
 0x672   : > { %v2339_v1 = vsel %vm718_vm8, %v5731_v42, %v5726_v6  ;;  %v6789_v17 = vld [vmem:[#allocation9_spill] sm:$0xff]  ;;  %v2336_v42 = vsel %vm718_vm8, %v6791_v38, %v5643_v14 }
 0x673   : > { %v5786_v20 = vpop.permute.xlu0 %2230  ;;  %2680 = vmatprep.subr.bf16.mxu0 %v2578_v49 }
 0x674   : > { %v5788_v10 = vpop.permute.xlu1 %2156  ;;  %2681 = vmatpush1.bf16.msra.mxu0 %v2577_v58  ;;  %v6788_v58 = vmov 0  }
 0x675   : > { %2682 = vmatprep.subr.bf16.mxu0 %v2575_v4  ;;  %v6790_v4 = vld [vmem:[#allocation10_spill] sm:$0xff] }
 0x676   : > { %v2335_v7 = vsel %vm718_vm8, %v6790_v4, %v6789_v17 }
 0x677   : > { %v1851_v45 = vpop.permute.xlu0 %1850 }
 0x678   : > { %v1860_v5 = vsel %vm592_vm14, %v5716_v41, %v1851_v45  ;;  %v1861_v30 = vsel %vm592_vm14, %v1851_v45, %v1853_v37  ;;  %v5803_v18 = vpop.permute.xlu1 %2080  ;;  %2683 = vmatpush1.bf16.msra.mxu0 %v2574_v35  ;;  %v2538_v45 = vld [vmem:[#allocation3 + $0x2e0] sm:$0xff] }
 0x679   : > { %2119 = vst.msk [vmem:[#allocation3 + $0x1a8] sm:$0xff] %vm578_vm4, %v5803_v18  ;;  %v2572_v22 = vpack.c.bf16 %v1861_v30, %v1859_v13  ;;  %v2571_v24 = vpack.c.bf16 %v1860_v5, %v1858_v59  ;;  %v2535_v59 = vld [vmem:[#allocation3 + $0x2c8] sm:$0xff]  ;;  %v2490_v30 = vld [vmem:[#allocation3 + $0x160] sm:$0xff] }
 0x67a   : > { %v2585_v27 = vpack.c.bf16 %v2493_v33, %v2490_v30 }
 0x67b   : > { %v2411_v8 = vpop.permute.xlu0 %2410  ;;  %2684 = vmatprep.subr.bf16.mxu0 %v2572_v22  ;;  %v6792_v22 = vld [vmem:[#allocation7_spill] sm:$0xff] }
 0x67c   : > { %v2420_v37 = vsel %vm739_vm6, %v5718_v21, %v2411_v8  ;;  %v2413_v41 = vpop.permute.xlu1 %2412  ;;  %2685 = vmatpush1.bf16.msra.mxu0 %v2571_v24  ;;  %v2418_v21 = vsel %vm739_vm6, %v5703_v61, %v5722_v36  ;;  %v2611_v36 = vpack.c.bf16 %v2417_v54, %v2415_v44  ;;  %v1783_v61 = vld [vmem:[#allocation2 + $0x8] sm:$0xff]  ;;  %v2334_v24 = vsel %vm718_vm8, %v6792_v22, %v6790_v4  ;;  %v6794_v54 = vld [vmem:[#allocation14_spill] sm:$0xff]  ;;  %v6797_v44 = vld [vmem:[#allocation19_spill] sm:$0xff] }
 0x67d   : > { %v2421_v15 = vsel %vm739_vm6, %v2411_v8, %v2413_v41  ;;  %2445 = vst.msk [vmem:[#allocation3 + $0x358] sm:$0xff] %vm578_vm4, %v2413_v41  ;;  %2686 = vmatprep.subr.bf16.mxu0 %v2569_v31  ;;  %v2613_v23 = vpack.c.bf16 %v2420_v37, %v2418_v21  ;;  %v2563_v60 = vpack.c.bf16 %v5427_v47, %v1783_v61  ;;  %v2487_v37 = vld [vmem:[#allocation3 + $0x148] sm:$0xff]  ;;  %v6796_v21 = vld [vmem:[#allocation16_spill] sm:$0xff]  ;;  %v2484_v61 = vld [vmem:[#allocation3 + $0x130] sm:$0xff] }
 0x67e   : > { %v2614_v52 = vpack.c.bf16 %v2421_v15, %v2419_v40  ;;  %v2337_v47 = vsel %vm718_vm8, %v5643_v14, %v5633_v12  ;;  %v5890_v14 = vld [vmem:[%s6720_s9 + $0x20] ss:$12 sps:$4 sm:$0xff]   ;;  %v2606_v31 = vpack.c.bf16 %v2535_v59, %v2532_v0  ;;  %v2604_v41 = vpack.c.bf16 %v2336_v42, %v2334_v24  ;;  %v2520_v42 = vld [vmem:[#allocation3 + $0x250] sm:$0xff] }
 0x67f   : > { %v5832_v46 = vpop.permute.xlu0 %2164  ;;  %v2605_v13 = vpack.c.bf16 %v2337_v47, %v2335_v7  ;;  %v2257_v40 = vsel %vm697_vm9, %v6794_v54, %v6793_v34  ;;  %v6795_v15 = vld [vmem:[#allocation20_spill] sm:$0xff]  ;;  %v2582_v56 = vpack.c.bf16 %v2487_v37, %v2484_v61  ;;  %v2481_v47 = vld [vmem:[#allocation3 + $0x118] sm:$0xff]  ;;  %v6802_v7 = vld [vmem:[#allocation18_spill] sm:$0xff] }
 0x680   : > { %v5839_v63 = vpop.permute.xlu1 %2088  ;;  %2687 = vmatpush1.bf16.msra.mxu0 %v2568_v28  ;;  %2741 = vmatprep.subr.bf16.mxu1 %v2614_v52  ;;  %v2258_v28 = vsel %vm697_vm9, %v6796_v21, %v6795_v15  ;;  %v2478_v4 = vld [vmem:[#allocation3 + $0x100] sm:$0xff]  ;;  %v2256_v33 = vsel %vm697_vm9, %v6802_v7, %v6794_v54  ;;  %v2179_v59 = vsel %vm676_vm10, %v5832_v46, %v5760_v19  ;;  %v2469_v37 = vld [vmem:[#allocation3 + $0xb8] sm:$0xff]  ;;  %v2451_v7 = vld [vmem:[#allocation3 + $0x28] sm:$0xff] }
 0x681   : > { %2688 = vmatprep.subr.bf16.mxu0 %v2566_v48  ;;  %2742 = vmatpush1.bf16.msra.mxu1 %v2613_v23  ;;  %v2259_v48 = vsel %vm697_vm9, %v6795_v15, %v6797_v44  ;;  %v6798_v23 = vld [vmem:[#allocation17_spill] sm:$0xff]  ;;  %v2579_v38 = vpack.c.bf16 %v2481_v47, %v2478_v4  ;;  %v2466_v21 = vld [vmem:[#allocation3 + $0xa0] sm:$0xff] }
 0x682   : > { %2743 = vmatprep.subr.bf16.mxu1 %v2611_v36 }
 0x683   : > { %v5846_v53 = vpop.permute.xlu0 %2154 }
 0x684   : > { %2196 = vst.msk [vmem:[#allocation3 + $0x1f0] sm:$0xff] %vm578_vm4, %v5846_v53  ;;  %v2333_v26 = vpop.permute.xlu1 %2332  ;;  %2689 = vmatpush1.bf16.msra.mxu0 %v2565_v51 }
 0x685   : > { %2365 = vst.msk [vmem:[#allocation3 + $0x2f8] sm:$0xff] %vm578_vm4, %v2333_v26  ;;  %2690 = vmatprep.subr.bf16.mxu0 %v2563_v60  ;;  %2744 = vmatpush1.bf16.msra.mxu1 %v2610_v16  ;;  %v6799_v16 = vld [vmem:[#allocation11_spill] sm:$0xff] }
 0x687   : > { %v5858_v55 = vpop.permute.xlu0 %2162 }
 0x688   : > { %v2331_v62 = vpop.permute.xlu1 %2330  ;;  %2691 = vmatpush1.bf16.msra.mxu0 %v2562_v25  ;;  %4558 = vmatmul.mubr.msk.bf16.vlgmr.msra.gmra.mxu1 %vm1593_vm7, %v5854_v43 }
 0x689   : > { %v2340_v39 = vsel %vm718_vm8, %v5720_v11, %v2331_v62  ;;  %v2341_v49 = vsel %vm718_vm8, %v2331_v62, %v2333_v26  ;;  %2771 = vmatprep.mubr.bf16.mxu1 %v6788_v58  ;;  %v6800_v26 = vld [vmem:[#allocation12_spill] sm:$0xff]  ;;  %v6801_v62 = vld [vmem:[#allocation15_spill] sm:$0xff] }
 0x68a   : > { %v2608_v12 = vpack.c.bf16 %v2341_v49, %v2339_v1  ;;  %v2607_v3 = vpack.c.bf16 %v2340_v39, %v2338_v9  ;;  %v2255_v50 = vsel %vm697_vm9, %v6800_v26, %v6799_v16  ;;  %v2254_v9 = vsel %vm697_vm9, %v5786_v20, %v6800_v26  ;;  %v2526_v39 = vld [vmem:[#allocation3 + $0x280] sm:$0xff] }
 0x68b   : > { %v5878_v35 = vpop.permute.xlu0 %2152  ;;  %v2508_v54 = vld [vmem:[#allocation3 + $0x1f0] sm:$0xff] }
 0x68c   : > { %v2253_v6 = vpop.permute.xlu1 %2252  ;;  %v2541_v11 = vld [vmem:[#allocation3 + $0x2f8] sm:$0xff]  ;;  %2692 = vmatprep.subr.bf16.mxu0 %v2608_v12  ;;  %v2523_v12 = vld [vmem:[#allocation3 + $0x268] sm:$0xff]  ;;  %v2175_v30 = vsel %vm676_vm10, %v5878_v35, %v5846_v53 }
 0x68d   : > { %2285 = vst.msk [vmem:[#allocation3 + $0x298] sm:$0xff] %vm578_vm4, %v2253_v6  ;;  %v2609_v5 = vpack.c.bf16 %v2541_v11, %v2538_v45  ;;  %2693 = vmatpush2.bf16.msra.mxu0 %v2607_v3  ;;  %v2599_v3 = vpack.c.bf16 %v2257_v40, %v2255_v50  ;;  %v2475_v45 = vld [vmem:[#allocation3 + $0xe8] sm:$0xff]  ;;  %v2598_v11 = vpack.c.bf16 %v2256_v33, %v2254_v9  ;;  %v2454_v50 = vld [vmem:[#allocation3 + $0x40] sm:$0xff] }
 0x68e   : > { %2694 = vmatprep.subr.bf16.mxu0 %v2605_v13  ;;  %v2178_v13 = vsel %vm676_vm10, %v5858_v55, %v5832_v46  ;;  %v2177_v46 = vsel %vm676_vm10, %v5778_v29, %v5750_v2  ;;  %v2176_v2 = vsel %vm676_vm10, %v5788_v10, %v5778_v29  ;;  %v2460_v10 = vld [vmem:[#allocation3 + $0x70] sm:$0xff] }
 0x68f   : > { %v5892_v8 = vpop.permute.xlu0 %2086  ;;  %4610 = vmatprep.subr.bf16.mxu1 %v2609_v5  ;;  %v2593_v40 = vpack.c.bf16 %v2177_v46, %v2175_v30  ;;  %v4762_v30 = vld [vmem:[%s6720_s9 + $0x1c] ss:$12 sps:$4 sm:$0xff]  }
 0x690   : > { %2122 = vst.msk [vmem:[#allocation3 + $0x1c0] sm:$0xff] %vm578_vm4, %v5892_v8  ;;  %v2251_v52 = vpop.permute.xlu1 %2250  ;;  %4611 = vmatpush3.bf16.msra.mxu1 %v2585_v27  ;;  %v2472_v27 = vld [vmem:[#allocation3 + $0xd0] sm:$0xff] }
 0x691   : > { %v2260_v57 = vsel %vm697_vm9, %v6798_v23, %v2251_v52  ;;  %v2261_v36 = vsel %vm697_vm9, %v2251_v52, %v2253_v6  ;;  %4612 = vmatprep.subr.bf16.mxu1 %v2606_v31  ;;  %2695 = vmatpush2.bf16.msra.mxu0 %v2604_v41  ;;  %v2600_v6 = vpack.c.bf16 %v2523_v12, %v2520_v42  ;;  %v2514_v41 = vld [vmem:[#allocation3 + $0x220] sm:$0xff]  ;;  %v2499_v12 = vld [vmem:[#allocation3 + $0x1a8] sm:$0xff]  ;;  %v2553_v42 = vld [vmem:[#allocation3 + $0x358] sm:$0xff] }
 0x692   : > { %v2602_v51 = vpack.c.bf16 %v2261_v36, %v2259_v48  ;;  %v2601_v60 = vpack.c.bf16 %v2260_v57, %v2258_v28  ;;  %4559 = vmatmul.mubr.msk.bf16.gmra.mxu1 %vm1593_vm7, %v5890_v14  ;;  %v2576_v0 = vpack.c.bf16 %v2475_v45, %v2472_v27  ;;  %v2573_v28 = vpack.c.bf16 %v2469_v37, %v2466_v21  ;;  %v2463_v48 = vld [vmem:[#allocation3 + $0x88] sm:$0xff]  ;;  %v2550_v45 = vld [vmem:[#allocation3 + $0x340] sm:$0xff] }
 0x693   : > { %v2151_v25 = vpop.permute.xlu0 %2150  ;;  %2814 = vmatprep.mubr.bf16.mxu1 %v6801_v62  ;;  %v4764_v27 = vld [vmem:[%s6720_s9 + $0x18] ss:$12 sps:$4 sm:$0xff]  }
 0x694   : > { %v2173_v1 = vpop.permute.xlu1 %2172  ;;  %4613 = vmatpush3.bf16.msra.mxu1 %v2582_v56  ;;  %v2529_v49 = vld [vmem:[#allocation3 + $0x298] sm:$0xff]  ;;  %2696 = vmatprep.subr.bf16.mxu0 %v2602_v51  ;;  %v2174_v53 = vsel %vm676_vm10, %v2151_v25, %v5878_v35  ;;  %v2511_v35 = vld [vmem:[#allocation3 + $0x208] sm:$0xff]  ;;  %v2570_v51 = vpack.c.bf16 %v2463_v48, %v2460_v10 }
 0x695   : > { %2205 = vst.msk [vmem:[#allocation3 + $0x238] sm:$0xff] %vm578_vm4, %v2173_v1  ;;  %v2603_v17 = vpack.c.bf16 %v2529_v49, %v2526_v39  ;;  %2697 = vmatpush2.bf16.msra.mxu0 %v2601_v60  ;;  %v2594_v44 = vpack.c.bf16 %v2511_v35, %v2508_v54  ;;  %v2592_v23 = vpack.c.bf16 %v2176_v2, %v2174_v53  ;;  %v2457_v25 = vld [vmem:[#allocation3 + $0x58] sm:$0xff] }
 0x696   : > { %2698 = vmatprep.subr.bf16.mxu0 %v2599_v3  ;;  %v2567_v49 = vpack.c.bf16 %v2457_v25, %v2454_v50 }
 0x697   : > { %v2085_v20 = vpop.permute.xlu0 %2084  ;;  %4614 = vmatprep.subr.bf16.mxu1 %v2603_v17  ;;  %v2502_v9 = vld [vmem:[#allocation3 + $0x1c0] sm:$0xff] }
 0x698   : > { %v2171_v5 = vpop.permute.xlu1 %2170  ;;  %4615 = vmatpush3.bf16.msra.mxu1 %v2579_v38  ;;  %v2099_v61 = vsel %vm655_vm11, %v2085_v20, %v5892_v8 }
 0x699   : > { %v2180_v22 = vsel %vm676_vm10, %v5764_v32, %v2171_v5  ;;  %v2181_v24 = vsel %vm676_vm10, %v2171_v5, %v2173_v1  ;;  %4616 = vmatprep.subr.bf16.mxu1 %v2600_v6  ;;  %2699 = vmatpush2.bf16.msra.mxu0 %v2598_v11  ;;  %v2448_v6 = vld [vmem:[#allocation3 + $0x10] sm:$0xff]  ;;  %v2547_v5 = vld [vmem:[#allocation3 + $0x328] sm:$0xff] }
 0x69a   : > { %v2596_v19 = vpack.c.bf16 %v2181_v24, %v2179_v59  ;;  %v2595_v31 = vpack.c.bf16 %v2180_v22, %v2178_v13  ;;  %v2615_v59 = vpack.c.bf16 %v2553_v42, %v2550_v45  ;;  %v4759_v13 = vld [vmem:[%s6720_s9] ss:$12 sps:$4 sm:$0xff]   ;;  %v2544_v22 = vld [vmem:[#allocation3 + $0x310] sm:$0xff] }
 0x69b   : > { %v2075_v55 = vpop.permute.xlu0 %2074  ;;  %v2612_v24 = vpack.c.bf16 %v2547_v5, %v2544_v22 }
 0x69c   : > { %2116 = vst.msk [vmem:[#allocation3 + $0x190] sm:$0xff] %vm578_vm4, %v2075_v55  ;;  %v2093_v32 = vpop.permute.xlu1 %2092  ;;  %4617 = vmatpush3.bf16.msra.mxu1 %v2576_v0  ;;  %v2517_v34 = vld [vmem:[#allocation3 + $0x238] sm:$0xff]  ;;  %2700 = vmatprep.subr.bf16.mxu0 %v2596_v19 }
 0x69d   : > { %2125 = vst.msk [vmem:[#allocation3 + $0x1d8] sm:$0xff] %vm578_vm4, %v2093_v32  ;;  %v2597_v15 = vpack.c.bf16 %v2517_v34, %v2514_v41  ;;  %2701 = vmatpush2.bf16.msra.mxu0 %v2595_v31 }
 0x69e   : > { %2702 = vmatprep.subr.bf16.mxu0 %v2593_v40 }
 0x69f   : > { %v2083_v52 = vpop.permute.xlu0 %2082  ;;  %4618 = vmatprep.subr.bf16.mxu1 %v2597_v15 }
 0x6a0   : > { %v2098_v57 = vsel %vm655_vm11, %v2083_v52, %v2085_v20  ;;  %v2091_v36 = vpop.permute.xlu1 %2090  ;;  %4619 = vmatpush3.bf16.msra.mxu1 %v2573_v28 }
 0x6a1   : > { %v2100_v56 = vsel %vm655_vm11, %v5839_v63, %v2091_v36  ;;  %v2101_v29 = vsel %vm655_vm11, %v2091_v36, %v2093_v32  ;;  %4620 = vmatprep.subr.bf16.mxu1 %v2594_v44  ;;  %2703 = vmatpush2.bf16.msra.mxu0 %v2592_v23 }
 0x6a2   : > { %v2590_v60 = vpack.c.bf16 %v2101_v29, %v2099_v61  ;;  %v2589_v16 = vpack.c.bf16 %v2100_v56, %v2098_v57 }
 0x6a3   : > { %v2073_v26 = vpop.permute.xlu0 %2072  ;;  %v2496_v1 = vld [vmem:[#allocation3 + $0x190] sm:$0xff] }
 0x6a4   : > { %v2095_v47 = vsel %vm655_vm11, %v2073_v26, %v2075_v55  ;;  %v2079_v62 = vpop.permute.xlu1 %2078  ;;  %4621 = vmatpush3.bf16.msra.mxu1 %v2570_v51  ;;  %v2505_v8 = vld [vmem:[#allocation3 + $0x1d8] sm:$0xff]  ;;  %2704 = vmatprep.subr.bf16.mxu0 %v2590_v60  ;;  %v2588_v4 = vpack.c.bf16 %v2499_v12, %v2496_v1 }
 0x6a5   : > { %v2097_v63 = vsel %vm655_vm11, %v2079_v62, %v5803_v18  ;;  %v2591_v39 = vpack.c.bf16 %v2505_v8, %v2502_v9  ;;  %2705 = vmatpush2.bf16.msra.mxu0 %v2589_v16  ;;  %v2564_v18 = vpack.c.bf16 %v2451_v7, %v2448_v6 }
 0x6a6   : > { %v2587_v3 = vpack.c.bf16 %v2097_v63, %v2095_v47  ;;  %v6803_v47 = vld [vmem:[#allocation6_spill] sm:$0xff] }
 0x6a7   : > { %v2071_v17 = vpop.permute.xlu0 %2070  ;;  %4622 = vmatprep.subr.bf16.mxu1 %v2591_v39 }
 0x6a8   : > { %v2094_v33 = vsel %vm655_vm11, %v2071_v17, %v2073_v26  ;;  %v2077_v38 = vpop.permute.xlu1 %2076  ;;  %4623 = vmatpush3.bf16.msra.mxu1 %v2567_v49  ;;  %2706 = vmatprep.subr.bf16.mxu0 %v2587_v3 }
 0x6a9   : > { %v2096_v20 = vsel %vm655_vm11, %v2077_v38, %v2079_v62  ;;  %4624 = vmatprep.subr.bf16.mxu1 %v2588_v4 }
 0x6aa   : > { %v2586_v11 = vpack.c.bf16 %v2096_v20, %v2094_v33 }
 0x6ac   : > { %4625 = vmatpush3.bf16.msra.mxu1 %v2564_v18  ;;  %2707 = vmatpush2.bf16.msra.mxu0 %v2586_v11  ;;  %v6804_v18 = vld [vmem:[#allocation4_spill] sm:$0xff] }
 0x6ad   : > { %4699 = vmatprep.subr.bf16.mxu1 %v2615_v59 }
 0x6af   : > { %2815 = vmatmul.mubr.bf16.vlgmr.msra.gmra.mxu1 %v4759_v13  ;;  %2709 = vmatmul.mubr.bf16.vlgmr.msra.gmra.mxu0 %v4759_v13 }
 0x6b0   : > { %4700 = vmatpush3.bf16.msra.mxu1 %v2615_v59  ;;  %2822 = vmatprep.mubr.bf16.mxu1 %v4762_v30 }
 0x6b1   : > { %4701 = vmatprep.subr.bf16.mxu1 %v2612_v24  ;;  %2718 = vmatprep.mubr.bf16.mxu0 %v4762_v30  ;;  %v6805_v30 = vld [vmem:[#allocation5_spill] sm:$0xff] }
 0x6b4   : > { %4702 = vmatpush3.bf16.msra.mxu1 %v2612_v24 }
 0x6b5   : > { %v2638_v48 = vpop.permute.xlu1 %2637 }
 0x6b7   : > { %2823 = vmatmul.mubr.bf16.gmra.mxu1 %v4764_v27  ;;  %2719 = vmatmul.mubr.bf16.gmra.mxu0 %v4764_v27 }
 0x6b8   : > { %4703 = vmatprep.mubr.msk.bf16.mxu1 %vm1593_vm7, %v5854_v43  ;;  %3939 = vmatprep.mubr.bf16.mxu0 %v6788_v58 }
 0x6b9   : > { %v2628_v25 = vpop.permute.xlu1 %2627 }
 0x6bf   : > { %4704 = vmatmul.mubr.msk.bf16.vlgmr.msra.gmra.mxu1 %vm1593_vm7, %v5890_v14  ;;  %v2633_v14 = vpop.permute.xlu0 %2632 }
 0x6c3   : > { %v2623_v36 = vpop.permute.xlu0 %2622 }
 0x748   : > { %v2763_v0 = vpop.f32.mrf.mxu1 }
 0x74a   : > { %v2765_v19 = vpop.f32.mrf.mxu1 }
 0x74c   : > { %v2767_v31 = vpop.f32.mrf.mxu1 }
 0x74e   : > { %v2769_v46 = vpop.f32.mrf.mxu1 }
 0x752   : > { %v2773_v55 = vpop.f32.mrf.mxu1 }
 0x754   : > { %v5968_v37 = vpop.f32.mrf.mxu1 }
 0x756   : > { %v5970_v53 = vpop.f32.mrf.mxu1 }
 0x758   : > { %v5972_v32 = vpop.f32.mrf.mxu1 }
 0x76f   : > { %v4626_v41 = vpop.f32.mrf.mxu1  ;;  %v2710_v34 = vpop.f32.mrf.mxu0 }
 0x770   : > { %v2711_v26 = vadd.f32 %v2710_v34, %v2623_v36 }
 0x771   : > { %v4627_v54 = vpop.f32.mrf.mxu1  ;;  %v2712_v40 = vpop.f32.mrf.mxu0 }
 0x772   : > { %v4628_v23 = vadd.f32 %v4627_v54, %v4626_v41  ;;  %v2764_v12 = vadd.f32 %v2763_v0, %v2711_v26  ;;  %v2713_v3 = vadd.f32 %v2712_v40, %v2623_v36 }
 0x773   : > { %v4629_v43 = vpop.f32.mrf.mxu1  ;;  %v2714_v2 = vpop.f32.mrf.mxu0 }
 0x774   : > { %v2817_v16 = vadd.f32 %v4628_v23, %v2623_v36  ;;  %v2766_v20 = vadd.f32 %v2765_v19, %v2713_v3  ;;  %v2715_v6 = vadd.f32 %v2714_v2, %v2628_v25  ;;  %v2880_v45 = vmul.f32 %v2764_v12, %v6804_v18 }
 0x775   : > { %v4630_v15 = vpop.f32.mrf.mxu1  ;;  %v2716_v44 = vpop.f32.mrf.mxu0 }
 0x776   : > { %v4631_v51 = vadd.f32 %v4630_v15, %v4629_v43  ;;  %v2717_v4 = vadd.f32 %v2716_v44, %v2628_v25  ;;  %v2881_v22 = vmul.f32 %v2766_v20, %v6805_v30  ;;  %v2768_v24 = vadd.f32 %v2767_v31, %v2715_v6 }
 0x777   : > { %v4632_v21 = vpop.f32.mrf.mxu1  ;;  %v2720_v29 = vpop.f32.mrf.mxu0 }
 0x778   : > { %v2820_v49 = vadd.f32 %v4631_v51, %v2628_v25  ;;  %v2770_v11 = vadd.f32 %v2769_v46, %v2717_v4  ;;  %v2721_v59 = vadd.f32 %v2720_v29, %v2633_v14  ;;  %v2883_v46 = vmul.f32 %v2768_v24, %v6804_v18 }
 0x779   : > { %v4633_v28 = vpop.f32.mrf.mxu1  ;;  %v2722_v1 = vpop.f32.mrf.mxu0 }
 0x77a   : > { %v4634_v35 = vadd.f32 %v4633_v28, %v4632_v21  ;;  %v2884_v27 = vmul.f32 %v2770_v11, %v6805_v30  ;;  %v2774_v0 = vadd.f32 %v2773_v55, %v2721_v59  ;;  %v2723_v41 = vadd.f32 %v2722_v1, %v2633_v14 }
 0x77b   : > { %v4635_v52 = vpop.f32.mrf.mxu1  ;;  %v2724_v42 = vpop.f32.mrf.mxu0 }
 0x77c   : > { %v2825_v56 = vadd.f32 %v4634_v35, %v2633_v14  ;;  %v2886_v34 = vmul.f32 %v2774_v0, %v6804_v18  ;;  %v2776_v54 = vadd.f32 %v5968_v37, %v2723_v41  ;;  %v2725_v43 = vadd.f32 %v2724_v42, %v2638_v48 }
 0x77d   : > { %v4636_v57 = vpop.f32.mrf.mxu1  ;;  %v2726_v5 = vpop.f32.mrf.mxu0 }
 0x77e   : > { %v4637_v61 = vadd.f32 %v4636_v57, %v4635_v52  ;;  %v2727_v19 = vadd.f32 %v2726_v5, %v2638_v48  ;;  %v2887_v31 = vmul.f32 %v2776_v54, %v6805_v30  ;;  %v2778_v55 = vadd.f32 %v5970_v53, %v2725_v43 }
 0x77f   : > { %v4705_v10 = vpop.f32.mrf.mxu1 }
 0x780   : > { %v2874_v60 = vadd.f32 %v4705_v10, %v2825_v56  ;;  %v2828_v8 = vadd.f32 %v4637_v61, %v2638_v48  ;;  %v2780_v40 = vadd.f32 %v5972_v32, %v2727_v19  ;;  %v2889_v21 = vmul.f32 %v2778_v55, %v6804_v18 }
 0x781   : > { %v2865_v50 = vpop.f32.mrf.mxu1 }
 0x782   : > { %v2888_v62 = vmul.f32 %v2874_v60, %v6803_v47  ;;  %v2866_v9 = vadd.f32 %v2865_v50, %v2817_v16  ;;  %v2890_v15 = vmul.f32 %v2780_v40, %v6805_v30 }
 0x783   : > { %v4706_v63 = vpop.f32.mrf.mxu1 }
 0x784   : > { %v2877_v39 = vadd.f32 %v4706_v63, %v2828_v8  ;;  %2920 = vrot.lane.b32.xlu0 %v2888_v62, %s4801_s28  ;;  %v2882_v7 = vmul.f32 %v2866_v9, %v6803_v47 }
 0x785   : > { %v2868_v17 = vpop.f32.mrf.mxu1 }
 0x786   : > { %v2891_v33 = vmul.f32 %v2877_v39, %v6803_v47  ;;  %v2869_v38 = vadd.f32 %v2868_v17, %v2820_v49 }
 0x788   : > { %2926 = vrot.lane.b32.xlu1 %v2891_v33, %s4801_s28  ;;  %2908 = vrot.lane.b32.xlu0 %v2882_v7, %s4801_s28  ;;  %v2885_v13 = vmul.f32 %v2869_v38, %v6803_v47 }
 0x78c   : > { %2914 = vrot.lane.b32.xlu1 %v2885_v13, %s4801_s28  ;;  %2904 = vrot.lane.b32.xlu0 %v2880_v45, %s4801_s28 }
 0x790   : > { %2906 = vrot.lane.b32.xlu1 %v2881_v22, %s4801_s28  ;;  %2912 = vrot.lane.b32.xlu0 %v2884_v27, %s4801_s28 }
 0x794   : > { %2910 = vrot.lane.b32.xlu1 %v2883_v46, %s4801_s28  ;;  %2916 = vrot.lane.b32.xlu0 %v2886_v34, %s4801_s28 }
 0x798   : > { %2918 = vrot.lane.b32.xlu1 %v2887_v31, %s4801_s28  ;;  %2924 = vrot.lane.b32.xlu0 %v2890_v15, %s4801_s28 }
 0x79c   : > { %2922 = vrot.lane.b32.xlu1 %v2889_v21, %s4801_s28  ;;  %s6806_s28 = smov 110  }
 0x7f6   : > { %v2921_v37 = vpop.permute.xlu0 %2920 }
 0x7fa   : > { %v2927_v32 = vpop.permute.xlu1 %2926  ;;  %v2909_v2 = vpop.permute.xlu0 %2908 }
 0x7fe   : > { %v2915_v14 = vpop.permute.xlu1 %2914  ;;  %v2905_v28 = vpop.permute.xlu0 %2904 }
 0x7ff   : > { %2948 = vst.msk [vmem:[#allocation2] sm:$0xff] %vm568_vm1, %v2905_v28 }
 0x802   : > { %v2907_v35 = vpop.permute.xlu1 %2906  ;;  %v2913_v52 = vpop.permute.xlu0 %2912 }
 0x803   : > { %v6003_v53 = vsel %vm562_vm3, %v2905_v28, %v2907_v35  ;;  %v2929_v44 = vsel %vm562_vm3, %v2907_v35, %v2909_v2  ;;  %v2931_v48 = vsel %vm562_vm3, %v2913_v52, %v2915_v14 }
 0x804   : > { %2949 = vst [vmem:[#allocation2 + $0x8] sm:$0xff] %v6003_v53  ;;  %2950 = vst.msk [vmem:[#allocation2 + $0x10] sm:$0xff] %vm571_vm2, %v2929_v44 }
 0x805   : > { %2953 = vst.msk [vmem:[#allocation2 + $0x28] sm:$0xff] %vm571_vm2, %v2931_v48 }
 0x806   : > { %v2911_v23 = vpop.permute.xlu1 %2910  ;;  %v2917_v57 = vpop.permute.xlu0 %2916  ;;  %v6010_v36 = vld [vmem:[#allocation2] sm:$0xff] }
 0x807   : > { %v6012_v61 = vld [vmem:[#allocation2] sm:$0xff]  ;;  %v6015_v56 = vsel %vm562_vm3, %v2911_v23, %v2913_v52  ;;  %2951 = vst.msk [vmem:[#allocation2 + $0x18] sm:$0xff] %vm568_vm1, %v2911_v23  ;;  %2954 = vst.msk [vmem:[#allocation2 + $0x30] sm:$0xff] %vm568_vm1, %v2917_v57  ;;  %3168 = vrot.lane.b32.xlu0 %v6010_v36, %s6806_s28 }
 0x80a   : > { %v2919_v29 = vpop.permute.xlu1 %2918  ;;  %v2925_v10 = vpop.permute.xlu0 %2924 }
 0x80b   : > { %v6022_v51 = vsel %vm562_vm3, %v2917_v57, %v2919_v29  ;;  %v2933_v60 = vsel %vm562_vm3, %v2919_v29, %v2921_v37  ;;  %v2935_v16 = vsel %vm562_vm3, %v2925_v10, %v2927_v32  ;;  %3088 = vrot.lane.b32.xlu0 %v6010_v36, %s6807_s18  ;;  %v6028_v26 = vld [vmem:[#allocation2 + $0x10] sm:$0xff]  ;;  %v6030_v50 = vld [vmem:[#allocation2 + $0x8] sm:$0xff] }
 0x80c   : > { %2956 = vst.msk [vmem:[#allocation2 + $0x40] sm:$0xff] %vm571_vm2, %v2933_v60  ;;  %2959 = vst.msk [vmem:[#allocation2 + $0x58] sm:$0xff] %vm571_vm2, %v2935_v16  ;;  %3172 = vrot.lane.b32.xlu1 %v6028_v26, %s6806_s28  ;;  %v2962_v25 = vld [vmem:[#allocation2 + $0x10] sm:$0xff]  ;;  %v2965_v47 = vld [vmem:[#allocation2 + $0x28] sm:$0xff]  ;;  %vm4331_vm2 = vcmask 1044484  }
 0x80d   : > { %2974 = vst.msk [vmem:[#allocation3 + $0x10] sm:$0xff] %vm578_vm4, %v2962_v25  ;;  %2977 = vst.msk [vmem:[#allocation3 + $0x28] sm:$0xff] %vm578_vm4, %v2965_v47  ;;  %v6096_v12 = vld [vmem:[#allocation2 + $0x28] sm:$0xff] }
 0x80e   : > { %v2923_v62 = vpop.permute.xlu1 %2922  ;;  %v6038_v9 = vld [vmem:[#allocation2 + $0x18] sm:$0xff]  ;;  %v6040_v8 = vld [vmem:[#allocation2 + $0x30] sm:$0xff] }
 0x80f   : > { %v6043_v1 = vsel %vm562_vm3, %v2923_v62, %v2925_v10  ;;  %2957 = vst.msk [vmem:[#allocation2 + $0x48] sm:$0xff] %vm568_vm1, %v2923_v62  ;;  %3008 = vrot.lane.b32.xlu0 %v6010_v36, %s6768_s29  ;;  %vm4330_vm1 = vcmask 1040384   ;;  %vm4205_vm3 = vcmask 550912  }
 0x810   : > { %3092 = vrot.lane.b32.xlu1 %v6028_v26, %s6807_s18 }
 0x813   : > { %3568 = vrot.lane.b32.xlu0 %v6010_v36, %s6769_s0  ;;  %v2968_v63 = vld [vmem:[#allocation2 + $0x40] sm:$0xff]  ;;  %v2971_v39 = vld [vmem:[#allocation2 + $0x58] sm:$0xff] }
 0x814   : > { %3012 = vrot.lane.b32.xlu1 %v6028_v26, %s6768_s29  ;;  %2980 = vst.msk [vmem:[#allocation3 + $0x40] sm:$0xff] %vm578_vm4, %v2968_v63  ;;  %2983 = vst.msk [vmem:[#allocation3 + $0x58] sm:$0xff] %vm578_vm4, %v2971_v39  ;;  %v6122_v3 = vld [vmem:[#allocation2 + $0x40] sm:$0xff]  ;;  %v6179_v6 = vld [vmem:[#allocation2 + $0x58] sm:$0xff] }
 0x816   : > { %v6056_v49 = vld [vmem:[#allocation2 + $0x48] sm:$0xff] }
 0x817   : > { %3488 = vrot.lane.b32.xlu0 %v6010_v36, %s6770_s23 }
 0x818   : > { %3572 = vrot.lane.b32.xlu1 %v6028_v26, %s6769_s0 }
 0x81b   : > { %3408 = vrot.lane.b32.xlu0 %v6010_v36, %s6771_s25 }
 0x81c   : > { %3492 = vrot.lane.b32.xlu1 %v6028_v26, %s6770_s23 }
 0x81f   : > { %3170 = vrot.lane.b32.xlu0 %v6003_v53, %s6806_s28 }
 0x820   : > { %3412 = vrot.lane.b32.xlu1 %v6028_v26, %s6771_s25 }
 0x823   : > { %3090 = vrot.lane.b32.xlu0 %v6003_v53, %s6807_s18 }
 0x824   : > { %3174 = vrot.lane.b32.xlu1 %v6038_v9, %s6806_s28 }
 0x827   : > { %3010 = vrot.lane.b32.xlu0 %v6003_v53, %s6768_s29 }
 0x828   : > { %3094 = vrot.lane.b32.xlu1 %v6038_v9, %s6807_s18 }
 0x82b   : > { %3570 = vrot.lane.b32.xlu0 %v6003_v53, %s6769_s0 }
 0x82c   : > { %3014 = vrot.lane.b32.xlu1 %v6038_v9, %s6768_s29 }
 0x82f   : > { %3490 = vrot.lane.b32.xlu0 %v6003_v53, %s6770_s23 }
 0x830   : > { %3574 = vrot.lane.b32.xlu1 %v6038_v9, %s6769_s0 }
 0x833   : > { %3410 = vrot.lane.b32.xlu0 %v6003_v53, %s6771_s25 }
 0x834   : > { %3494 = vrot.lane.b32.xlu1 %v6038_v9, %s6770_s23 }
 0x837   : > { %3176 = vrot.lane.b32.xlu0 %v6015_v56, %s6806_s28 }
 0x838   : > { %3414 = vrot.lane.b32.xlu1 %v6038_v9, %s6771_s25 }
 0x83b   : > { %3096 = vrot.lane.b32.xlu0 %v6015_v56, %s6807_s18 }
 0x83c   : > { %3178 = vrot.lane.b32.xlu1 %v6096_v12, %s6806_s28 }
 0x83f   : > { %3016 = vrot.lane.b32.xlu0 %v6015_v56, %s6768_s29 }
 0x840   : > { %3098 = vrot.lane.b32.xlu1 %v6096_v12, %s6807_s18 }
 0x843   : > { %3576 = vrot.lane.b32.xlu0 %v6015_v56, %s6769_s0 }
 0x844   : > { %3018 = vrot.lane.b32.xlu1 %v6096_v12, %s6768_s29 }
 0x847   : > { %3496 = vrot.lane.b32.xlu0 %v6015_v56, %s6770_s23 }
 0x848   : > { %3578 = vrot.lane.b32.xlu1 %v6096_v12, %s6769_s0 }
 0x84b   : > { %3416 = vrot.lane.b32.xlu0 %v6015_v56, %s6771_s25 }
 0x84c   : > { %3498 = vrot.lane.b32.xlu1 %v6096_v12, %s6770_s23 }
 0x84f   : > { %3180 = vrot.lane.b32.xlu0 %v6040_v8, %s6806_s28 }
 0x850   : > { %3418 = vrot.lane.b32.xlu1 %v6096_v12, %s6771_s25 }
 0x853   : > { %3100 = vrot.lane.b32.xlu0 %v6040_v8, %s6807_s18 }
 0x854   : > { %3184 = vrot.lane.b32.xlu1 %v6122_v3, %s6806_s28 }
 0x857   : > { %3020 = vrot.lane.b32.xlu0 %v6040_v8, %s6768_s29 }
 0x858   : > { %3104 = vrot.lane.b32.xlu1 %v6122_v3, %s6807_s18 }
 0x85b   : > { %3580 = vrot.lane.b32.xlu0 %v6040_v8, %s6769_s0 }
 0x85c   : > { %3024 = vrot.lane.b32.xlu1 %v6122_v3, %s6768_s29 }
 0x85f   : > { %3500 = vrot.lane.b32.xlu0 %v6040_v8, %s6770_s23 }
 0x860   : > { %3584 = vrot.lane.b32.xlu1 %v6122_v3, %s6769_s0 }
 0x863   : > { %3420 = vrot.lane.b32.xlu0 %v6040_v8, %s6771_s25 }
 0x864   : > { %3504 = vrot.lane.b32.xlu1 %v6122_v3, %s6770_s23 }
 0x867   : > { %3182 = vrot.lane.b32.xlu0 %v6022_v51, %s6806_s28 }
 0x868   : > { %3424 = vrot.lane.b32.xlu1 %v6122_v3, %s6771_s25 }
 0x86b   : > { %3102 = vrot.lane.b32.xlu0 %v6022_v51, %s6807_s18 }
 0x86c   : > { %3344 = vrot.lane.b32.xlu1 %v6122_v3, %s6772_s26 }
 0x86f   : > { %3022 = vrot.lane.b32.xlu0 %v6022_v51, %s6768_s29 }
 0x870   : > { %3186 = vrot.lane.b32.xlu1 %v6056_v49, %s6806_s28 }
 0x873   : > { %3582 = vrot.lane.b32.xlu0 %v6022_v51, %s6769_s0 }
 0x874   : > { %3106 = vrot.lane.b32.xlu1 %v6056_v49, %s6807_s18 }
 0x877   : > { %3502 = vrot.lane.b32.xlu0 %v6022_v51, %s6770_s23 }
 0x878   : > { %3026 = vrot.lane.b32.xlu1 %v6056_v49, %s6768_s29 }
 0x879   : > { %v3169_v17 = vpop.permute.xlu0 %3168 }
 0x87b   : > { %3422 = vrot.lane.b32.xlu0 %v6022_v51, %s6771_s25 }
 0x87c   : > { %3586 = vrot.lane.b32.xlu1 %v6056_v49, %s6769_s0 }
 0x87d   : > { %v3089_v4 = vpop.permute.xlu0 %3088 }
 0x87e   : > { %v3173_v7 = vpop.permute.xlu1 %3172 }
 0x87f   : > { %3214 = vst.msk [vmem:[#allocation3 + $0x130] sm:$0xff] %vm578_vm4, %v3173_v7  ;;  %3342 = vrot.lane.b32.xlu0 %v6022_v51, %s6772_s26 }
 0x880   : > { %3506 = vrot.lane.b32.xlu1 %v6056_v49, %s6770_s23 }
 0x881   : > { %v3009_v33 = vpop.permute.xlu0 %3008 }
 0x882   : > { %v3093_v38 = vpop.permute.xlu1 %3092 }
 0x883   : > { %3134 = vst.msk [vmem:[#allocation3 + $0xd0] sm:$0xff] %vm578_vm4, %v3093_v38  ;;  %3188 = vrot.lane.b32.xlu0 %v6043_v1, %s6806_s28 }
 0x884   : > { %3426 = vrot.lane.b32.xlu1 %v6056_v49, %s6771_s25 }
 0x885   : > { %v3569_v42 = vpop.permute.xlu0 %3568 }
 0x886   : > { %v3013_v20 = vpop.permute.xlu1 %3012 }
 0x887   : > { %3054 = vst.msk [vmem:[#allocation3 + $0x70] sm:$0xff] %vm578_vm4, %v3013_v20  ;;  %3340 = vrot.lane.b32.xlu0 %v6040_v8, %s6772_s26 }
 0x888   : > { %3190 = vrot.lane.b32.xlu1 %v6179_v6, %s6806_s28 }
 0x889   : > { %v3489_v18 = vpop.permute.xlu0 %3488 }
 0x88a   : > { %v3573_v45 = vpop.permute.xlu1 %3572 }
 0x88b   : > { %3614 = vst.msk [vmem:[#allocation3 + $0x310] sm:$0xff] %vm578_vm4, %v3573_v45  ;;  %3108 = vrot.lane.b32.xlu0 %v6043_v1, %s6807_s18 }
 0x88c   : > { %3346 = vrot.lane.b32.xlu1 %v6056_v49, %s6772_s26 }
 0x88d   : > { %v3409_v11 = vpop.permute.xlu0 %3408 }
 0x88e   : > { %v3493_v59 = vpop.permute.xlu1 %3492 }
 0x88f   : > { %3534 = vst.msk [vmem:[#allocation3 + $0x2b0] sm:$0xff] %vm578_vm4, %v3493_v59  ;;  %3330 = vrot.lane.b32.xlu0 %v6003_v53, %s6772_s26 }
 0x890   : > { %3110 = vrot.lane.b32.xlu1 %v6179_v6, %s6807_s18 }
 0x891   : > { %v3171_v13 = vpop.permute.xlu0 %3170 }
 0x892   : > { %v6194_v5 = vsel %vm634_vm12, %v3169_v17, %v3171_v13  ;;  %v6197_v30 = vsel %vm634_vm12, %v3171_v13, %v3173_v7  ;;  %v3413_v22 = vpop.permute.xlu1 %3412 }
 0x893   : > { %3454 = vst.msk [vmem:[#allocation3 + $0x250] sm:$0xff] %vm578_vm4, %v3413_v22  ;;  %3028 = vrot.lane.b32.xlu0 %v6043_v1, %s6768_s29 }
 0x894   : > { %3332 = vrot.lane.b32.xlu1 %v6028_v26, %s6772_s26 }
 0x895   : > { %v3091_v24 = vpop.permute.xlu0 %3090 }
 0x896   : > { %v6205_v27 = vsel %vm613_vm13, %v3089_v4, %v3091_v24  ;;  %v6208_v0 = vsel %vm613_vm13, %v3091_v24, %v3093_v38  ;;  %v3175_v41 = vpop.permute.xlu1 %3174 }
 0x897   : > { %3336 = vrot.lane.b32.xlu0 %v6015_v56, %s6772_s26 }
 0x898   : > { %3030 = vrot.lane.b32.xlu1 %v6179_v6, %s6768_s29 }
 0x899   : > { %v3011_v19 = vpop.permute.xlu0 %3010 }
 0x89a   : > { %v6215_v46 = vsel %vm592_vm14, %v3009_v33, %v3011_v19  ;;  %v6218_v34 = vsel %vm592_vm14, %v3011_v19, %v3013_v20  ;;  %v3095_v54 = vpop.permute.xlu1 %3094 }
 0x89b   : > { %3588 = vrot.lane.b32.xlu0 %v6043_v1, %s6769_s0 }
 0x89c   : > { %3338 = vrot.lane.b32.xlu1 %v6096_v12, %s6772_s26 }
 0x89d   : > { %v3571_v43 = vpop.permute.xlu0 %3570 }
 0x89e   : > { %v6225_v40 = vsel %vm739_vm6, %v3569_v42, %v3571_v43  ;;  %v6228_v31 = vsel %vm739_vm6, %v3571_v43, %v3573_v45  ;;  %v3015_v55 = vpop.permute.xlu1 %3014 }
 0x89f   : > { %3328 = vrot.lane.b32.xlu0 %v6010_v36, %s6772_s26 }
 0x8a0   : > { %3590 = vrot.lane.b32.xlu1 %v6179_v6, %s6769_s0 }
 0x8a1   : > { %v3491_v15 = vpop.permute.xlu0 %3490 }
 0x8a2   : > { %v6235_v21 = vsel %vm718_vm8, %v3489_v18, %v3491_v15  ;;  %v6238_v37 = vsel %vm718_vm8, %v3491_v15, %v3493_v59  ;;  %v3575_v32 = vpop.permute.xlu1 %3574 }
 0x8a3   : > { %3508 = vrot.lane.b32.xlu0 %v6043_v1, %s6770_s23 }
 0x8a4   : > { %3334 = vrot.lane.b32.xlu1 %v6038_v9, %s6772_s26 }
 0x8a5   : > { %v3411_v2 = vpop.permute.xlu0 %3410 }
 0x8a6   : > { %v6245_v14 = vsel %vm697_vm9, %v3409_v11, %v3411_v2  ;;  %v6248_v28 = vsel %vm697_vm9, %v3411_v2, %v3413_v22  ;;  %v3495_v35 = vpop.permute.xlu1 %3494 }
 0x8a7   : > { %3262 = vrot.lane.b32.xlu0 %v6022_v51, %s6774_s27 }
 0x8a8   : > { %3510 = vrot.lane.b32.xlu1 %v6179_v6, %s6770_s23 }
 0x8a9   : > { %v3177_v52 = vpop.permute.xlu0 %3176 }
 0x8aa   : > { %v6255_v44 = vsel %vm634_vm12, %v3175_v41, %v3177_v52  ;;  %v3415_v48 = vpop.permute.xlu1 %3414 }
 0x8ab   : > { %3428 = vrot.lane.b32.xlu0 %v6043_v1, %s6771_s25 }
 0x8ac   : > { %3264 = vrot.lane.b32.xlu1 %v6122_v3, %s6774_s27 }
 0x8ad   : > { %v3097_v57 = vpop.permute.xlu0 %3096 }
 0x8ae   : > { %v6264_v29 = vsel %vm613_vm13, %v3095_v54, %v3097_v57  ;;  %v3179_v10 = vpop.permute.xlu1 %3178 }
 0x8af   : > { %v6267_v60 = vsel %vm634_vm12, %v3177_v52, %v3179_v10  ;;  %3217 = vst.msk [vmem:[#allocation3 + $0x148] sm:$0xff] %vm578_vm4, %v3179_v10  ;;  %3260 = vrot.lane.b32.xlu0 %v6040_v8, %s6774_s27  ;;  %v4078_v10 = vld [vmem:[%s6725_s14] sm:$0xff] }
 0x8b0   : > { %3430 = vrot.lane.b32.xlu1 %v6179_v6, %s6771_s25  ;;  %s4724_s25 = smul.u32 12, %s6830_s22 }
 0x8b1   : > { %v3017_v47 = vpop.permute.xlu0 %3016 }
 0x8b2   : > { %v6279_v62 = vsel %vm592_vm14, %v3015_v55, %v3017_v47  ;;  %v3099_v63 = vpop.permute.xlu1 %3098  ;;  %s529_s19 = scalar_lea.vmem %s6726_s15, %s4724_s25 }
 0x8b3   : > { %v6282_v39 = vsel %vm613_vm13, %v3097_v57, %v3099_v63  ;;  %3137 = vst.msk [vmem:[#allocation3 + $0xe8] sm:$0xff] %vm578_vm4, %v3099_v63  ;;  %3348 = vrot.lane.b32.xlu0 %v6043_v1, %s6772_s26  ;;  %v3795_v63 = vld [vmem:[%s6723_s12 + $0x8] sm:$0xff] }
 0x8b4   : > { %3266 = vrot.lane.b32.xlu1 %v6056_v49, %s6774_s27 }
 0x8b5   : > { %v3577_v4 = vpop.permute.xlu0 %3576 }
 0x8b6   : > { %v6294_v7 = vsel %vm739_vm6, %v3575_v32, %v3577_v4  ;;  %v3019_v33 = vpop.permute.xlu1 %3018 }
 0x8b7   : > { %v6297_v38 = vsel %vm592_vm14, %v3017_v47, %v3019_v33  ;;  %3057 = vst.msk [vmem:[#allocation3 + $0x88] sm:$0xff] %vm578_vm4, %v3019_v33  ;;  %3250 = vrot.lane.b32.xlu0 %v6003_v53, %s6774_s27 }
 0x8b8   : > { %3350 = vrot.lane.b32.xlu1 %v6179_v6, %s6772_s26 }
 0x8b9   : > { %v3497_v18 = vpop.permute.xlu0 %3496 }
 0x8ba   : > { %v6309_v45 = vsel %vm718_vm8, %v3495_v35, %v3497_v18  ;;  %v3579_v11 = vpop.permute.xlu1 %3578 }
 0x8bb   : > { %v6312_v59 = vsel %vm739_vm6, %v3577_v4, %v3579_v11  ;;  %3617 = vst.msk [vmem:[#allocation3 + $0x328] sm:$0xff] %vm578_vm4, %v3579_v11  ;;  %3268 = vrot.lane.b32.xlu0 %v6043_v1, %s6774_s27 }
 0x8bc   : > { %3252 = vrot.lane.b32.xlu1 %v6028_v26, %s6774_s27  ;;  %v6337_v26 = vld [vmem:[%s6722_s11 + $0x4] ss:$12 sps:$4 sm:$0xff]  }
 0x8bd   : > { %v3417_v22 = vpop.permute.xlu0 %3416  ;;  %3886 = vmatprep.mubr.bf16.mxu1 %v6337_v26 }
 0x8be   : > { %v6324_v24 = vsel %vm697_vm9, %v3415_v48, %v3417_v22  ;;  %v3499_v41 = vpop.permute.xlu1 %3498  ;;  %v3797_v48 = vld [vmem:[%s6723_s12 + $0x18] sm:$0xff] }
 0x8bf   : > { %v6327_v19 = vsel %vm718_vm8, %v3497_v18, %v3499_v41  ;;  %3537 = vst.msk [vmem:[#allocation3 + $0x2c8] sm:$0xff] %vm578_vm4, %v3499_v41  ;;  %3256 = vrot.lane.b32.xlu0 %v6015_v56, %s6774_s27  ;;  %v4079_v18 = vld [vmem:[%s6725_s14 + $0x8] sm:$0xff] }
 0x8c0   : > { %3270 = vrot.lane.b32.xlu1 %v6179_v6, %s6774_s27  ;;  %v3796_v6 = vld [vmem:[%s6723_s12 + $0x10] sm:$0xff] }
 0x8c1   : > { %v3181_v55 = vpop.permute.xlu0 %3180 }
 0x8c2   : > { %v3419_v15 = vpop.permute.xlu1 %3418 }
 0x8c3   : > { %v6345_v32 = vsel %vm697_vm9, %v3417_v22, %v3419_v15  ;;  %3457 = vst.msk [vmem:[#allocation3 + $0x268] sm:$0xff] %vm578_vm4, %v3419_v15  ;;  %3248 = vrot.lane.b32.xlu0 %v6010_v36, %s6774_s27  ;;  %v3794_v36 = vld [vmem:[%s6723_s12] sm:$0xff] }
 0x8c4   : > { %3258 = vrot.lane.b32.xlu1 %v6096_v12, %s6774_s27 }
 0x8c5   : > { %v3101_v35 = vpop.permute.xlu0 %3100 }
 0x8c6   : > { %v3185_v52 = vpop.permute.xlu1 %3184 }
 0x8c7   : > { %3220 = vst.msk [vmem:[#allocation3 + $0x160] sm:$0xff] %vm578_vm4, %v3185_v52  ;;  %3810 = vperm.xlu0 %4747, %v3796_v6  }
 0x8c8   : > { %3254 = vrot.lane.b32.xlu1 %v6038_v9, %s6774_s27 }
 0x8c9   : > { %v3021_v12 = vpop.permute.xlu0 %3020 }
 0x8ca   : > { %v3105_v57 = vpop.permute.xlu1 %3104 }
 0x8cb   : > { %3140 = vst.msk [vmem:[#allocation3 + $0x100] sm:$0xff] %vm578_vm4, %v3105_v57  ;;  %3800 = vperm.xlu0 %4747, %v3794_v36  }
 0x8cc   : > { %3815 = vperm.xlu1 %4746, %v3797_v48  }
 0x8cd   : > { %v3581_v47 = vpop.permute.xlu0 %3580 }
 0x8ce   : > { %v3025_v4 = vpop.permute.xlu1 %3024 }
 0x8cf   : > { %3060 = vst.msk [vmem:[#allocation3 + $0xa0] sm:$0xff] %vm578_vm4, %v3025_v4  ;;  %4082 = vperm.xlu0 %4747, %v4078_v10  }
 0x8d0   : > { %3805 = vperm.xlu1 %4746, %v3795_v63  }
 0x8d1   : > { %v3501_v33 = vpop.permute.xlu0 %3500 }
 0x8d2   : > { %v3585_v11 = vpop.permute.xlu1 %3584 }
 0x8d3   : > { %3620 = vst.msk [vmem:[#allocation3 + $0x340] sm:$0xff] %vm578_vm4, %v3585_v11 }
 0x8d4   : > { %4087 = vperm.xlu1 %4746, %v4079_v18  }
 0x8d5   : > { %v3421_v22 = vpop.permute.xlu0 %3420 }
 0x8d6   : > { %v3505_v41 = vpop.permute.xlu1 %3504 }
 0x8d7   : > { %3540 = vst.msk [vmem:[#allocation3 + $0x2e0] sm:$0xff] %vm578_vm4, %v3505_v41 }
 0x8d9   : > { %v3183_v15 = vpop.permute.xlu0 %3182 }
 0x8da   : > { %v3196_v6 = vsel %vm634_vm12, %v3181_v55, %v3183_v15  ;;  %v3197_v36 = vsel %vm634_vm12, %v3183_v15, %v3185_v52  ;;  %v3425_v48 = vpop.permute.xlu1 %3424 }
 0x8db   : > { %3460 = vst.msk [vmem:[#allocation3 + $0x280] sm:$0xff] %vm578_vm4, %v3425_v48 }
 0x8dd   : > { %v3103_v10 = vpop.permute.xlu0 %3102 }
 0x8de   : > { %v3116_v63 = vsel %vm613_vm13, %v3101_v35, %v3103_v10  ;;  %v3117_v54 = vsel %vm613_vm13, %v3103_v10, %v3105_v57  ;;  %v3345_v2 = vpop.permute.xlu1 %3344 }
 0x8df   : > { %3380 = vst.msk [vmem:[#allocation3 + $0x220] sm:$0xff] %vm578_vm4, %v3345_v2 }
 0x8e1   : > { %v3023_v18 = vpop.permute.xlu0 %3022 }
 0x8e2   : > { %v3036_v53 = vsel %vm592_vm14, %v3021_v12, %v3023_v18  ;;  %v3037_v43 = vsel %vm592_vm14, %v3023_v18, %v3025_v4  ;;  %v3187_v42 = vpop.permute.xlu1 %3186 }
 0x8e5   : > { %v3583_v55 = vpop.permute.xlu0 %3582 }
 0x8e6   : > { %v6388_v52 = vsel %vm739_vm6, %v3581_v47, %v3583_v55  ;;  %v6391_v15 = vsel %vm739_vm6, %v3583_v55, %v3585_v11  ;;  %v3107_v13 = vpop.permute.xlu1 %3106 }
 0x8e9   : > { %v3503_v35 = vpop.permute.xlu0 %3502 }
 0x8ea   : > { %v6394_v57 = vsel %vm718_vm8, %v3501_v33, %v3503_v35  ;;  %v6397_v10 = vsel %vm718_vm8, %v3503_v35, %v3505_v41  ;;  %v3027_v3 = vpop.permute.xlu1 %3026 }
 0x8ed   : > { %v3423_v12 = vpop.permute.xlu0 %3422 }
 0x8ee   : > { %v6400_v4 = vsel %vm697_vm9, %v3421_v22, %v3423_v12  ;;  %v6403_v18 = vsel %vm697_vm9, %v3423_v12, %v3425_v48  ;;  %v3587_v47 = vpop.permute.xlu1 %3586 }
 0x8f1   : > { %v3343_v20 = vpop.permute.xlu0 %3342 }
 0x8f2   : > { %v6406_v11 = vsel %vm676_vm10, %v3343_v20, %v3345_v2  ;;  %v3507_v55 = vpop.permute.xlu1 %3506 }
 0x8f3   : > { %6808 = vst [vmem:[#allocation9_spill] sm:$0xff] %v6406_v11 }
 0x8f5   : > { %v3189_v16 = vpop.permute.xlu0 %3188 }
 0x8f6   : > { %v3198_v33 = vsel %vm634_vm12, %v3187_v42, %v3189_v16  ;;  %v6409_v17 = vpop.permute.xlu1 %3426  ;;  %v6810_v42 = vpack.c.bf16 %v6267_v60, %v6197_v30  ;;  %v6812_v60 = vpack.c.bf16 %v6282_v39, %v6208_v0  ;;  %v6814_v39 = vpack.c.bf16 %v6297_v38, %v6218_v34 }
 0x8f7   : > { %v3761_v25 = vpack.c.bf16 %v3198_v33, %v3196_v6 }
 0x8f9   : > { %v3341_v41 = vpop.permute.xlu0 %3340 }
 0x8fa   : > { %v6412_v35 = vsel %vm676_vm10, %v3341_v41, %v3343_v20  ;;  %v3191_v22 = vpop.permute.xlu1 %3190 }
 0x8fb   : > { %6809 = vst [vmem:[#allocation10_spill] sm:$0xff] %v6412_v35  ;;  %v3199_v23 = vsel %vm634_vm12, %v3189_v16, %v3191_v22  ;;  %3223 = vst.msk [vmem:[#allocation3 + $0x178] sm:$0xff] %vm578_vm4, %v3191_v22 }
 0x8fc   : > { %v3762_v48 = vpack.c.bf16 %v3199_v23, %v3197_v36  ;;  %v6811_v23 = vpack.c.bf16 %v6255_v44, %v6194_v5 }
 0x8fd   : > { %v3109_v12 = vpop.permute.xlu0 %3108 }
 0x8fe   : > { %v3118_v2 = vsel %vm613_vm13, %v3107_v13, %v3109_v12  ;;  %v6417_v11 = vpop.permute.xlu1 %3346  ;;  %3854 = vmatprep.subr.bf16.mxu1 %v3762_v48 }
 0x8ff   : > { %3855 = vmatpush1.bf16.msra.mxu1 %v3761_v25  ;;  %v3755_v6 = vpack.c.bf16 %v3118_v2, %v3116_v63  ;;  %v3743_v2 = vpack.c.bf16 %v6056_v49, %v6040_v8  ;;  %v3740_v49 = vpack.c.bf16 %v6038_v9, %v6012_v61 }
 0x900   : > { %3856 = vmatprep.subr.bf16.mxu1 %v6810_v42 }
 0x901   : > { %v3331_v20 = vpop.permute.xlu0 %3330 }
 0x902   : > { %v3111_v41 = vpop.permute.xlu1 %3110 }
 0x903   : > { %v3119_v35 = vsel %vm613_vm13, %v3109_v12, %v3111_v41  ;;  %3143 = vst.msk [vmem:[#allocation3 + $0x118] sm:$0xff] %vm578_vm4, %v3111_v41  ;;  %3857 = vmatpush1.bf16.msra.mxu1 %v6811_v23  ;;  %v3716_v23 = vld [vmem:[#allocation3 + $0x2e0] sm:$0xff] }
 0x904   : > { %v3756_v16 = vpack.c.bf16 %v3119_v35, %v3117_v54 }
 0x905   : > { %v3029_v13 = vpop.permute.xlu0 %3028 }
 0x906   : > { %v3038_v36 = vsel %vm592_vm14, %v3027_v3, %v3029_v13  ;;  %v3333_v25 = vpop.permute.xlu1 %3332  ;;  %3858 = vmatprep.subr.bf16.mxu1 %v3756_v16  ;;  %v6813_v3 = vpack.c.bf16 %v6264_v29, %v6205_v27 }
 0x907   : > { %v6429_v30 = vsel %vm676_vm10, %v3331_v20, %v3333_v25  ;;  %3374 = vst.msk [vmem:[#allocation3 + $0x1f0] sm:$0xff] %vm578_vm4, %v3333_v25  ;;  %3859 = vmatpush1.bf16.msra.mxu1 %v3755_v6  ;;  %v3749_v35 = vpack.c.bf16 %v3038_v36, %v3036_v53  ;;  %v3744_v53 = vpack.c.bf16 %v6043_v1, %v6022_v51  ;;  %v3668_v25 = vld [vmem:[#allocation3 + $0x160] sm:$0xff] }
 0x908   : > { %3860 = vmatprep.subr.bf16.mxu1 %v6812_v60  ;;  %v3741_v1 = vpack.c.bf16 %v6015_v56, %v6030_v50  ;;  %v6817_v50 = vpack.c.bf16 %v6294_v7, %v6225_v40  ;;  %v6818_v40 = vpack.c.bf16 %v6327_v19, %v6238_v37  ;;  %v6819_v60 = vpack.c.bf16 %v6309_v45, %v6235_v21  ;;  %v3710_v19 = vld [vmem:[#allocation3 + $0x2b0] sm:$0xff] }
 0x909   : > { %v3337_v33 = vpop.permute.xlu0 %3336  ;;  %v3662_v45 = vld [vmem:[#allocation3 + $0x130] sm:$0xff] }
 0x90a   : > { %v3031_v5 = vpop.permute.xlu1 %3030 }
 0x90b   : > { %v3039_v44 = vsel %vm592_vm14, %v3029_v13, %v3031_v5  ;;  %3063 = vst.msk [vmem:[#allocation3 + $0xb8] sm:$0xff] %vm578_vm4, %v3031_v5  ;;  %3861 = vmatpush1.bf16.msra.mxu1 %v6813_v3  ;;  %v3713_v13 = vld [vmem:[#allocation3 + $0x2c8] sm:$0xff] }
 0x90c   : > { %v3750_v54 = vpack.c.bf16 %v3039_v44, %v3037_v43  ;;  %v6509_v5 = vld [vmem:[%s6722_s11 + $0x20] ss:$12 sps:$4 sm:$0xff]   ;;  %v3784_v3 = vpack.c.bf16 %v3713_v13, %v3710_v19  ;;  %v3635_v19 = vld [vmem:[#allocation3 + $0x58] sm:$0xff] }
 0x90d   : > { %v3589_v63 = vpop.permute.xlu0 %3588 }
 0x90e   : > { %v3598_v22 = vsel %vm739_vm6, %v3587_v47, %v3589_v63  ;;  %v3339_v48 = vpop.permute.xlu1 %3338  ;;  %3862 = vmatprep.subr.bf16.mxu1 %v3750_v54  ;;  %v6815_v47 = vpack.c.bf16 %v6279_v62, %v6215_v46  ;;  %v6816_v46 = vpack.c.bf16 %v6312_v59, %v6228_v31  ;;  %v3665_v54 = vld [vmem:[#allocation3 + $0x148] sm:$0xff] }
 0x90f   : > { %v6442_v0 = vsel %vm676_vm10, %v3337_v33, %v3339_v48  ;;  %3377 = vst.msk [vmem:[#allocation3 + $0x208] sm:$0xff] %vm578_vm4, %v3339_v48  ;;  %3863 = vmatpush1.bf16.msra.mxu1 %v3749_v35  ;;  %v3791_v42 = vpack.c.bf16 %v3598_v22, %v6388_v52  ;;  %v6476_v52 = vld [vmem:[%s6722_s11 + $0x8] ss:$12 sps:$4 sm:$0xff]   ;;  %v6820_v22 = vpack.c.bf16 %v6345_v32, %v6248_v28 }
 0x910   : > { %3864 = vmatprep.subr.bf16.mxu1 %v6814_v39  ;;  %v3659_v39 = vld [vmem:[#allocation3 + $0x118] sm:$0xff]  ;;  %v6821_v28 = vpack.c.bf16 %v6324_v24, %v6245_v14  ;;  %v3650_v24 = vld [vmem:[#allocation3 + $0xd0] sm:$0xff] }
 0x911   : > { %v3329_v12 = vpop.permute.xlu0 %3328 }
 0x912   : > { %v6449_v27 = vsel %vm676_vm10, %v3329_v12, %v3331_v20  ;;  %v3591_v29 = vpop.permute.xlu1 %3590 }
 0x913   : > { %v3599_v43 = vsel %vm739_vm6, %v3589_v63, %v3591_v29  ;;  %3623 = vst.msk [vmem:[#allocation3 + $0x358] sm:$0xff] %vm578_vm4, %v3591_v29  ;;  %3865 = vmatpush1.bf16.msra.mxu1 %v6815_v47  ;;  %v3701_v29 = vld [vmem:[#allocation3 + $0x268] sm:$0xff]  ;;  %v3656_v47 = vld [vmem:[#allocation3 + $0x100] sm:$0xff]  ;;  %vm6660_vm6 = vmor %vm4330_vm1, %vm4331_vm2 }
 0x914   : > { %3866 = vmatprep.subr.bf16.mxu1 %v3744_v53  ;;  %v3792_v34 = vpack.c.bf16 %v3599_v43, %v6391_v15  ;;  %v3757_v32 = vpack.c.bf16 %v3659_v39, %v3656_v47  ;;  %v3725_v47 = vld [vmem:[#allocation3 + $0x328] sm:$0xff] }
 0x915   : > { %v3509_v38 = vpop.permute.xlu0 %3508 }
 0x916   : > { %v3518_v20 = vsel %vm718_vm8, %v3507_v55, %v3509_v38  ;;  %v3335_v51 = vpop.permute.xlu1 %3334  ;;  %3919 = vmatprep.subr.bf16.mxu0 %v3792_v34  ;;  %v3698_v34 = vld [vmem:[#allocation3 + $0x250] sm:$0xff] }
 0x917   : > { %v6466_v41 = vsel %vm676_vm10, %v3335_v51, %v3337_v33  ;;  %3867 = vmatpush1.bf16.msra.mxu1 %v3743_v2  ;;  %3920 = vmatpush1.bf16.msra.mxu0 %v3791_v42  ;;  %v3785_v61 = vpack.c.bf16 %v3518_v20, %v6394_v57  ;;  %v3671_v57 = vld [vmem:[#allocation3 + $0x178] sm:$0xff]  ;;  %v3778_v42 = vpack.c.bf16 %v3701_v29, %v3698_v34  ;;  %v3653_v20 = vld [vmem:[#allocation3 + $0xe8] sm:$0xff]  ;;  %v6823_v51 = vld [vmem:[#allocation10_spill] sm:$0xff] }
 0x918   : > { %3868 = vmatprep.subr.bf16.mxu1 %v3741_v1  ;;  %3921 = vmatprep.subr.bf16.mxu0 %v6816_v46  ;;  %v3763_v37 = vpack.c.bf16 %v3671_v57, %v3668_v25  ;;  %v3686_v57 = vld [vmem:[#allocation3 + $0x1f0] sm:$0xff]  ;;  %v4772_v34 = vld [vmem:[%s6722_s11 + $0x18] ss:$12 sps:$4 sm:$0xff]  }
 0x919   : > { %v3263_v8 = vpop.permute.xlu0 %3262  ;;  %v3638_v25 = vld [vmem:[#allocation3 + $0x70] sm:$0xff] }
 0x91a   : > { %v3511_v62 = vpop.permute.xlu1 %3510 }
 0x91b   : > { %v3519_v56 = vsel %vm718_vm8, %v3509_v38, %v3511_v62  ;;  %3543 = vst.msk [vmem:[#allocation3 + $0x2f8] sm:$0xff] %vm578_vm4, %v3511_v62  ;;  %3869 = vmatpush1.bf16.msra.mxu1 %v3740_v49  ;;  %3922 = vmatpush1.bf16.msra.mxu0 %v6817_v50  ;;  %v6822_v38 = vld [vmem:[#allocation9_spill] sm:$0xff]  ;;  %v3771_v49 = vpack.c.bf16 %v6442_v0, %v6429_v30  ;;  %v3647_v50 = vld [vmem:[#allocation3 + $0xb8] sm:$0xff] }
 0x91c   : > { %v3786_v31 = vpack.c.bf16 %v3519_v56, %v6397_v10  ;;  %v3754_v62 = vpack.c.bf16 %v3653_v20, %v3650_v24 }
 0x91d   : > { %v3429_v59 = vpop.permute.xlu0 %3428 }
 0x91e   : > { %v3438_v9 = vsel %vm697_vm9, %v6409_v17, %v3429_v59  ;;  %v3265_v15 = vpop.permute.xlu1 %3264  ;;  %3870 = vmatprep.subr.bf16.mxu1 %v3786_v31  ;;  %4568 = vmatmul.mubr.msk.bf16.vlgmr.msra.gmra.mxu0 %vm1593_vm7, %v6476_v52  ;;  %v3770_v31 = vpack.c.bf16 %v6466_v41, %v6449_v27  ;;  %v3641_v27 = vld [vmem:[#allocation3 + $0x88] sm:$0xff] }
 0x91f   : > { %v6490_v55 = vsel %vm655_vm11, %v3263_v8, %v3265_v15  ;;  %3300 = vst.msk [vmem:[#allocation3 + $0x1c0] sm:$0xff] %vm578_vm4, %v3265_v15  ;;  %3871 = vmatpush2.bf16.msra.mxu1 %v3785_v61  ;;  %3949 = vmatprep.mubr.bf16.mxu0 %v6788_v58  ;;  %v3779_v63 = vpack.c.bf16 %v3438_v9, %v6400_v4  ;;  %v3692_v61 = vld [vmem:[#allocation3 + $0x220] sm:$0xff]  ;;  %v3689_v15 = vld [vmem:[#allocation3 + $0x208] sm:$0xff] }
 0x920   : > { %3872 = vmatprep.subr.bf16.mxu1 %v6818_v40  ;;  %v3644_v40 = vld [vmem:[#allocation3 + $0xa0] sm:$0xff] }
 0x921   : > { %v3261_v7 = vpop.permute.xlu0 %3260 }
 0x922   : > { %v6498_v17 = vsel %vm655_vm11, %v3261_v7, %v3263_v8  ;;  %v3431_v10 = vpop.permute.xlu1 %3430  ;;  %v3719_v16 = vld [vmem:[#allocation3 + $0x2f8] sm:$0xff]  ;;  %v3751_v7 = vpack.c.bf16 %v3647_v50, %v3644_v40 }
 0x923   : > { %v3439_v6 = vsel %vm697_vm9, %v3429_v59, %v3431_v10  ;;  %3463 = vst.msk [vmem:[#allocation3 + $0x298] sm:$0xff] %vm578_vm4, %v3431_v10  ;;  %v3787_v36 = vpack.c.bf16 %v3719_v16, %v3716_v23  ;;  %3873 = vmatpush2.bf16.msra.mxu1 %v6819_v60  ;;  %v3772_v16 = vpack.c.bf16 %v3689_v15, %v3686_v57 }
 0x924   : > { %v3780_v33 = vpack.c.bf16 %v3439_v6, %v6403_v18  ;;  %v3760_v18 = vpack.c.bf16 %v3665_v54, %v3662_v45  ;;  %v3748_v60 = vpack.c.bf16 %v3641_v27, %v3638_v25  ;;  %v3629_v45 = vld [vmem:[#allocation3 + $0x28] sm:$0xff] }
 0x925   : > { %4642 = vmatprep.subr.bf16.mxu0 %v3787_v36  ;;  %v3349_v44 = vpop.permute.xlu0 %3348 }
 0x926   : > { %v3358_v35 = vsel %vm676_vm10, %v6417_v11, %v3349_v44  ;;  %v3267_v21 = vpop.permute.xlu1 %3266  ;;  %4643 = vmatpush3.bf16.msra.mxu0 %v3763_v37  ;;  %3874 = vmatprep.subr.bf16.mxu1 %v3780_v33  ;;  %v3704_v11 = vld [vmem:[#allocation3 + $0x280] sm:$0xff] }
 0x927   : > { %4644 = vmatprep.subr.bf16.mxu0 %v3784_v3  ;;  %3875 = vmatpush2.bf16.msra.mxu1 %v3779_v63  ;;  %v3773_v1 = vpack.c.bf16 %v3358_v35, %v6823_v51  ;;  %v3632_v37 = vld [vmem:[#allocation3 + $0x40] sm:$0xff]  ;;  %v3626_v35 = vld [vmem:[#allocation3 + $0x10] sm:$0xff] }
 0x928   : > { %3876 = vmatprep.subr.bf16.mxu1 %v6820_v22  ;;  %4569 = vmatmul.mubr.msk.bf16.gmra.mxu0 %vm1593_vm7, %v6509_v5  ;;  %v3745_v63 = vpack.c.bf16 %v3635_v19, %v3632_v37  ;;  %v4770_v22 = vld [vmem:[%s6722_s11 + $0x1c] ss:$12 sps:$4 sm:$0xff]   ;;  %v3742_v29 = vpack.c.bf16 %v3629_v45, %v3626_v35 }
 0x929   : > { %v3251_v48 = vpop.permute.xlu0 %3250  ;;  %3992 = vmatprep.mubr.bf16.mxu0 %v6337_v26 }
 0x92a   : > { %v3351_v4 = vpop.permute.xlu1 %3350  ;;  %4645 = vmatpush3.bf16.msra.mxu0 %v3760_v18  ;;  %v3707_v12 = vld [vmem:[#allocation3 + $0x298] sm:$0xff]  ;;  %v4767_v18 = vld [vmem:[%s6722_s11] ss:$12 sps:$4 sm:$0xff]  }
 0x92b   : > { %v3359_v53 = vsel %vm676_vm10, %v3349_v44, %v3351_v4  ;;  %3383 = vst.msk [vmem:[#allocation3 + $0x238] sm:$0xff] %vm578_vm4, %v3351_v4  ;;  %v3781_v43 = vpack.c.bf16 %v3707_v12, %v3704_v11  ;;  %3877 = vmatpush2.bf16.msra.mxu1 %v6821_v28  ;;  %v3680_v44 = vld [vmem:[#allocation3 + $0x1c0] sm:$0xff]  ;;  %v3731_v4 = vld [vmem:[#allocation3 + $0x358] sm:$0xff]  ;;  %v6824_v12 = vmov 0.0   ;;  %v3722_v28 = vld [vmem:[#allocation3 + $0x310] sm:$0xff] }
 0x92c   : > { %v3774_v2 = vpack.c.bf16 %v3359_v53, %v6822_v38  ;;  %v3728_v53 = vld [vmem:[#allocation3 + $0x340] sm:$0xff] }
 0x92d   : > { %4646 = vmatprep.subr.bf16.mxu0 %v3781_v43  ;;  %v3269_v26 = vpop.permute.xlu0 %3268  ;;  %v3793_v43 = vpack.c.bf16 %v3731_v4, %v3728_v53 }
 0x92e   : > { %v3278_v46 = vsel %vm655_vm11, %v3267_v21, %v3269_v26  ;;  %v3253_v8 = vpop.permute.xlu1 %3252  ;;  %4647 = vmatpush3.bf16.msra.mxu0 %v3757_v32  ;;  %3878 = vmatprep.subr.bf16.mxu1 %v3774_v2  ;;  %v3790_v32 = vpack.c.bf16 %v3725_v47, %v3722_v28 }
 0x92f   : > { %v3273_v14 = vsel %vm655_vm11, %v3251_v48, %v3253_v8  ;;  %3294 = vst.msk [vmem:[#allocation3 + $0x190] sm:$0xff] %vm578_vm4, %v3253_v8  ;;  %4648 = vmatprep.subr.bf16.mxu0 %v3778_v42  ;;  %3879 = vmatpush2.bf16.msra.mxu1 %v3773_v1  ;;  %v3767_v41 = vpack.c.bf16 %v3278_v46, %v6498_v17 }
 0x930   : > { %3880 = vmatprep.subr.bf16.mxu1 %v3771_v49 }
 0x931   : > { %v3257_v56 = vpop.permute.xlu0 %3256 }
 0x932   : > { %v3271_v59 = vpop.permute.xlu1 %3270  ;;  %4649 = vmatpush3.bf16.msra.mxu0 %v3754_v62  ;;  %v3695_v9 = vld [vmem:[#allocation3 + $0x238] sm:$0xff] }
 0x933   : > { %v3279_v30 = vsel %vm655_vm11, %v3269_v26, %v3271_v59  ;;  %3303 = vst.msk [vmem:[#allocation3 + $0x1d8] sm:$0xff] %vm578_vm4, %v3271_v59  ;;  %v3775_v0 = vpack.c.bf16 %v3695_v9, %v3692_v61  ;;  %3881 = vmatpush2.bf16.msra.mxu1 %v3770_v31 }
 0x934   : > { %v3768_v10 = vpack.c.bf16 %v3279_v30, %v6490_v55 }
 0x935   : > { %4650 = vmatprep.subr.bf16.mxu0 %v3775_v0  ;;  %v3249_v23 = vpop.permute.xlu0 %3248 }
 0x936   : > { %v3272_v13 = vsel %vm655_vm11, %v3249_v23, %v3251_v48  ;;  %v3259_v6 = vpop.permute.xlu1 %3258  ;;  %4651 = vmatpush3.bf16.msra.mxu0 %v3751_v7  ;;  %3882 = vmatprep.subr.bf16.mxu1 %v3768_v10  ;;  %v3674_v48 = vld [vmem:[#allocation3 + $0x190] sm:$0xff] }
 0x937   : > { %v3275_v36 = vsel %vm655_vm11, %v3257_v56, %v3259_v6  ;;  %3297 = vst.msk [vmem:[#allocation3 + $0x1a8] sm:$0xff] %vm578_vm4, %v3259_v6  ;;  %4652 = vmatprep.subr.bf16.mxu0 %v3772_v16  ;;  %3883 = vmatpush2.bf16.msra.mxu1 %v3767_v41  ;;  %vm4372_vm4 = vcmask 1041408  }
 0x938   : > { %v3765_v55 = vpack.c.bf16 %v3275_v36, %v3273_v14 }
 0x93a   : > { %v3255_v33 = vpop.permute.xlu1 %3254  ;;  %4653 = vmatpush3.bf16.msra.mxu0 %v3748_v60  ;;  %v3683_v17 = vld [vmem:[#allocation3 + $0x1d8] sm:$0xff]  ;;  %3884 = vmatprep.subr.bf16.mxu1 %v3765_v55 }
 0x93b   : > { %v3274_v3 = vsel %vm655_vm11, %v3255_v33, %v3257_v56  ;;  %v3769_v54 = vpack.c.bf16 %v3683_v17, %v3680_v44 }
 0x93c   : > { %v3764_v21 = vpack.c.bf16 %v3274_v3, %v3272_v13 }
 0x93d   : > { %4654 = vmatprep.subr.bf16.mxu0 %v3769_v54 }
 0x93e   : > { %4655 = vmatpush3.bf16.msra.mxu0 %v3745_v63  ;;  %v3677_v39 = vld [vmem:[#allocation3 + $0x1a8] sm:$0xff]  ;;  %3885 = vmatpush2.bf16.msra.mxu1 %v3764_v21 }
 0x93f   : > { %v3766_v11 = vpack.c.bf16 %v3677_v39, %v3674_v48  ;;  %4715 = vmatprep.subr.bf16.mxu1 %v6824_v12 }
 0x941   : > { %4656 = vmatprep.subr.bf16.mxu0 %v3766_v11  ;;  %3887 = vmatmul.mubr.bf16.vlgmr.msra.gmra.mxu1 %v4767_v18 }
 0x942   : > { %4657 = vmatpush3.bf16.msra.mxu0 %v3742_v29  ;;  %3896 = vmatprep.mubr.bf16.mxu1 %v4770_v22  ;;  %v3811_v56 = vpop.permute.xlu0 %3810 }
 0x943   : > { %4707 = vmatprep.subr.bf16.mxu0 %v3793_v43 }
 0x945   : > { %3993 = vmatmul.mubr.bf16.vlgmr.msra.gmra.mxu0 %v4767_v18 }
 0x946   : > { %4708 = vmatpush3.bf16.msra.mxu0 %v3793_v43  ;;  %4000 = vmatprep.mubr.bf16.mxu0 %v4770_v22  ;;  %v3801_v9 = vpop.permute.xlu0 %3800 }
 0x947   : > { %4709 = vmatprep.subr.bf16.mxu0 %v3790_v32  ;;  %v3816_v14 = vpop.permute.xlu1 %3815 }
 0x949   : > { %3897 = vmatmul.mubr.bf16.gmra.mxu1 %v4772_v34 }
 0x94a   : > { %4710 = vmatpush3.bf16.msra.mxu0 %v3790_v32  ;;  %4719 = vmatprep.mubr.msk.bf16.mxu1 %vm4811_vm5, %v6824_v12  ;;  %vm4373_vm5 = vcmask 1045508  }
 0x94b   : > { %v3806_v59 = vpop.permute.xlu1 %3805  ;;  %vm6674_vm8 = vmor %vm4372_vm4, %vm4373_vm5 }
 0x94d   : > { %4001 = vmatmul.mubr.bf16.gmra.mxu0 %v4772_v34 }
 0x94e   : > { %4711 = vmatprep.mubr.msk.bf16.mxu0 %vm1593_vm7, %v6476_v52 }
 0x955   : > { %4712 = vmatmul.mubr.msk.bf16.vlgmr.msra.gmra.mxu0 %vm1593_vm7, %v6509_v5 }
 0x956   : > { %4130 = vmatprep.mubr.bf16.mxu0 %v6788_v58 }
 0x9de   : > { %v3941_v38 = vpop.f32.mrf.mxu0 }
 0x9e0   : > { %v3943_v2 = vpop.f32.mrf.mxu0 }
 0x9e2   : > { %v3945_v26 = vpop.f32.mrf.mxu0 }
 0x9e4   : > { %v3947_v42 = vpop.f32.mrf.mxu0 }
 0x9e8   : > { %v3951_v20 = vpop.f32.mrf.mxu0 }
 0x9ea   : > { %v3953_v51 = vpop.f32.mrf.mxu0 }
 0x9ec   : > { %v3955_v1 = vpop.f32.mrf.mxu0 }
 0x9ee   : > { %v3957_v8 = vpop.f32.mrf.mxu0 }
 0xa01   : > { %v3888_v46 = vpop.f32.mrf.mxu1 }
 0xa02   : > { %v3889_v25 = vadd.f32 %v3888_v46, %v3801_v9 }
 0xa03   : > { %v3890_v49 = vpop.f32.mrf.mxu1 }
 0xa04   : > { %v3891_v57 = vadd.f32 %v3890_v49, %v3801_v9  ;;  %v3942_v18 = vadd.f32 %v3941_v38, %v3889_v25 }
 0xa05   : > { %v4658_v24 = vpop.f32.mrf.mxu0  ;;  %v3892_v62 = vpop.f32.mrf.mxu1 }
 0xa06   : > { %v3893_v23 = vadd.f32 %v3892_v62, %v3806_v59  ;;  %v3944_v37 = vadd.f32 %v3943_v2, %v3891_v57  ;;  %v4058_v2 = vmax.f32 %v3942_v18, 0.0  ;;  %v4773_v62 = vld [vmem:[%s6724_s13] sm:$0xff]  }
 0xa07   : > { %v4659_v52 = vpop.f32.mrf.mxu0  ;;  %v3894_v50 = vpop.f32.mrf.mxu1 }
 0xa08   : > { %v3895_v15 = vadd.f32 %v3894_v50, %v3806_v59  ;;  %v3946_v44 = vadd.f32 %v3945_v26, %v3893_v23  ;;  %v4660_v45 = vadd.f32 %v4659_v52, %v4658_v24  ;;  %v4059_v39 = vmax.f32 %v3944_v37, 0.0 }
 0xa09   : > { %v4661_v31 = vpop.f32.mrf.mxu0  ;;  %v3898_v5 = vpop.f32.mrf.mxu1 }
 0xa0a   : > { %v3899_v0 = vadd.f32 %v3898_v5, %v3811_v56  ;;  %v3948_v41 = vadd.f32 %v3947_v42, %v3895_v15  ;;  %v4061_v53 = vmax.f32 %v3946_v44, 0.0  ;;  %v3995_v42 = vadd.f32 %v4660_v45, %v3801_v9  ;;  %v4582_v9 = vld [vmem:[%s6713_s2 + $0x24] sm:$0x77]  ;;  %v4583_v44 = vld [vmem:[%s6713_s2 + $0x2c] sm:$0x7] }
 0xa0b   : > { %v4662_v58 = vpop.f32.mrf.mxu0  ;;  %v3900_v61 = vpop.f32.mrf.mxu1 }
 0xa0c   : > { %v3901_v40 = vadd.f32 %v3900_v61, %v3811_v56  ;;  %v3952_v60 = vadd.f32 %v3951_v20, %v3899_v0  ;;  %v4062_v54 = vmax.f32 %v3948_v41, 0.0  ;;  %v4663_v4 = vadd.f32 %v4662_v58, %v4661_v31  ;;  %v4083_v31 = vpop.permute.xlu0 %4082  ;;  %v4580_v61 = vld [vmem:[%s6713_s2 + $0x18] sm:$0x77] }
 0xa0d   : > { %v4664_v30 = vpop.f32.mrf.mxu0  ;;  %v3902_v7 = vpop.f32.mrf.mxu1  ;;  %v4072_v38 = vpack.c.bf16 %v4061_v53, %v4058_v2 }
 0xa0e   : > { %v3903_v10 = vadd.f32 %v3902_v7, %v3816_v14  ;;  %v3954_v13 = vadd.f32 %v3953_v51, %v3901_v40  ;;  %v4064_v22 = vmax.f32 %v3952_v60, 0.0  ;;  %v4073_v34 = vpack.c.bf16 %v4062_v54, %v4059_v39 }
 0xa0f   : > { %v4665_v16 = vpop.f32.mrf.mxu0  ;;  %v3904_v27 = vpop.f32.mrf.mxu1  ;;  %v3998_v51 = vadd.f32 %v4663_v4, %v3806_v59  ;;  %v4207_v59 = vld [vmem:[%s6713_s2] sm:$0x77] }
 0xa10   : > { %v3956_v6 = vadd.f32 %v3955_v1, %v3903_v10  ;;  %v3905_v36 = vadd.f32 %v3904_v27, %v3816_v14  ;;  %v4666_v19 = vadd.f32 %v4665_v16, %v4664_v30  ;;  %v4065_v63 = vmax.f32 %v3954_v13, 0.0  ;;  %v4088_v10 = vpop.permute.xlu1 %4087  ;;  %v4208_v13 = vld [vmem:[%s6713_s2 + $0x8] sm:$0x7] }
 0xa11   : > { %v4667_v55 = vpop.f32.mrf.mxu0  ;;  %v6582_v40 = vsub.f32 %v4580_v61, %v4207_v59 }
 0xa12   : > { %v3958_v33 = vadd.f32 %v3957_v8, %v3905_v36  ;;  %v4067_v3 = vmax.f32 %v3956_v6, 0.0  ;;  %v4003_v11 = vadd.f32 %v4666_v19, %v3811_v56  ;;  %v4581_v6 = vld [vmem:[%s6713_s2 + $0x20] sm:$0x7] }
 0xa13   : > { %v4668_v17 = vpop.f32.mrf.mxu0  ;;  %v4222_v25 = vmul.f32 0.5, %v6582_v40  ;;  %v6610_v54 = vsub.f32 %v4581_v6, %v4208_v13 }
 0xa14   : > { %v4669_v35 = vadd.f32 %v4668_v17, %v4667_v55  ;;  %v4068_v21 = vmax.f32 %v3958_v33, 0.0  ;;  %v4075_v43 = vpack.c.bf16 %v4067_v3, %v4064_v22  ;;  %v4579_v33 = vld [vmem:[%s6713_s2 + $0x14] sm:$0x7] }
 0xa15   : > { %v4713_v48 = vpop.f32.mrf.mxu0  ;;  %v4224_v45 = vadd.f32 %v4222_v25, %v4207_v59  ;;  %v6612_v22 = vsub.f32 %v4583_v44, %v4579_v33  ;;  %v4223_v4 = vmul.f32 0.5, %v6610_v54 }
 0xa16   : > { %v4076_v29 = vpack.c.bf16 %v4068_v21, %v4065_v63  ;;  %v4052_v28 = vadd.f32 %v4713_v48, %v4003_v11  ;;  %v4006_v32 = vadd.f32 %v4669_v35, %v3816_v14 }
 0xa17   : > { %v4043_v47 = vpop.f32.mrf.mxu0  ;;  %v4247_v53 = vcombine.high %v4224_v45, %v4224_v45  ;;  %v4262_v61 = vrot.slane %v6612_v22, 2 }
 0xa18   : > { %4110 = vmatprep.subr.bf16.mxu0 %v4076_v29  ;;  %v4066_v46 = vmax.f32 %v4052_v28, 0.0  ;;  %v4044_v8 = vadd.f32 %v4043_v47, %v3995_v42  ;;  %v4235_v29 = vcombine.high %v6582_v40, %v6582_v40  ;;  %v4236_v28 = vrot.slane %v6582_v40, 5 }
 0xa19   : > { %v4714_v26 = vpop.f32.mrf.mxu0  ;;  %4111 = vmatpush1.bf16.msra.mxu0 %v4075_v43  ;;  %v4227_v43 = vmul.f32 0.5, %v6612_v22 }
 0xa1a   : > { %v4055_v20 = vadd.f32 %v4714_v26, %v4006_v32  ;;  %4112 = vmatprep.subr.bf16.mxu0 %v4073_v34  ;;  %v4060_v52 = vmax.f32 %v4044_v8, 0.0  ;;  %v4225_v26 = vadd.f32 %v4223_v4, %v4208_v13 }
 0xa1b   : > { %v4046_v1 = vpop.f32.mrf.mxu0 }
 0xa1c   : > { %v4069_v49 = vmax.f32 %v4055_v20, 0.0  ;;  %v4047_v24 = vadd.f32 %v4046_v1, %v3998_v51  ;;  %v4248_v51 = vrot.slane %v4224_v45, 5  ;;  %v4237_v1 = vrot.slane %v4235_v29, 5 }
 0xa1d   : > { %4113 = vmatpush1.bf16.msra.mxu0 %v4072_v38 }
 0xa1e   : > { %v4077_v14 = vpack.c.bf16 %v4069_v49, %v4066_v46  ;;  %v4063_v56 = vmax.f32 %v4047_v24, 0.0  ;;  %v4249_v46 = vrot.slane %v4247_v53, 5  ;;  %v4229_v49 = vadd.f32 %v4579_v33, %v4227_v43 }
 0xa20   : > { %4716 = vmatpush3.bf16.msra.mxu1 %v4077_v14  ;;  %4573 = vmatmul.mubr.msk.bf16.vlgmr.msra.gmra.mxu0 %vm1593_vm7, %v4773_v62  ;;  %v4074_v50 = vpack.c.bf16 %v4063_v56, %v4060_v52  ;;  %v4238_v52 = vrot.slane %v6610_v54, 5 }
 0xa21   : > { %4717 = vmatprep.subr.bf16.mxu1 %v6824_v12  ;;  %v4578_v12 = vld [vmem:[%s6713_s2 + $0xc] sm:$0x77] }
 0xa22   : > { %v6584_v57 = vsub.f32 %v4582_v9, %v4578_v12 }
 0xa24   : > { %4718 = vmatpush3.bf16.msra.mxu1 %v4074_v50  ;;  %v4226_v55 = vmul.f32 0.5, %v6584_v57  ;;  %v4259_v32 = vcombine.high %v6584_v57, %v6584_v57  ;;  %v4260_v42 = vrot.slane %v6584_v57, 2  ;;  %v4250_v50 = vrot.slane %v4225_v26, 5 }
 0xa25   : > { %v4302_v59 = vcombine.low %v6584_v57, %v6584_v57 }
 0xa26   : > { %v4228_v48 = vadd.f32 %v4578_v12, %v4226_v55  ;;  %v4261_v14 = vrot.slane %v4259_v32, 2  ;;  %v4295_v12 = vrot.slane %v6610_v54, 7 }
 0xa27   : > { %4720 = vmatmul.mubr.msk.bf16.vlgmr.msra.gmra.mxu1 %vm1593_vm7, %v4773_v62 }
 0xa28   : > { %v4274_v34 = vcombine.high %v4228_v48, %v4228_v48  ;;  %v4275_v8 = vrot.slane %v4228_v48, 2 }
 0xa2a   : > { %v4276_v56 = vrot.slane %v4274_v34, 2 }
 0xae0   : > { %v4132_v5 = vpop.f32.mrf.mxu0 }
 0xae1   : > { %v6568_v58 = vadd.f32 %v4132_v5, %v4083_v31  ;;  %v4293_v5 = vrot.slane %v6582_v40, 7 }
 0xae2   : > { %v4134_v15 = vpop.f32.mrf.mxu0 }
 0xae3   : > { %v4575_v30 = vmul.f32 -1.442695, %v6568_v58  ;;  %v6580_v0 = vadd.f32 %v4134_v15, %v4083_v31  ;;  %v4242_v24 = vmul.f32 %v4236_v28, %v6568_v58  ;;  %v4294_v15 = vrot.slane %v4235_v29, 7 }
 0xae4   : > { %v4136_v7 = vpop.f32.mrf.mxu0 }
 0xae5   : > { %4774 = vpow2.f32 %v4575_v30  ;;  %v4576_v23 = vmul.f32 -1.442695, %v6580_v0  ;;  %v6587_v16 = vadd.f32 %v4136_v7, %v4088_v10  ;;  %v4243_v9 = vmul.f32 %v4237_v1, %v6580_v0 }
 0xae6   : > { %v4138_v27 = vpop.f32.mrf.mxu0  ;;  %v4277_v30 = vrot.slane %v4229_v49, 2  ;;  %v4267_v40 = vmul.f32 %v4261_v14, %v6580_v0 }
 0xae7   : > { %v4175_v41 = vpop.f32.mrf.mxu1  ;;  %4776 = vpow2.f32 %v4576_v23  ;;  %v6595_v36 = vadd.f32 %v4138_v27, %v4088_v10  ;;  %v4230_v37 = vmin.f32 %v6587_v16, 4.1351666  ;;  %v4269_v23 = vmul.f32 %v4260_v42, %v6587_v16 }
 0xae8   : > { %v6598_v60 = vadd.f32 %v4175_v41, %v4083_v31  ;;  %v4266_v31 = vmul.f32 %v4260_v42, %v6568_v58  ;;  %v4303_v58 = vcombine.low %v6612_v22, %v6612_v22  ;;  %v4255_v16 = vadd.f32 %v4249_v46, %v4243_v9 }
 0xae9   : > { %v4721_v19 = vpop.f32.mrf.mxu1  ;;  %v4231_v17 = vmin.f32 %v6595_v36, 4.1351666  ;;  %v4287_v63 = vmul.f32 1.442695, %v4230_v37  ;;  %v4270_v25 = vmul.f32 %v4261_v14, %v6595_v36 }
 0xaea   : > { %v4577_v3 = vmul.f32 -1.442695, %v6598_v60  ;;  %v4244_v13 = vmul.f32 %v4238_v52, %v6598_v60  ;;  %v4281_v6 = vadd.f32 %v4275_v8, %v4266_v31  ;;  %v4268_v33 = vmul.f32 %v4262_v61, %v6598_v60 }
 0xaeb   : > { %v4178_v35 = vpop.f32.mrf.mxu1  ;;  %v4289_v21 = vmul.f32 1.442695, %v4231_v17 }
 0xaec   : > { %4778 = vpow2.f32 %v4577_v3  ;;  %v4179_v18 = vadd.f32 %v4178_v35, %v4088_v10  ;;  %v4254_v10 = vadd.f32 %v4248_v51, %v4242_v24  ;;  %v6639_v3 = vadd.f32 %v4275_v8, %v4269_v23 }
 0xaed   : > { %4780 = vpow2.f32 %v4287_v63  ;;  %v4722_v39 = vpop.f32.mrf.mxu1  ;;  %v4282_v35 = vadd.f32 %v4276_v56, %v4267_v40  ;;  %v4256_v36 = vadd.f32 %v4250_v50, %v4244_v13 }
 0xaee   : > { %v4232_v11 = vmin.f32 %v4179_v18, 4.1351666  ;;  %4782 = vpow2.f32 %v4289_v21  ;;  %v4271_v44 = vmul.f32 %v4262_v61, %v4179_v18  ;;  %v6641_v21 = vadd.f32 %v4276_v56, %v4270_v25 }
 0xaef   : > { %v4283_v39 = vadd.f32 %v4277_v30, %v4268_v33 }
 0xaf0   : > { %v4291_v47 = vmul.f32 1.442695, %v4232_v11  ;;  %v4286_v4 = vadd.f32 %v4277_v30, %v4271_v44 }
 0xaf2   : > { %v4775_v2 = vpop.eup %4774  ;;  %4784 = vpow2.f32 %v4291_v47 }
 0xaf3   : > { %v4191_v20 = vadd.f32 1.0, %v4775_v2 }
 0xaf4   : > { %v4777_v38 = vpop.eup %4776 }
 0xaf5   : > { %v4192_v62 = vadd.f32 1.0, %v4777_v38  ;;  %4786 = vrcp.f32 %v4191_v20 }
 0xaf7   : > { %4788 = vrcp.f32 %v4192_v62 }
 0xaf9   : > { %v4779_v7 = vpop.eup %4778 }
 0xafa   : > { %v4781_v27 = vpop.eup %4780  ;;  %v4193_v41 = vadd.f32 1.0, %v4779_v7 }
 0xafb   : > { %v4783_v55 = vpop.eup %4782  ;;  %v4299_v37 = vmul.f32 %v4781_v27, %v4293_v5  ;;  %v4306_v19 = vmul.f32 %v4781_v27, %v4302_v59 }
 0xafc   : > { %4790 = vrcp.f32 %v4193_v41  ;;  %v4300_v17 = vmul.f32 %v4783_v55, %v4294_v15  ;;  %v4307_v0 = vmul.f32 %v4783_v55, %v6584_v57 }
 0xafd   : > { %v4309_v54 = vmul.f32 0.5, %v4299_v37  ;;  %v4345_v63 = vmul.f32 0.5, %v4306_v19 }
 0xafe   : > { %v4310_v45 = vmul.f32 0.5, %v4300_v17  ;;  %v4346_v22 = vmul.f32 0.5, %v4307_v0 }
 0xaff   : > { %v4785_v60 = vpop.eup %4784  ;;  %v4315_v18 = vrot.slane %v4309_v54, 6  ;;  %v4351_v48 = vrot.slane %v4345_v63, 6 }
 0xb00   : > { %v4301_v11 = vmul.f32 %v4785_v60, %v4295_v12  ;;  %v4308_v29 = vmul.f32 %v4785_v60, %v4303_v58  ;;  %v4316_v57 = vrot.slane %v4310_v45, 6  ;;  %v4352_v53 = vrot.slane %v4346_v22, 6 }
 0xb01   : > { %v4321_v43 = vsub.f32 %v4254_v10, %v4315_v18  ;;  %v4357_v47 = vsub.f32 %v4281_v6, %v4351_v48  ;;  %v4360_v28 = vsub.f32 %v6639_v3, %v4351_v48  ;;  %v6645_v32 = vadd.f32 %v4315_v18, %v4254_v10 }
 0xb02   : > { %v6647_v34 = vadd.f32 %v4351_v48, %v4281_v6  ;;  %v6650_v2 = vadd.f32 %v4351_v48, %v6639_v3  ;;  %v4311_v26 = vmul.f32 0.5, %v4301_v11  ;;  %v4347_v42 = vmul.f32 0.5, %v4308_v29  ;;  %v4787_v20 = vpop.eup %4786 }
 0xb03   : > { %v4322_v51 = vsub.f32 %v4255_v16, %v4316_v57  ;;  %v4358_v38 = vsub.f32 %v4282_v35, %v4352_v53  ;;  %v4361_v1 = vsub.f32 %v6641_v21, %v4352_v53  ;;  %v4389_v46 = vadd.f32 %v4316_v57, %v4255_v16 }
 0xb04   : > { %v4789_v8 = vpop.eup %4788  ;;  %v4317_v49 = vrot.slane %v4311_v26, 6  ;;  %v4353_v24 = vrot.slane %v4347_v42, 6  ;;  %v4411_v62 = vadd.f32 %v4352_v53, %v4282_v35  ;;  %v4414_v14 = vadd.f32 %v4352_v53, %v6641_v21 }
 0xb05   : > { %v4202_v56 = vcombine.low %v4787_v20, %v4789_v8  ;;  %v4327_v52 = vcombine.low %v4321_v43, %v4322_v51  ;;  %v4328_v50 = vcombine.high %v4321_v43, %v4322_v51  ;;  %v4369_v31 = vcombine.high %v4357_v47, %v4358_v38 }
 0xb06   : > { %v4323_v5 = vsub.f32 %v4256_v36, %v4317_v49  ;;  %v4359_v59 = vsub.f32 %v4283_v39, %v4353_v24  ;;  %v4362_v61 = vsub.f32 %v4286_v4, %v4353_v24  ;;  %v4390_v12 = vadd.f32 %v4317_v49, %v4256_v36 }
 0xb07   : > { %4204 = vst [vmem:[%s529_s19] sm:$0x77] %v4202_v56  ;;  %v4412_v15 = vadd.f32 %v4353_v24, %v4283_v39  ;;  %v4415_v30 = vadd.f32 %v4353_v24, %v4286_v4  ;;  %v4584_v7 = vrot.slane %v4327_v52, 11  ;;  %v4335_v10 = vrot.slane %v4328_v50, 7 }
 0xb08   : > { %v4329_v23 = vcombine.high %v4323_v5, %v4323_v5  ;;  %v4585_v58 = vrot.slane %v4323_v5, 11  ;;  %v4370_v40 = vcombine.high %v4359_v59, %v4359_v59  ;;  %v4381_v27 = vrot.slane %v4362_v61, 6 }
 0xb09   : > { %v4791_v41 = vpop.eup %4790  ;;  %v4396_v13 = vcombine.high %v4390_v12, %v4390_v12  ;;  %v4591_v6 = vrot.slane %v4390_v12, 11  ;;  %v4423_v25 = vcombine.high %v4412_v15, %v4412_v15  ;;  %v4431_v55 = vrot.slane %v4415_v30, 6 }
 0xb0a   : > { %4206 = vst.msk [vmem:[%s529_s19 + $0x8] sm:$0x7] %vm4205_vm3, %v4791_v41  ;;  %v4339_v37 = vrot.slane %v4329_v23, 7  ;;  %v4587_v19 = vrot.slane %v4370_v40, 10  ;;  %v4336_v33 = vsel %vm6660_vm6, %v4584_v7, %v4335_v10  ;;  %v4371_v44 = vcombine.low %v4360_v28, %v4361_v1 }
 0xb0b   : > { %v4403_v17 = vrot.slane %v4396_v13, 7  ;;  %v4595_v0 = vrot.slane %v4423_v25, 10  ;;  %4343 = vst [vmem:[%s6667_s24] sm:$0x77] %v4336_v33  ;;  %v4586_v3 = vrot.slane %v4369_v31, 10  ;;  %v4394_v54 = vcombine.low %v6645_v32, %v4389_v46 }
 0xb0c   : > { %v4340_v63 = vsel %vm6660_vm6, %v4585_v58, %v4339_v37  ;;  %v4382_v35 = vsel %vm6674_vm8, %v4587_v19, %v4381_v27  ;;  %v4377_v36 = vrot.slane %v4371_v44, 6  ;;  %v4395_v21 = vcombine.high %v6645_v32, %v4389_v46 }
 0xb0d   : > { %4344 = vst.msk [vmem:[%s6667_s24 + $0x8] sm:$0x7] %vm4205_vm3, %v4340_v63  ;;  %4589 = vst.msk [vmem:[%s6667_s24 + $0x14] sm:$0x7] %vm4205_vm3, %v4382_v35  ;;  %v4404_v45 = vsel %vm6660_vm6, %v4591_v6, %v4403_v17  ;;  %v4432_v22 = vsel %vm6674_vm8, %v4595_v0, %v4431_v55  ;;  %v4590_v60 = vrot.slane %v4394_v54, 11  ;;  %v4422_v18 = vcombine.high %v6647_v34, %v4411_v62 }
 0xb0e   : > { %4593 = vst.msk [vmem:[%s6667_s24 + $0x20] sm:$0x7] %vm4205_vm3, %v4404_v45  ;;  %4597 = vst.msk [vmem:[%s6667_s24 + $0x2c] sm:$0x7] %vm4205_vm3, %v4432_v22  ;;  %v4378_v48 = vsel %vm6674_vm8, %v4586_v3, %v4377_v36  ;;  %v4399_v39 = vrot.slane %v4395_v21, 7  ;;  %v4424_v4 = vcombine.low %v6650_v2, %v4414_v14 }
 0xb0f   : > { %4588 = vst [vmem:[%s6667_s24 + $0xc] sm:$0x77] %v4378_v48  ;;  %v4594_v11 = vrot.slane %v4422_v18, 10 }
 0xb10   : > { %v4400_v29 = vsel %vm6660_vm6, %v4590_v60, %v4399_v39  ;;  %v4427_v57 = vrot.slane %v4424_v4, 6 }
 0xb11   : > { %4592 = vst [vmem:[%s6667_s24 + $0x18] sm:$0x77] %v4400_v29 }
 0xb12   : > { %v4428_v53 = vsel %vm6674_vm8, %v4594_v11, %v4427_v57 }
 0xb13   : > { %4596 = vst [vmem:[%s6667_s24 + $0x24] sm:$0x77] %v4428_v53 }
 0xb14 PF: > { %s27_s21 = sadd.s32 1, %s4798_s21  }
 0xb15   : > { %p24_p4 = scmp.ge.s32.totalorder %s27_s21, 4  }
 0xb17   :  { %26 = sbr.rel (!%p24_p4) target bundleno = 2 (0x2), region = 128 }

</bundles_post_ra>
